<compile_context>
chip_gen: v7x
topology: tpu7x:2x2x1
jax: 0.10.0
libtpu: 0.0.40
codegen_flags: <defaults>
</compile_context>

<pallas_src>
import functools

import jax
import jax.numpy as jnp
import numpy as np
from jax.experimental import pallas as pl
from jax.experimental.pallas import tpu as pltpu


def _round_up(v, m):
    return (v + m - 1) // m * m


def _sep_conv3d_kernel(x_ref, w_ref, b_ref, o_ref, patch_ref, *, taps, C):
    """One grid step = one batch element (the whole T-frame sequence).

    x_ref:     (C, L_ext)      f32 flattened [cache, frame_0..frame_{T-1}]; each
                               frame spatially zero-padded to Hp*Wp, lane-padded
                               to S_pad (multiple of 128); 128-lane zero margins
                               on both ends of the sequence.
    w_ref:     (O, 18*C)       f32 combined conv2d/conv3d weight, contraction
                               column order (kt, dy, dx, c); kt=0 -> prev frame.
    b_ref:     (O, 1)          f32 combined bias.
    o_ref:     (O, T*S_pad)    f32 lane-dense output on the padded grid.
    patch_ref: (18*C, T*S_pad) f32 VMEM scratch (im2col patch).
    """
    n = o_ref.shape[-1]  # T * S_pad, multiple of 128

    # im2col for the WHOLE sequence: 18 statically-shifted views of the input,
    # staged into VMEM scratch at static row offsets (no concat, no casts).
    for i, off in enumerate(taps):
        patch_ref[i * C:(i + 1) * C, :] = x_ref[:, off:off + n]

    # Single MXU matmul per batch element: (O, 18C) x (18C, T*S_pad), f32 acc.
    acc = jnp.dot(w_ref[...], patch_ref[...], preferred_element_type=jnp.float32)

    # Columns at padded positions hold garbage by design (wrapper discards them).
    o_ref[...] = acc + b_ref[...]


def sep_conv3d_forward(x_ncthw, cache_ncthw, params):
    """PyTorch-equivalent Sep_Conv3d.forward (kernel=3, stride=1, padding=1, t_c=1).

    x_ncthw:     (B, C_in, T, H, W)
    cache_ncthw: (B, C_in, 1, H, W)   (required: T > 1 causal path)
    returns:     (B, out_dim_2d + out_dim_3d, T, H, W)  float32
    """
    w2, b2, w3, b3 = params["w2d"], params["b2d"], params["w3d"], params["b3d"]
    B, C, T, H, W = x_ncthw.shape
    assert T > 1 and cache_ncthw is not None, "only the T>1 causal cache path"
    O2 = w2.shape[0]                  # torch Conv2d weight: (O2, C, 3, 3)
    O3 = w3.shape[0]                  # torch Conv3d weight: (O3, C, 3, 3, 3)
    O = O2 + O3
    Hp, Wp = H + 2, W + 2
    S = Hp * Wp                       # padded frame size (flattened)
    S_pad = _round_up(S, 128)         # lane-dense per-frame stride
    N = T * S_pad                     # lane-dense output length per batch elem
    margin = 128                      # lane-aligned; must cover the max tap shift
    assert margin >= Wp + 1
    L_ext = margin + (T + 1) * S_pad + margin      # multiple of 128

    # ---- layout: [cache, frame_0 .. frame_{T-1}] -> spatial zero-pad ->
    #      flatten -> per-frame lane pad to S_pad -> 128-lane sequence margins --
    x_all = jnp.concatenate([cache_ncthw, x_ncthw], axis=2)            # (B,C,T+1,H,W)
    x_all = jnp.pad(x_all, ((0, 0), (0, 0), (0, 0), (1, 1), (1, 1)))   # spatial pad
    x_all = x_all.reshape(B, C, T + 1, S)
    x_all = jnp.pad(x_all, ((0, 0), (0, 0), (0, 0), (0, S_pad - S)))   # lane pad
    x_ext = jnp.pad(x_all.reshape(B, C, (T + 1) * S_pad),
                    ((0, 0), (0, 0), (margin, margin))).astype(jnp.float32)

    # ---- combined weight (O, 18C), column order (kt, dy, dx, c). kt=0 -> prev
    #      frame, kt=1 -> current frame; the conv3d kt=2 tap only multiplies
    #      zeros on this path and is dropped (exact).  72 of the 144 columns are
    #      zero for the 2D output rows; left as-is while the MXU has slack. ----
    w_full = jnp.zeros((O, 2, 3, 3, C), jnp.float32)
    w_full = w_full.at[:O2, 1].set(jnp.transpose(w2, (0, 2, 3, 1)))
    w_full = w_full.at[O2:, 0].set(jnp.transpose(w3[:, :, 0], (0, 2, 3, 1)))
    w_full = w_full.at[O2:, 1].set(jnp.transpose(w3[:, :, 1], (0, 2, 3, 1)))
    w_t = w_full.reshape(O, 18 * C).astype(jnp.float32)
    b_all = jnp.concatenate([b2, b3]).reshape(O, 1).astype(jnp.float32)

    # Static lane offsets of the 18 (kt, dy, dx) taps for the whole sequence.
    taps = tuple(margin + kt * S_pad + (dy - 1) * Wp + (dx - 1)
                 for kt in range(2) for dy in range(3) for dx in range(3))

    kernel = functools.partial(_sep_conv3d_kernel, taps=taps, C=C)

    out_flat = pl.pallas_call(
        kernel,
        out_shape=jax.ShapeDtypeStruct((B, O, N), jnp.float32),
        grid_spec=pltpu.PrefetchScalarGridSpec(
            num_scalar_prefetch=0,
            grid=(B,),
            in_specs=[
                pl.BlockSpec((None, C, L_ext), lambda b: (b, 0, 0)),
                pl.BlockSpec((O, 18 * C), lambda b: (0, 0)),
                pl.BlockSpec((O, 1), lambda b: (0, 0)),
            ],
            out_specs=pl.BlockSpec((None, O, N), lambda b: (b, 0, 0)),
            scratch_shapes=[pltpu.VMEM((18 * C, N), jnp.float32)],
        ),
        compiler_params=pltpu.CompilerParams(
            dimension_semantics=("parallel",),
            vmem_limit_bytes=32 * 1024 * 1024),
    )(x_ext, w_t, b_all)

    # Only un-padded positions are valid: drop lane padding, then the spatial
    # border rows/cols.  Channels are already in NCTHW position (2D then 3D).
    y = out_flat.reshape(B, O, T, S_pad)[:, :, :, :S]
    y = y.reshape(B, O, T, Hp, Wp)[:, :, :, 1:H + 1, 1:W + 1]
    return y


# ---------------- pure-JAX reference (for correctness check) ----------------
def _conv2d_nchw(x, w, b):
    y = jax.lax.conv_general_dilated(
        x, w, window_strides=(1, 1), padding=((1, 1), (1, 1)),
        dimension_numbers=("NCHW", "OIHW", "NCHW"),
        precision=jax.lax.Precision.HIGHEST)
    return y + b[None, :, None, None]


def sep_conv3d_reference(x, cache, params):
    w2, b2, w3, b3 = params["w2d"], params["b2d"], params["w3d"], params["b3d"]
    B, C, T, H, W = x.shape
    O2, O3 = w2.shape[0], w3.shape[0]
    cur = jnp.transpose(x, (0, 2, 1, 3, 4)).reshape(B * T, C, H, W)
    prev5 = jnp.concatenate([cache, x[:, :, :-1]], axis=2)
    prev = jnp.transpose(prev5, (0, 2, 1, 3, 4)).reshape(B * T, C, H, W)

    y2 = _conv2d_nchw(cur, w2, b2)
    y3 = (_conv2d_nchw(prev, w3[:, :, 0], jnp.zeros_like(b3))
          + _conv2d_nchw(cur, w3[:, :, 1], b3))            # kt=2 tap sees zeros

    y2 = jnp.transpose(y2.reshape(B, T, O2, H, W), (0, 2, 1, 3, 4))
    y3 = jnp.transpose(y3.reshape(B, T, O3, H, W), (0, 2, 1, 3, 4))
    return jnp.concatenate([y2, y3], axis=1)


if __name__ == "__main__":
    # Small config: in_dim_2d=4, in_dim_3d=4, out_dim_2d=8, out_dim_3d=8,
    # kernel=3, stride=1, padding=1, t_c=1.
    B, T, H, W = 2, 8, 16, 16
    in_dim_2d, in_dim_3d = 4, 4
    out_dim_2d, out_dim_3d = 8, 8
    C = in_dim_2d + in_dim_3d

    key = jax.random.PRNGKey(0)
    kx, kc, kw2, kb2, kw3, kb3 = jax.random.split(key, 6)

    x = jax.random.normal(kx, (B, C, T, H, W), jnp.float32)
    cache_x = jax.random.normal(kc, (B, C, 1, H, W), jnp.float32)

    params = {
        "w2d": 0.1 * jax.random.normal(kw2, (out_dim_2d, C, 3, 3), jnp.float32),
        "b2d": 0.1 * jax.random.normal(kb2, (out_dim_2d,), jnp.float32),
        "w3d": 0.1 * jax.random.normal(kw3, (out_dim_3d, C, 3, 3, 3), jnp.float32),
        "b3d": 0.1 * jax.random.normal(kb3, (out_dim_3d,), jnp.float32),
    }

    fwd = jax.jit(sep_conv3d_forward)
    out = jax.block_until_ready(fwd(x, cache_x, params))
    assert out.shape == (B, out_dim_2d + out_dim_3d, T, H, W), out.shape

    ref = jax.block_until_ready(sep_conv3d_reference(x, cache_x, params))
    # Everything is carried in f32 now (no bf16 round-trip); tolerance only
    # covers the MXU's default-precision matmul passes vs the HIGHEST-precision
    # XLA reference convs.
    np.testing.assert_allclose(np.asarray(out), np.asarray(ref),
                               rtol=2e-2, atol=3e-2)

    print("KERNEL_OK")
</pallas_src>

<mosaic_0001>
module attributes {stable_mosaic.version = 11 : i64} {
  func.func @_sep_conv3d_kernel(%arg0: i32, %arg1: memref<1x8x3712xf32, #tpu.memory_space<vmem>>, %arg2: memref<16x144xf32, #tpu.memory_space<vmem>>, %arg3: memref<16x1xf32, #tpu.memory_space<vmem>>, %arg4: memref<1x16x3072xf32, #tpu.memory_space<vmem>>, %arg5: memref<144x3072xf32, #tpu.memory_space<vmem>>) attributes {dimension_semantics = [#tpu.dimension_semantics<parallel>], iteration_bounds = array<i64: 2>, scalar_prefetch = 0 : i64, scratch_operands = 1 : i64, tpu.core_type = #tpu.core_type<tc>, window_params = [{transform_indices = @transform_0, window_bounds = array<i64: 1, 8, 3712>}, {pipeline_mode = #tpu.pipeline_mode<synchronous>, transform_indices = @transform_1, window_bounds = array<i64: 16, 144>}, {pipeline_mode = #tpu.pipeline_mode<synchronous>, transform_indices = @transform_2, window_bounds = array<i64: 16, 1>}, {transform_indices = @transform_3, window_bounds = array<i64: 1, 16, 3072>}]} {
    %c0 = arith.constant 0 : index
    %c0_0 = arith.constant 0 : index
    %c109 = arith.constant 109 : index
    %0 = vector.load %arg1[%c0, %c0_0, %c109] : memref<1x8x3712xf32, #tpu.memory_space<vmem>>, vector<1x8x3072xf32>
    %1 = vector.shape_cast %0 : vector<1x8x3072xf32> to vector<8x3072xf32>
    %c0_1 = arith.constant 0 : index
    %c0_2 = arith.constant 0 : index
    %2 = vector.load %arg5[%c0_1, %c0_2] : memref<144x3072xf32, #tpu.memory_space<vmem>>, vector<8x3072xf32>
    tpu.vector_store %arg5[%c0_1, %c0_2], %1 {strides = array<i32>} : memref<144x3072xf32, #tpu.memory_space<vmem>>, vector<8x3072xf32>,
    %c0_3 = arith.constant 0 : index
    %c0_4 = arith.constant 0 : index
    %c110 = arith.constant 110 : index
    %3 = vector.load %arg1[%c0_3, %c0_4, %c110] : memref<1x8x3712xf32, #tpu.memory_space<vmem>>, vector<1x8x3072xf32>
    %4 = vector.shape_cast %3 : vector<1x8x3072xf32> to vector<8x3072xf32>
    %c8 = arith.constant 8 : index
    %c0_5 = arith.constant 0 : index
    %5 = vector.load %arg5[%c8, %c0_5] : memref<144x3072xf32, #tpu.memory_space<vmem>>, vector<8x3072xf32>
    tpu.vector_store %arg5[%c8, %c0_5], %4 {strides = array<i32>} : memref<144x3072xf32, #tpu.memory_space<vmem>>, vector<8x3072xf32>,
    %c0_6 = arith.constant 0 : index
    %c0_7 = arith.constant 0 : index
    %c111 = arith.constant 111 : index
    %6 = vector.load %arg1[%c0_6, %c0_7, %c111] : memref<1x8x3712xf32, #tpu.memory_space<vmem>>, vector<1x8x3072xf32>
    %7 = vector.shape_cast %6 : vector<1x8x3072xf32> to vector<8x3072xf32>
    %c16 = arith.constant 16 : index
    %c0_8 = arith.constant 0 : index
    %8 = vector.load %arg5[%c16, %c0_8] : memref<144x3072xf32, #tpu.memory_space<vmem>>, vector<8x3072xf32>
    tpu.vector_store %arg5[%c16, %c0_8], %7 {strides = array<i32>} : memref<144x3072xf32, #tpu.memory_space<vmem>>, vector<8x3072xf32>,
    %c0_9 = arith.constant 0 : index
    %c0_10 = arith.constant 0 : index
    %c127 = arith.constant 127 : index
    %9 = vector.load %arg1[%c0_9, %c0_10, %c127] : memref<1x8x3712xf32, #tpu.memory_space<vmem>>, vector<1x8x3072xf32>
    %10 = vector.shape_cast %9 : vector<1x8x3072xf32> to vector<8x3072xf32>
    %c24 = arith.constant 24 : index
    %c0_11 = arith.constant 0 : index
    %11 = vector.load %arg5[%c24, %c0_11] : memref<144x3072xf32, #tpu.memory_space<vmem>>, vector<8x3072xf32>
    tpu.vector_store %arg5[%c24, %c0_11], %10 {strides = array<i32>} : memref<144x3072xf32, #tpu.memory_space<vmem>>, vector<8x3072xf32>,
    %c0_12 = arith.constant 0 : index
    %c0_13 = arith.constant 0 : index
    %c128 = arith.constant 128 : index
    %12 = vector.load %arg1[%c0_12, %c0_13, %c128] : memref<1x8x3712xf32, #tpu.memory_space<vmem>>, vector<1x8x3072xf32>
    %13 = vector.shape_cast %12 : vector<1x8x3072xf32> to vector<8x3072xf32>
    %c32 = arith.constant 32 : index
    %c0_14 = arith.constant 0 : index
    %14 = vector.load %arg5[%c32, %c0_14] : memref<144x3072xf32, #tpu.memory_space<vmem>>, vector<8x3072xf32>
    tpu.vector_store %arg5[%c32, %c0_14], %13 {strides = array<i32>} : memref<144x3072xf32, #tpu.memory_space<vmem>>, vector<8x3072xf32>,
    %c0_15 = arith.constant 0 : index
    %c0_16 = arith.constant 0 : index
    %c129 = arith.constant 129 : index
    %15 = vector.load %arg1[%c0_15, %c0_16, %c129] : memref<1x8x3712xf32, #tpu.memory_space<vmem>>, vector<1x8x3072xf32>
    %16 = vector.shape_cast %15 : vector<1x8x3072xf32> to vector<8x3072xf32>
    %c40 = arith.constant 40 : index
    %c0_17 = arith.constant 0 : index
    %17 = vector.load %arg5[%c40, %c0_17] : memref<144x3072xf32, #tpu.memory_space<vmem>>, vector<8x3072xf32>
    tpu.vector_store %arg5[%c40, %c0_17], %16 {strides = array<i32>} : memref<144x3072xf32, #tpu.memory_space<vmem>>, vector<8x3072xf32>,
    %c0_18 = arith.constant 0 : index
    %c0_19 = arith.constant 0 : index
    %c145 = arith.constant 145 : index
    %18 = vector.load %arg1[%c0_18, %c0_19, %c145] : memref<1x8x3712xf32, #tpu.memory_space<vmem>>, vector<1x8x3072xf32>
    %19 = vector.shape_cast %18 : vector<1x8x3072xf32> to vector<8x3072xf32>
    %c48 = arith.constant 48 : index
    %c0_20 = arith.constant 0 : index
    %20 = vector.load %arg5[%c48, %c0_20] : memref<144x3072xf32, #tpu.memory_space<vmem>>, vector<8x3072xf32>
    tpu.vector_store %arg5[%c48, %c0_20], %19 {strides = array<i32>} : memref<144x3072xf32, #tpu.memory_space<vmem>>, vector<8x3072xf32>,
    %c0_21 = arith.constant 0 : index
    %c0_22 = arith.constant 0 : index
    %c146 = arith.constant 146 : index
    %21 = vector.load %arg1[%c0_21, %c0_22, %c146] : memref<1x8x3712xf32, #tpu.memory_space<vmem>>, vector<1x8x3072xf32>
    %22 = vector.shape_cast %21 : vector<1x8x3072xf32> to vector<8x3072xf32>
    %c56 = arith.constant 56 : index
    %c0_23 = arith.constant 0 : index
    %23 = vector.load %arg5[%c56, %c0_23] : memref<144x3072xf32, #tpu.memory_space<vmem>>, vector<8x3072xf32>
    tpu.vector_store %arg5[%c56, %c0_23], %22 {strides = array<i32>} : memref<144x3072xf32, #tpu.memory_space<vmem>>, vector<8x3072xf32>,
    %c0_24 = arith.constant 0 : index
    %c0_25 = arith.constant 0 : index
    %c147 = arith.constant 147 : index
    %24 = vector.load %arg1[%c0_24, %c0_25, %c147] : memref<1x8x3712xf32, #tpu.memory_space<vmem>>, vector<1x8x3072xf32>
    %25 = vector.shape_cast %24 : vector<1x8x3072xf32> to vector<8x3072xf32>
    %c64 = arith.constant 64 : index
    %c0_26 = arith.constant 0 : index
    %26 = vector.load %arg5[%c64, %c0_26] : memref<144x3072xf32, #tpu.memory_space<vmem>>, vector<8x3072xf32>
    tpu.vector_store %arg5[%c64, %c0_26], %25 {strides = array<i32>} : memref<144x3072xf32, #tpu.memory_space<vmem>>, vector<8x3072xf32>,
    %c0_27 = arith.constant 0 : index
    %c0_28 = arith.constant 0 : index
    %c493 = arith.constant 493 : index
    %27 = vector.load %arg1[%c0_27, %c0_28, %c493] : memref<1x8x3712xf32, #tpu.memory_space<vmem>>, vector<1x8x3072xf32>
    %28 = vector.shape_cast %27 : vector<1x8x3072xf32> to vector<8x3072xf32>
    %c72 = arith.constant 72 : index
    %c0_29 = arith.constant 0 : index
    %29 = vector.load %arg5[%c72, %c0_29] : memref<144x3072xf32, #tpu.memory_space<vmem>>, vector<8x3072xf32>
    tpu.vector_store %arg5[%c72, %c0_29], %28 {strides = array<i32>} : memref<144x3072xf32, #tpu.memory_space<vmem>>, vector<8x3072xf32>,
    %c0_30 = arith.constant 0 : index
    %c0_31 = arith.constant 0 : index
    %c494 = arith.constant 494 : index
    %30 = vector.load %arg1[%c0_30, %c0_31, %c494] : memref<1x8x3712xf32, #tpu.memory_space<vmem>>, vector<1x8x3072xf32>
    %31 = vector.shape_cast %30 : vector<1x8x3072xf32> to vector<8x3072xf32>
    %c80 = arith.constant 80 : index
    %c0_32 = arith.constant 0 : index
    %32 = vector.load %arg5[%c80, %c0_32] : memref<144x3072xf32, #tpu.memory_space<vmem>>, vector<8x3072xf32>
    tpu.vector_store %arg5[%c80, %c0_32], %31 {strides = array<i32>} : memref<144x3072xf32, #tpu.memory_space<vmem>>, vector<8x3072xf32>,
    %c0_33 = arith.constant 0 : index
    %c0_34 = arith.constant 0 : index
    %c495 = arith.constant 495 : index
    %33 = vector.load %arg1[%c0_33, %c0_34, %c495] : memref<1x8x3712xf32, #tpu.memory_space<vmem>>, vector<1x8x3072xf32>
    %34 = vector.shape_cast %33 : vector<1x8x3072xf32> to vector<8x3072xf32>
    %c88 = arith.constant 88 : index
    %c0_35 = arith.constant 0 : index
    %35 = vector.load %arg5[%c88, %c0_35] : memref<144x3072xf32, #tpu.memory_space<vmem>>, vector<8x3072xf32>
    tpu.vector_store %arg5[%c88, %c0_35], %34 {strides = array<i32>} : memref<144x3072xf32, #tpu.memory_space<vmem>>, vector<8x3072xf32>,
    %c0_36 = arith.constant 0 : index
    %c0_37 = arith.constant 0 : index
    %c511 = arith.constant 511 : index
    %36 = vector.load %arg1[%c0_36, %c0_37, %c511] : memref<1x8x3712xf32, #tpu.memory_space<vmem>>, vector<1x8x3072xf32>
    %37 = vector.shape_cast %36 : vector<1x8x3072xf32> to vector<8x3072xf32>
    %c96 = arith.constant 96 : index
    %c0_38 = arith.constant 0 : index
    %38 = vector.load %arg5[%c96, %c0_38] : memref<144x3072xf32, #tpu.memory_space<vmem>>, vector<8x3072xf32>
    tpu.vector_store %arg5[%c96, %c0_38], %37 {strides = array<i32>} : memref<144x3072xf32, #tpu.memory_space<vmem>>, vector<8x3072xf32>,
    %c0_39 = arith.constant 0 : index
    %c0_40 = arith.constant 0 : index
    %c512 = arith.constant 512 : index
    %39 = vector.load %arg1[%c0_39, %c0_40, %c512] : memref<1x8x3712xf32, #tpu.memory_space<vmem>>, vector<1x8x3072xf32>
    %40 = vector.shape_cast %39 : vector<1x8x3072xf32> to vector<8x3072xf32>
    %c104 = arith.constant 104 : index
    %c0_41 = arith.constant 0 : index
    %41 = vector.load %arg5[%c104, %c0_41] : memref<144x3072xf32, #tpu.memory_space<vmem>>, vector<8x3072xf32>
    tpu.vector_store %arg5[%c104, %c0_41], %40 {strides = array<i32>} : memref<144x3072xf32, #tpu.memory_space<vmem>>, vector<8x3072xf32>,
    %c0_42 = arith.constant 0 : index
    %c0_43 = arith.constant 0 : index
    %c513 = arith.constant 513 : index
    %42 = vector.load %arg1[%c0_42, %c0_43, %c513] : memref<1x8x3712xf32, #tpu.memory_space<vmem>>, vector<1x8x3072xf32>
    %43 = vector.shape_cast %42 : vector<1x8x3072xf32> to vector<8x3072xf32>
    %c112 = arith.constant 112 : index
    %c0_44 = arith.constant 0 : index
    %44 = vector.load %arg5[%c112, %c0_44] : memref<144x3072xf32, #tpu.memory_space<vmem>>, vector<8x3072xf32>
    tpu.vector_store %arg5[%c112, %c0_44], %43 {strides = array<i32>} : memref<144x3072xf32, #tpu.memory_space<vmem>>, vector<8x3072xf32>,
    %c0_45 = arith.constant 0 : index
    %c0_46 = arith.constant 0 : index
    %c529 = arith.constant 529 : index
    %45 = vector.load %arg1[%c0_45, %c0_46, %c529] : memref<1x8x3712xf32, #tpu.memory_space<vmem>>, vector<1x8x3072xf32>
    %46 = vector.shape_cast %45 : vector<1x8x3072xf32> to vector<8x3072xf32>
    %c120 = arith.constant 120 : index
    %c0_47 = arith.constant 0 : index
    %47 = vector.load %arg5[%c120, %c0_47] : memref<144x3072xf32, #tpu.memory_space<vmem>>, vector<8x3072xf32>
    tpu.vector_store %arg5[%c120, %c0_47], %46 {strides = array<i32>} : memref<144x3072xf32, #tpu.memory_space<vmem>>, vector<8x3072xf32>,
    %c0_48 = arith.constant 0 : index
    %c0_49 = arith.constant 0 : index
    %c530 = arith.constant 530 : index
    %48 = vector.load %arg1[%c0_48, %c0_49, %c530] : memref<1x8x3712xf32, #tpu.memory_space<vmem>>, vector<1x8x3072xf32>
    %49 = vector.shape_cast %48 : vector<1x8x3072xf32> to vector<8x3072xf32>
    %c128_50 = arith.constant 128 : index
    %c0_51 = arith.constant 0 : index
    %50 = vector.load %arg5[%c128_50, %c0_51] : memref<144x3072xf32, #tpu.memory_space<vmem>>, vector<8x3072xf32>
    tpu.vector_store %arg5[%c128_50, %c0_51], %49 {strides = array<i32>} : memref<144x3072xf32, #tpu.memory_space<vmem>>, vector<8x3072xf32>,
    %c0_52 = arith.constant 0 : index
    %c0_53 = arith.constant 0 : index
    %c531 = arith.constant 531 : index
    %51 = vector.load %arg1[%c0_52, %c0_53, %c531] : memref<1x8x3712xf32, #tpu.memory_space<vmem>>, vector<1x8x3072xf32>
    %52 = vector.shape_cast %51 : vector<1x8x3072xf32> to vector<8x3072xf32>
    %c136 = arith.constant 136 : index
    %c0_54 = arith.constant 0 : index
    %53 = vector.load %arg5[%c136, %c0_54] : memref<144x3072xf32, #tpu.memory_space<vmem>>, vector<8x3072xf32>
    tpu.vector_store %arg5[%c136, %c0_54], %52 {strides = array<i32>} : memref<144x3072xf32, #tpu.memory_space<vmem>>, vector<8x3072xf32>,
    %c0_55 = arith.constant 0 : index
    %c0_56 = arith.constant 0 : index
    %54 = vector.load %arg2[%c0_55, %c0_56] : memref<16x144xf32, #tpu.memory_space<vmem>>, vector<16x144xf32>
    %c0_57 = arith.constant 0 : index
    %c0_58 = arith.constant 0 : index
    %55 = vector.load %arg5[%c0_57, %c0_58] : memref<144x3072xf32, #tpu.memory_space<vmem>>, vector<144x3072xf32>
    %cst = arith.constant dense<0.000000e+00> : vector<16x3072xf32>
    %56 = tpu.matmul %54, %55, %cst {dimension_numbers = #tpu.dot_dimension_numbers<[1], [0], [0], [1], [0, 0, 1, 1], [], []>} : vector<16x144xf32>, vector<144x3072xf32>, vector<16x3072xf32> -> vector<16x3072xf32>
    %c0_59 = arith.constant 0 : index
    %c0_60 = arith.constant 0 : index
    %57 = vector.load %arg3[%c0_59, %c0_60] : memref<16x1xf32, #tpu.memory_space<vmem>>, vector<16x1xf32>
    %58 = vector.broadcast %57 : vector<16x1xf32> to vector<16x3072xf32>
    %59 = arith.addf %56, %58 : vector<16x3072xf32>
    %c0_61 = arith.constant 0 : index
    %c0_62 = arith.constant 0 : index
    %c0_63 = arith.constant 0 : index
    %60 = vector.load %arg4[%c0_61, %c0_62, %c0_63] : memref<1x16x3072xf32, #tpu.memory_space<vmem>>, vector<1x16x3072xf32>
    %61 = vector.shape_cast %60 : vector<1x16x3072xf32> to vector<16x3072xf32>
    %62 = vector.shape_cast %59 : vector<16x3072xf32> to vector<1x16x3072xf32>
    tpu.vector_store %arg4[%c0_61, %c0_62, %c0_63], %62 {strides = array<i32>} : memref<1x16x3072xf32, #tpu.memory_space<vmem>>, vector<1x16x3072xf32>,
    return
  }
  func.func @transform_0(%arg0: i32) -> (i32, i32, i32) {
    %c0_i32 = arith.constant 0 : i32
    %c0_i32_0 = arith.constant 0 : i32
    %c0_i32_1 = arith.constant 0 : i32
    return %arg0, %c0_i32, %c0_i32_0 : i32, i32, i32
  }
  func.func @transform_1(%arg0: i32) -> (i32, i32) {
    %c0_i32 = arith.constant 0 : i32
    %c0_i32_0 = arith.constant 0 : i32
    %c0_i32_1 = arith.constant 0 : i32
    return %c0_i32, %c0_i32_0 : i32, i32
  }
  func.func @transform_2(%arg0: i32) -> (i32, i32) {
    %c0_i32 = arith.constant 0 : i32
    %c0_i32_0 = arith.constant 0 : i32
    %c0_i32_1 = arith.constant 0 : i32
    return %c0_i32, %c0_i32_0 : i32, i32
  }
  func.func @transform_3(%arg0: i32) -> (i32, i32, i32) {
    %c0_i32 = arith.constant 0 : i32
    %c0_i32_0 = arith.constant 0 : i32
    %c0_i32_1 = arith.constant 0 : i32
    return %arg0, %c0_i32, %c0_i32_0 : i32, i32, i32
  }
}

</mosaic_0001>

<bundles_post_ra>
// kernel: sep_conv3d_forward.1
= control target key start
LH: loop header
LB: loop body
LE: loop exit
PB: predicated region body
PF: predicated region fallthrough
CT: control target
= control target key end

     0   :  { %s6037_s12 = smov 0   ;;  %s8575_s0 = inlined_call_operand.vmem [shape: f32[2,8,3712], index: 0, kind: input, shape index: {}]   ;;  %s8576_s1 = inlined_call_operand.vmem [shape: f32[16,144], index: 1, kind: input, shape index: {}]   ;;  %s8577_s2 = inlined_call_operand.vmem [shape: f32[16,1], index: 2, kind: input, shape index: {}]   ;;  %s8578_s3 = inlined_call_operand.vmem [shape: f32[2,16,3072], index: 3, kind: output, shape index: {}]  }
   0x1 LB: > { %s4509_s13 = sadd.s32 4294967295, %s6006_s12   ;;  %p4513_p0 = scmp.ge.s32.totalorder %s6006_s12, 1  ;;  %s6006_s12 = sphi %s6037_s12, %s13_s12  }
   0x2   : > { %p137_p1 = scmp.lt.s32.totalorder %s6006_s12, 3 }
   0x4   : > { %p138_p2 = pnand %p4513_p0, %p137_p1 }
   0x6   : > { %141 = sbr.rel (%p138_p2) target bundleno = 773 (0x305), region = 32 }
   0xd   : > { %p161_p3 = scmp.lt.s32.totalorder %s4509_s13, 1  ;;  %s6008_s18 = smov 19   ;;  %vm271_vm0 = vcmask 154624   ;;  %vm444_vm1 = vcmask 146432   ;;  %vm617_vm2 = vcmask 138240   ;;  %vm790_vm3 = vcmask 7168  }
   0xe   : > { %s6009_s19 = smov 18   ;;  %s6010_s20 = smov 17   ;;  %vm3475_vm4 = vcmask 130048   ;;  %vm1011_vm5 = vcmask 1039360   ;;  %vm1184_vm6 = vcmask 908288   ;;  %vm1357_vm7 = vcmask 900096  }
   0xf   : > { %s8959_s13 = smov (!%p161_p3, %s4509_s13), 1  ;;  %s6011_s21 = smov 1   ;;  %vm1530_vm8 = vcmask 891904  }
  0x10   : > { %s4974_s14 = smul.u32 232, %s8959_s13  ;;  %s6012_s22 = smov 127  }
  0x11   : > { %s6013_s23 = smov 111   ;;  %s6014_s24 = smov 110  }
  0x12   : > { %s6051_s17 = scalar_lea.vmem %s8575_s0, %s4974_s14  ;;  %s6015_s25 = smov 109  }
  0x13   : > { %v175_v0 = vld [vmem:[%s6051_s17 + $0x20] sm:$0xff]  ;;  %v6055_v1 = vld [vmem:[%s6051_s17 + $0x28] sm:$0xff]  ;;  %v6065_v5 = vld [vmem:[%s6051_s17 + $0x30] sm:$0xff] }
  0x14   : > { %v171_v2 = vld [vmem:[%s6051_s17] sm:$0xff]  ;;  %v6059_v3 = vpack.i.bf16 %v6055_v1, %v175_v0  ;;  %v6062_v4 = vld [vmem:[%s6051_s17 + $0x8] sm:$0xff]  ;;  %v6068_v6 = vld [vmem:[%s6051_s17 + $0x38] sm:$0xff]  ;;  %v6079_v10 = vpack.i.bf16 %v6065_v5, %v6055_v1 }
  0x15   : > { %v6071_v7 = vpack.i.bf16 %v6062_v4, %v171_v2  ;;  %v173_v8 = vld [vmem:[%s6051_s17 + $0x10] sm:$0xff]  ;;  %v6075_v9 = vld [vmem:[%s6051_s17 + $0x18] sm:$0xff]  ;;  %v6085_v11 = vpack.i.bf16 %v6068_v6, %v6065_v5  ;;  %v179_v13 = vld [vmem:[%s6051_s17 + $0x40] sm:$0xff]  ;;  %v5438_v50 = vpack.i.bf16 %v6055_v1, %v6062_v4 }
  0x16   : > { %5004 = vrot.lane.b32.xlu1 %v6059_v3, %s6008_s18  ;;  %v181_v12 = vld [vmem:[%s6051_s17 + $0x50] sm:$0xff]  ;;  %v180_v14 = vld [vmem:[%s6051_s17 + $0x48] sm:$0xff]  ;;  %v6091_v15 = vpack.i.bf16 %v175_v0, %v6075_v9  ;;  %v6094_v16 = vpack.i.bf16 %v173_v8, %v6062_v4  ;;  %v6099_v17 = vpack.i.bf16 %v6075_v9, %v173_v8  ;;  %v182_v18 = vld [vmem:[%s6051_s17 + $0x58] sm:$0xff]  ;;  %v6105_v21 = vpack.i.bf16 %v179_v13, %v6068_v6 }
  0x17   : > { %4994 = vrot.lane.b32.xlu0 %v6071_v7, %s6008_s18  ;;  %v185_v19 = vld [vmem:[%s6051_s17 + $0x70] sm:$0xff]  ;;  %v183_v20 = vld [vmem:[%s6051_s17 + $0x60] sm:$0xff]  ;;  %v6107_v22 = vpack.i.bf16 %v181_v12, %v180_v14  ;;  %v186_v23 = vld [vmem:[%s6051_s17 + $0x78] sm:$0xff]  ;;  %v6121_v31 = vpack.i.bf16 %v182_v18, %v181_v12  ;;  %v5013_v37 = vpack.i.bf16 %v180_v14, %v179_v13  ;;  %v6171_v51 = vpack.i.bf16 %v6075_v9, %v6068_v6 }
  0x18   : > { %v184_v24 = vld [vmem:[%s6051_s17 + $0x68] sm:$0xff]  ;;  %v189_v25 = vld [vmem:[%s6051_s17 + $0x90] sm:$0xff]  ;;  %v6112_v26 = vpack.i.bf16 %v183_v20, %v182_v18  ;;  %v190_v27 = vld [vmem:[%s6051_s17 + $0x98] sm:$0xff]  ;;  %v5028_v43 = vpack.i.bf16 %v186_v23, %v185_v19 }
  0x19   : > { %v187_v28 = vld [vmem:[%s6051_s17 + $0x80] sm:$0xff]  ;;  %v188_v29 = vld [vmem:[%s6051_s17 + $0x88] sm:$0xff]  ;;  %v6117_v30 = vpack.i.bf16 %v185_v19, %v184_v24  ;;  %v193_v32 = vld [vmem:[%s6051_s17 + $0xb0] sm:$0xff]  ;;  %v5023_v44 = vpack.i.bf16 %v184_v24, %v183_v20  ;;  %v5038_v45 = vpack.i.bf16 %v190_v27, %v189_v25 }
  0x1a   : > { %5009 = vrot.lane.b32.xlu1 %v6085_v11, %s6008_s18  ;;  %v191_v33 = vld [vmem:[%s6051_s17 + $0xa0] sm:$0xff]  ;;  %v192_v34 = vld [vmem:[%s6051_s17 + $0xa8] sm:$0xff]  ;;  %v6126_v35 = vpack.i.bf16 %v187_v28, %v186_v23  ;;  %v6128_v36 = vpack.i.bf16 %v189_v25, %v188_v29  ;;  %v194_v38 = vld [vmem:[%s6051_s17 + $0xb8] sm:$0xff]  ;;  %v5033_v46 = vpack.i.bf16 %v188_v29, %v187_v28 }
  0x1b   : > { %4999 = vrot.lane.b32.xlu0 %v6099_v17, %s6008_s18  ;;  %v195_v39 = vld [vmem:[%s6051_s17 + $0xc0] sm:$0xff]  ;;  %v6134_v40 = vpack.i.bf16 %v191_v33, %v190_v27  ;;  %v6136_v41 = vpack.i.bf16 %v193_v32, %v192_v34  ;;  %v5048_v47 = vpack.i.bf16 %v194_v38, %v193_v32  ;;  %v5043_v48 = vpack.i.bf16 %v192_v34, %v191_v33  ;;  %v935_v57 = vld [vmem:[%s6051_s17 + $0xc8] sm:$0xff] }
  0x1c   : > { %v6138_v42 = vpack.i.bf16 %v195_v39, %v194_v38  ;;  %v5053_v49 = vpack.i.bf16 %v175_v0, %v195_v39  ;;  %v5313_v59 = vpack.i.bf16 %v6055_v1, %v935_v57 }
  0x1e   : > { %5019 = vrot.lane.b32.xlu1 %v6121_v31, %s6008_s18 }
  0x1f   : > { %5014 = vrot.lane.b32.xlu0 %v5013_v37, %s6008_s18 }
  0x22   : > { %5029 = vrot.lane.b32.xlu1 %v5028_v43, %s6008_s18 }
  0x23   : > { %5024 = vrot.lane.b32.xlu0 %v5023_v44, %s6008_s18 }
  0x26   : > { %5039 = vrot.lane.b32.xlu1 %v5038_v45, %s6008_s18 }
  0x27   : > { %5034 = vrot.lane.b32.xlu0 %v5033_v46, %s6008_s18 }
  0x2a   : > { %5049 = vrot.lane.b32.xlu1 %v5048_v47, %s6008_s18 }
  0x2b   : > { %5044 = vrot.lane.b32.xlu0 %v5043_v48, %s6008_s18 }
  0x2e   : > { %5059 = vrot.lane.b32.xlu1 %v6071_v7, %s6009_s19 }
  0x2f   : > { %5054 = vrot.lane.b32.xlu0 %v5053_v49, %s6008_s18 }
  0x32   : > { %5069 = vrot.lane.b32.xlu1 %v6059_v3, %s6009_s19 }
  0x33   : > { %5064 = vrot.lane.b32.xlu0 %v6099_v17, %s6009_s19 }
  0x36   : > { %5079 = vrot.lane.b32.xlu1 %v5013_v37, %s6009_s19 }
  0x37   : > { %5074 = vrot.lane.b32.xlu0 %v6085_v11, %s6009_s19 }
  0x3a   : > { %5089 = vrot.lane.b32.xlu1 %v5023_v44, %s6009_s19 }
  0x3b   : > { %5084 = vrot.lane.b32.xlu0 %v6121_v31, %s6009_s19 }
  0x3e   : > { %5099 = vrot.lane.b32.xlu1 %v5033_v46, %s6009_s19 }
  0x3f   : > { %5094 = vrot.lane.b32.xlu0 %v5028_v43, %s6009_s19 }
  0x42   : > { %5109 = vrot.lane.b32.xlu1 %v5043_v48, %s6009_s19 }
  0x43   : > { %5104 = vrot.lane.b32.xlu0 %v5038_v45, %s6009_s19 }
  0x46   : > { %5119 = vrot.lane.b32.xlu1 %v5053_v49, %s6009_s19 }
  0x47   : > { %5114 = vrot.lane.b32.xlu0 %v5048_v47, %s6009_s19 }
  0x4a   : > { %5129 = vrot.lane.b32.xlu1 %v6099_v17, %s6010_s20 }
  0x4b   : > { %5124 = vrot.lane.b32.xlu0 %v6071_v7, %s6010_s20 }
  0x4e   : > { %5139 = vrot.lane.b32.xlu1 %v6085_v11, %s6010_s20 }
  0x4f   : > { %5134 = vrot.lane.b32.xlu0 %v6059_v3, %s6010_s20 }
  0x52   : > { %5149 = vrot.lane.b32.xlu1 %v6121_v31, %s6010_s20 }
  0x53   : > { %5144 = vrot.lane.b32.xlu0 %v5013_v37, %s6010_s20 }
  0x56   : > { %5159 = vrot.lane.b32.xlu1 %v5028_v43, %s6010_s20 }
  0x57   : > { %5154 = vrot.lane.b32.xlu0 %v5023_v44, %s6010_s20 }
  0x5a   : > { %5169 = vrot.lane.b32.xlu1 %v5038_v45, %s6010_s20 }
  0x5b   : > { %5164 = vrot.lane.b32.xlu0 %v5033_v46, %s6010_s20 }
  0x5e   : > { %5179 = vrot.lane.b32.xlu1 %v5048_v47, %s6010_s20 }
  0x5f   : > { %5174 = vrot.lane.b32.xlu0 %v5043_v48, %s6010_s20 }
  0x62   : > { %5189 = vrot.lane.b32.xlu1 %v6071_v7, %s6011_s21 }
  0x63   : > { %5184 = vrot.lane.b32.xlu0 %v5053_v49, %s6010_s20 }
  0x66   : > { %5199 = vrot.lane.b32.xlu1 %v6059_v3, %s6011_s21 }
  0x67   : > { %5194 = vrot.lane.b32.xlu0 %v6099_v17, %s6011_s21 }
  0x6a   : > { %5209 = vrot.lane.b32.xlu1 %v5013_v37, %s6011_s21 }
  0x6b   : > { %5204 = vrot.lane.b32.xlu0 %v6085_v11, %s6011_s21 }
  0x6e   : > { %5219 = vrot.lane.b32.xlu1 %v5023_v44, %s6011_s21 }
  0x6f   : > { %5214 = vrot.lane.b32.xlu0 %v6121_v31, %s6011_s21 }
  0x72   : > { %5229 = vrot.lane.b32.xlu1 %v5033_v46, %s6011_s21 }
  0x73   : > { %5224 = vrot.lane.b32.xlu0 %v5028_v43, %s6011_s21 }
  0x76   : > { %5239 = vrot.lane.b32.xlu1 %v5043_v48, %s6011_s21 }
  0x77   : > { %5234 = vrot.lane.b32.xlu0 %v5038_v45, %s6011_s21 }
  0x7a   : > { %5249 = vrot.lane.b32.xlu1 %v5053_v49, %s6011_s21 }
  0x7b   : > { %5244 = vrot.lane.b32.xlu0 %v5048_v47, %s6011_s21 }
  0x7e   : > { %5259 = vrot.lane.b32.xlu1 %v6091_v15, %s6012_s22 }
  0x7f   : > { %5254 = vrot.lane.b32.xlu0 %v6094_v16, %s6012_s22 }
  0x82   : > { %5269 = vrot.lane.b32.xlu1 %v6105_v21, %s6012_s22 }
  0x83   : > { %5264 = vrot.lane.b32.xlu0 %v6079_v10, %s6012_s22 }
  0x86   : > { %5279 = vrot.lane.b32.xlu1 %v6112_v26, %s6012_s22 }
  0x87   : > { %5274 = vrot.lane.b32.xlu0 %v6107_v22, %s6012_s22 }
  0x88   : > { %v6222_v52 = vpop.permute.xlu1 %5004 }
  0x89   : > { %v6224_v53 = vpop.permute.xlu0 %4994  ;;  %v8581_v8 = vunpack.i.h.bf16 %v6222_v52  ;;  %v5006_v9 = vunpack.i.l.bf16 %v6222_v52 }
  0x8a   : > { %5289 = vrot.lane.b32.xlu1 %v6126_v35, %s6012_s22  ;;  %v4997_v19 = vunpack.i.h.bf16 %v6224_v53  ;;  %v4996_v20 = vunpack.i.l.bf16 %v6224_v53 }
  0x8b   : > { %5284 = vrot.lane.b32.xlu0 %v6117_v30, %s6012_s22  ;;  %v6286_v27 = vsel %vm271_vm0, %v5006_v9, %v8581_v8 }
  0x8c   : > { %v6230_v54 = vpop.permute.xlu1 %5009  ;;  %8702 = vst [vmem:[#allocation5_spill] sm:$0xff] %v6286_v27  ;;  %v272_v46 = vsel %vm271_vm0, %v4996_v20, %v4997_v19 }
  0x8d   : > { %v5000_v55 = vpop.permute.xlu0 %4999 }
  0x8e   : > { %5299 = vrot.lane.b32.xlu1 %v6134_v40, %s6012_s22  ;;  %v5002_v11 = vunpack.i.h.bf16 %v5000_v55  ;;  %v5001_v12 = vunpack.i.l.bf16 %v5000_v55 }
  0x8f   : > { %5294 = vrot.lane.b32.xlu0 %v6128_v36, %s6012_s22 }
  0x90   : > { %v6236_v56 = vpop.permute.xlu1 %5019  ;;  %v273_v32 = vsel %vm271_vm0, %v4997_v19, %v5001_v12  ;;  %v275_v33 = vsel %vm271_vm0, %v5002_v11, %v5006_v9  ;;  %v274_v47 = vsel %vm271_vm0, %v5001_v12, %v5002_v11  ;;  %v1777_v9 = vld [vmem:[%s6051_s17 + $0x28] sm:$0xff]  ;;  %v1950_v12 = vld [vmem:[%s6051_s17 + $0x30] sm:$0xff]  ;;  %v6397_v19 = vld [vmem:[%s6051_s17 + $0x40] sm:$0xff] }
  0x91   : > { %v6239_v58 = vpop.permute.xlu0 %5014  ;;  %v5453_v4 = vpack.i.bf16 %v1950_v12, %v1777_v9 }
  0x92   : > { %5309 = vrot.lane.b32.xlu1 %v6138_v42, %s6012_s22 }
  0x93   : > { %5304 = vrot.lane.b32.xlu0 %v6136_v41, %s6012_s22 }
  0x94   : > { %v6246_v60 = vpop.permute.xlu1 %5029 }
  0x95   : > { %v6248_v61 = vpop.permute.xlu0 %5024 }
  0x96   : > { %5319 = vrot.lane.b32.xlu1 %v6094_v16, %s6013_s23 }
  0x97   : > { %5314 = vrot.lane.b32.xlu0 %v5313_v59, %s6012_s22 }
  0x98   : > { %v6253_v62 = vpop.permute.xlu1 %5039 }
  0x99   : > { %v6255_v63 = vpop.permute.xlu0 %5034 }
  0x9a   : > { %5329 = vrot.lane.b32.xlu1 %v6079_v10, %s6013_s23 }
  0x9b   : > { %5324 = vrot.lane.b32.xlu0 %v6091_v15, %s6013_s23 }
  0x9c   : > { %v6261_v0 = vpop.permute.xlu1 %5049 }
  0x9d   : > { %8700 = vst [vmem:[#allocation3_spill] sm:$0xff] %v6261_v0  ;;  %v6263_v2 = vpop.permute.xlu0 %5044 }
  0x9e   : > { %5339 = vrot.lane.b32.xlu1 %v6107_v22, %s6013_s23 }
  0x9f   : > { %5334 = vrot.lane.b32.xlu0 %v6105_v21, %s6013_s23 }
  0xa0   : > { %v5060_v6 = vpop.permute.xlu1 %5059 }
  0xa1   : > { %v6269_v7 = vpop.permute.xlu0 %5054  ;;  %v5062_v13 = vunpack.i.h.bf16 %v5060_v6  ;;  %v5061_v14 = vunpack.i.l.bf16 %v5060_v6 }
  0xa2   : > { %8701 = vst [vmem:[#allocation4_spill] sm:$0xff] %v6269_v7  ;;  %5349 = vrot.lane.b32.xlu1 %v6117_v30, %s6013_s23 }
  0xa3   : > { %5344 = vrot.lane.b32.xlu0 %v6112_v26, %s6013_s23  ;;  %v445_v34 = vsel %vm444_vm1, %v5061_v14, %v5062_v13 }
  0xa4   : > { %v6277_v18 = vpop.permute.xlu1 %5069  ;;  %v4544_v48 = vpack.c.bf16 %v445_v34, %v272_v46 }
  0xa5   : > { %v8579_v23 = vunpack.i.h.bf16 %v6277_v18  ;;  %v5071_v24 = vunpack.i.l.bf16 %v6277_v18  ;;  %v5065_v25 = vpop.permute.xlu0 %5064 }
  0xa6   : > { %v5067_v28 = vunpack.i.h.bf16 %v5065_v25  ;;  %v5066_v29 = vunpack.i.l.bf16 %v5065_v25  ;;  %5359 = vrot.lane.b32.xlu1 %v6128_v36, %s6013_s23 }
  0xa7   : > { %v6293_v31 = vsel %vm444_vm1, %v5071_v24, %v8579_v23  ;;  %5354 = vrot.lane.b32.xlu0 %v6126_v35, %s6013_s23 }
  0xa8   : > { %8703 = vst [vmem:[#allocation6_spill] sm:$0xff] %v6293_v31  ;;  %v6300_v37 = vpop.permute.xlu1 %5079  ;;  %v446_v38 = vsel %vm444_vm1, %v5062_v13, %v5066_v29  ;;  %v448_v36 = vsel %vm444_vm1, %v5067_v28, %v5071_v24  ;;  %v447_v39 = vsel %vm444_vm1, %v5066_v29, %v5067_v28 }
  0xa9   : > { %v6307_v44 = vpop.permute.xlu0 %5074  ;;  %v4542_v35 = vpack.c.bf16 %v446_v38, %v273_v32  ;;  %v4578_v45 = vpack.c.bf16 %v448_v36, %v275_v33  ;;  %v4580_v49 = vpack.c.bf16 %v447_v39, %v274_v47 }
  0xaa   : > { %5369 = vrot.lane.b32.xlu1 %v6136_v41, %s6013_s23 }
  0xab   : > { %5364 = vrot.lane.b32.xlu0 %v6134_v40, %s6013_s23  ;;  %4543 = vmatprep.subr.bf16.mxu0 %v4542_v35 }
  0xac   : > { %4579 = vmatprep.subr.bf16.mxu1 %v4578_v45  ;;  %4545 = vmatpush1.bf16.msra.mxu0 %v4544_v48  ;;  %v6315_v53 = vpop.permute.xlu1 %5089 }
  0xad   : > { %4581 = vmatpush1.bf16.msra.mxu1 %v4580_v49  ;;  %v6317_v55 = vpop.permute.xlu0 %5084 }
  0xae   : > { %5379 = vrot.lane.b32.xlu1 %v5313_v59, %s6013_s23 }
  0xaf   : > { %5374 = vrot.lane.b32.xlu0 %v6138_v42, %s6013_s23 }
  0xb0   : > { %v6322_v57 = vpop.permute.xlu1 %5099 }
  0xb1   : > { %v6324_v41 = vpop.permute.xlu0 %5094 }
  0xb2   : > { %5389 = vrot.lane.b32.xlu1 %v6091_v15, %s6014_s24 }
  0xb3   : > { %5384 = vrot.lane.b32.xlu0 %v6094_v16, %s6014_s24 }
  0xb4   : > { %v6330_v40 = vpop.permute.xlu1 %5109 }
  0xb5   : > { %8704 = vst [vmem:[#allocation7_spill] sm:$0xff] %v6330_v40  ;;  %v6332_v6 = vpop.permute.xlu0 %5104 }
  0xb6   : > { %5399 = vrot.lane.b32.xlu1 %v6105_v21, %s6014_s24 }
  0xb7   : > { %5394 = vrot.lane.b32.xlu0 %v6079_v10, %s6014_s24 }
  0xb8   : > { %v6338_v42 = vpop.permute.xlu1 %5119 }
  0xb9   : > { %8705 = vst [vmem:[#allocation8_spill] sm:$0xff] %v6338_v42  ;;  %v6340_v59 = vpop.permute.xlu0 %5114 }
  0xba   : > { %8706 = vst [vmem:[#allocation9_spill] sm:$0xff] %v6340_v59  ;;  %5409 = vrot.lane.b32.xlu1 %v6112_v26, %s6014_s24 }
  0xbb   : > { %5404 = vrot.lane.b32.xlu0 %v6107_v22, %s6014_s24 }
  0xbc   : > { %v6346_v15 = vpop.permute.xlu1 %5129 }
  0xbd   : > { %v6348_v16 = vpop.permute.xlu0 %5124  ;;  %v5131_v32 = vunpack.i.l.bf16 %v6346_v15  ;;  %v5132_v45 = vunpack.i.h.bf16 %v6346_v15 }
  0xbe   : > { %5419 = vrot.lane.b32.xlu1 %v6099_v17, %s6015_s25  ;;  %v6375_v17 = vld [vmem:[%s6051_s17 + $0x18] sm:$0xff]  ;;  %v5127_v33 = vunpack.i.h.bf16 %v6348_v16  ;;  %v5126_v46 = vunpack.i.l.bf16 %v6348_v16 }
  0xbf   : > { %5414 = vrot.lane.b32.xlu0 %v6117_v30, %s6014_s24 }
  0xc0   : > { %v6354_v21 = vpop.permute.xlu1 %5139 }
  0xc1   : > { %v6356_v26 = vpop.permute.xlu0 %5134 }
  0xc2   : > { %5429 = vrot.lane.b32.xlu1 %v6079_v10, %s6008_s18  ;;  %v5443_v10 = vpack.i.bf16 %v6065_v5, %v1777_v9  ;;  %v6394_v5 = vld [vmem:[%s6051_s17 + $0x20] sm:$0xff]  ;;  %v8580_v34 = vunpack.i.h.bf16 %v6356_v26  ;;  %v5136_v38 = vunpack.i.l.bf16 %v6356_v26 }
  0xc3   : > { %5424 = vrot.lane.b32.xlu0 %v6059_v3, %s6015_s25  ;;  %v1951_v3 = vld [vmem:[%s6051_s17 + $0x38] sm:$0xff]  ;;  %v5478_v24 = vpack.i.bf16 %v6394_v5, %v6397_v19 }
  0xc4   : > { %v6362_v22 = vpop.permute.xlu1 %5149  ;;  %v5458_v1 = vpack.i.bf16 %v6375_v17, %v1951_v3  ;;  %v5473_v25 = vpack.i.bf16 %v1951_v3, %v1950_v12  ;;  %v5498_v12 = vpack.i.bf16 %v6397_v19, %v1951_v3  ;;  %v621_v16 = vsel %vm617_vm2, %v5132_v45, %v5136_v38 }
  0xc5   : > { %v6365_v11 = vpop.permute.xlu0 %5144 }
  0xc6   : > { %5439 = vrot.lane.b32.xlu1 %v5438_v50, %s6015_s25 }
  0xc7   : > { %5434 = vrot.lane.b32.xlu0 %v6171_v51, %s6008_s18 }
  0xc8   : > { %v6378_v30 = vpop.permute.xlu1 %5159 }
  0xc9   : > { %8707 = vst [vmem:[#allocation10_spill] sm:$0xff] %v6378_v30  ;;  %v6381_v13 = vpop.permute.xlu0 %5154 }
  0xca   : > { %8708 = vst [vmem:[#allocation11_spill] sm:$0xff] %v6381_v13  ;;  %5449 = vrot.lane.b32.xlu1 %v6171_v51, %s6009_s19 }
  0xcb   : > { %5444 = vrot.lane.b32.xlu0 %v5443_v10, %s6009_s19 }
  0xcc   : > { %v6387_v50 = vpop.permute.xlu1 %5169 }
  0xcd   : > { %8709 = vst [vmem:[#allocation12_spill] sm:$0xff] %v6387_v50  ;;  %v6389_v14 = vpop.permute.xlu0 %5164 }
  0xce   : > { %8710 = vst [vmem:[#allocation13_spill] sm:$0xff] %v6389_v14  ;;  %5459 = vrot.lane.b32.xlu1 %v5458_v1, %s6010_s20  ;;  %v5011_v14 = vunpack.i.l.bf16 %v6230_v54 }
  0xcf   : > { %5454 = vrot.lane.b32.xlu0 %v5453_v4, %s6010_s20 }
  0xd0   : > { %v6399_v20 = vpop.permute.xlu1 %5179 }
  0xd1   : > { %8711 = vst [vmem:[#allocation14_spill] sm:$0xff] %v6399_v20  ;;  %v6401_v51 = vpop.permute.xlu0 %5174 }
  0xd2   : > { %8712 = vst [vmem:[#allocation15_spill] sm:$0xff] %v6401_v51  ;;  %5469 = vrot.lane.b32.xlu1 %v5458_v1, %s6011_s21  ;;  %v619_v1 = vsel %vm617_vm2, %v5127_v33, %v5131_v32 }
  0xd3   : > { %5464 = vrot.lane.b32.xlu0 %v5453_v4, %s6011_s21 }
  0xd4   : > { %v5190_v28 = vpop.permute.xlu1 %5189 }
  0xd5   : > { %v6407_v29 = vpop.permute.xlu0 %5184  ;;  %v5192_v36 = vunpack.i.h.bf16 %v5190_v28  ;;  %v5191_v39 = vunpack.i.l.bf16 %v5190_v28  ;;  %v6427_v28 = vsel %vm617_vm2, %v5136_v38, %v8580_v34  ;;  %v618_v38 = vsel %vm617_vm2, %v5126_v46, %v5127_v33 }
  0xd6   : > { %8713 = vst [vmem:[#allocation16_spill] sm:$0xff] %v6407_v29  ;;  %5479 = vrot.lane.b32.xlu1 %v5478_v24, %s6012_s22  ;;  %8715 = vst [vmem:[#allocation18_spill] sm:$0xff] %v6427_v28 }
  0xd7   : > { %5474 = vrot.lane.b32.xlu0 %v5473_v25, %s6012_s22 }
  0xd8   : > { %v6415_v35 = vpop.permute.xlu1 %5199 }
  0xd9   : > { %8714 = vst [vmem:[#allocation17_spill] sm:$0xff] %v6415_v35  ;;  %v8582_v47 = vunpack.i.h.bf16 %v6415_v35  ;;  %v5201_v48 = vunpack.i.l.bf16 %v6415_v35  ;;  %v5195_v49 = vpop.permute.xlu0 %5194 }
  0xda   : > { %v5197_v9 = vunpack.i.h.bf16 %v5195_v49  ;;  %v5196_v10 = vunpack.i.l.bf16 %v5195_v49  ;;  %5489 = vrot.lane.b32.xlu1 %v5478_v24, %s6013_s23  ;;  %v791_v49 = vsel %vm790_vm3, %v5191_v39, %v5192_v36  ;;  %v620_v39 = vsel %vm617_vm2, %v5131_v32, %v5132_v45 }
  0xdb   : > { %v6432_v15 = vsel %vm790_vm3, %v5201_v48, %v8582_v47  ;;  %5484 = vrot.lane.b32.xlu0 %v5473_v25, %s6013_s23  ;;  %v4548_v51 = vpack.c.bf16 %v791_v49, %v618_v38  ;;  %v863_v38 = vld [vmem:[%s6051_s17 + $0x8] sm:$0xff] }
  0xdc   : > { %8716 = vst [vmem:[#allocation19_spill] sm:$0xff] %v6432_v15  ;;  %v6437_v43 = vpop.permute.xlu1 %5209  ;;  %v792_v3 = vsel %vm790_vm3, %v5192_v36, %v5196_v10  ;;  %v794_v23 = vsel %vm790_vm3, %v5197_v9, %v5201_v48  ;;  %v793_v34 = vsel %vm790_vm3, %v5196_v10, %v5197_v9  ;;  %v2688_v9 = vld [vmem:[%s6051_s17 + $0x48] sm:$0xff] }
  0xdd   : > { %v6444_v47 = vpop.permute.xlu0 %5204  ;;  %v4546_v20 = vpack.c.bf16 %v792_v3, %v619_v1  ;;  %v4582_v59 = vpack.c.bf16 %v794_v23, %v621_v16  ;;  %v4584_v36 = vpack.c.bf16 %v793_v34, %v620_v39  ;;  %v3028_v23 = vld [vmem:[%s8576_s1 + $0x8] sm:$0xff]  ;;  %v1610_v34 = vld [vmem:[%s6051_s17 + $0x50] sm:$0xff] }
  0xde   : > { %5499 = vrot.lane.b32.xlu1 %v5498_v12, %s6014_s24  ;;  %4518 = vmatprep.mubr.msk.f32.mxu1 %vm3475_vm4, %v3028_v23  ;;  %v864_v3 = vld [vmem:[%s6051_s17 + $0x10] sm:$0xff] }
  0xdf   : > { %5494 = vrot.lane.b32.xlu0 %v5453_v4, %s6014_s24  ;;  %4547 = vmatprep.subr.bf16.mxu0 %v4546_v20 }
  0xe0   : > { %4583 = vmatprep.subr.bf16.mxu1 %v4582_v59  ;;  %4549 = vmatpush1.bf16.msra.mxu0 %v4548_v51  ;;  %v6450_v48 = vpop.permute.xlu1 %5219  ;;  %v5513_v59 = vpack.i.bf16 %v2688_v9, %v6394_v5  ;;  %v5528_v51 = vpack.i.bf16 %v2688_v9, %v6397_v19 }
  0xe1   : > { %8717 = vst [vmem:[#allocation20_spill] sm:$0xff] %v6450_v48  ;;  %4585 = vmatpush1.bf16.msra.mxu1 %v4584_v36  ;;  %v6456_v32 = vpop.permute.xlu0 %5214  ;;  %4516 = vmatprep.mubr.msk.f32.mxu0 %vm3475_vm4, %v3028_v23 }
  0xe2   : > { %8718 = vst [vmem:[#allocation21_spill] sm:$0xff] %v6456_v32  ;;  %5509 = vrot.lane.b32.xlu1 %v5478_v24, %s6015_s25  ;;  %v1611_v24 = vld [vmem:[%s6051_s17 + $0x58] sm:$0xff] }
  0xe3   : > { %5504 = vrot.lane.b32.xlu0 %v5473_v25, %s6015_s25  ;;  %v5533_v46 = vpack.i.bf16 %v1611_v24, %v1610_v34 }
  0xe4   : > { %v6463_v4 = vpop.permute.xlu1 %5229 }
  0xe5   : > { %8719 = vst [vmem:[#allocation22_spill] sm:$0xff] %v6463_v4  ;;  %v6465_v20 = vpop.permute.xlu0 %5224  ;;  %v5012_v4 = vunpack.i.h.bf16 %v6230_v54 }
  0xe6   : > { %8720 = vst [vmem:[#allocation23_spill] sm:$0xff] %v6465_v20  ;;  %5519 = vrot.lane.b32.xlu1 %v5473_v25, %s6015_s25 }
  0xe7   : > { %5514 = vrot.lane.b32.xlu0 %v5513_v59, %s6014_s24  ;;  %v6592_v54 = vsel %vm271_vm0, %v5011_v14, %v5012_v4 }
  0xe8   : > { %v6470_v33 = vpop.permute.xlu1 %5239 }
  0xe9   : > { %8721 = vst [vmem:[#allocation24_spill] sm:$0xff] %v6470_v33  ;;  %v6474_v45 = vpop.permute.xlu0 %5234  ;;  %v5568_v33 = vpack.i.bf16 %v1610_v34, %v2688_v9 }
  0xea   : > { %8722 = vst [vmem:[#allocation25_spill] sm:$0xff] %v6474_v45  ;;  %5529 = vrot.lane.b32.xlu1 %v5528_v51, %s6008_s18 }
  0xeb   : > { %5524 = vrot.lane.b32.xlu0 %v5528_v51, %s6015_s25 }
  0xec   : > { %v6478_v10 = vpop.permute.xlu1 %5249 }
  0xed   : > { %8723 = vst [vmem:[#allocation26_spill] sm:$0xff] %v6478_v10  ;;  %v6480_v25 = vpop.permute.xlu0 %5244 }
  0xee   : > { %8724 = vst [vmem:[#allocation27_spill] sm:$0xff] %v6480_v25  ;;  %5539 = vrot.lane.b32.xlu1 %v5528_v51, %s6009_s19 }
  0xef   : > { %5534 = vrot.lane.b32.xlu0 %v5533_v46, %s6008_s18 }
  0xf0   : > { %v5260_v19 = vpop.permute.xlu1 %5259 }
  0xf1   : > { %v5261_v12 = vunpack.i.l.bf16 %v5260_v19  ;;  %v5255_v1 = vpop.permute.xlu0 %5254  ;;  %v5262_v39 = vunpack.i.h.bf16 %v5260_v19 }
  0xf2   : > { %v5257_v16 = vunpack.i.h.bf16 %v5255_v1  ;;  %v5256_v49 = vunpack.i.l.bf16 %v5255_v1  ;;  %5549 = vrot.lane.b32.xlu1 %v5528_v51, %s6010_s20 }
  0xf3   : > { %5544 = vrot.lane.b32.xlu0 %v5533_v46, %s6009_s19  ;;  %v1014_v19 = vsel %vm1011_vm5, %v5261_v12, %v5262_v39 }
  0xf4   : > { %v6488_v36 = vpop.permute.xlu1 %5269  ;;  %v1013_v23 = vsel %vm1011_vm5, %v5257_v16, %v5261_v12  ;;  %v1012_v59 = vsel %vm1011_vm5, %v5256_v49, %v5257_v16  ;;  %v2347_v49 = vld [vmem:[%s6051_s17 + $0x60] sm:$0xff]  ;;  %v4588_v9 = vpack.c.bf16 %v1014_v19, %v6375_v17 }
  0xf5   : > { %8725 = vst [vmem:[#allocation28_spill] sm:$0xff] %v6488_v36  ;;  %v6492_v8 = vpop.permute.xlu0 %5264  ;;  %v4550_v25 = vpack.c.bf16 %v1013_v23, %v864_v3  ;;  %v4552_v45 = vpack.c.bf16 %v1012_v59, %v863_v38  ;;  %v5042_v36 = vunpack.i.h.bf16 %v6253_v62 }
  0xf6   : > { %8726 = vst [vmem:[#allocation29_spill] sm:$0xff] %v6492_v8  ;;  %v8590_v1 = vunpack.i.l.bf16 %v6492_v8  ;;  %5559 = vrot.lane.b32.xlu1 %v5528_v51, %s6011_s21  ;;  %v5573_v51 = vpack.i.bf16 %v2347_v49, %v1611_v24 }
  0xf7   : > { %5554 = vrot.lane.b32.xlu0 %v5533_v46, %s6010_s20  ;;  %4551 = vmatprep.subr.bf16.mxu0 %v4550_v25 }
  0xf8   : > { %4553 = vmatpush1.bf16.msra.mxu0 %v4552_v45  ;;  %v6498_v50 = vpop.permute.xlu1 %5279  ;;  %v1015_v16 = vsel %vm1011_vm5, %v5262_v39, %v8590_v1 }
  0xf9   : > { %8727 = vst [vmem:[#allocation30_spill] sm:$0xff] %v6498_v50  ;;  %v6504_v3 = vpop.permute.xlu0 %5274  ;;  %v4586_v38 = vpack.c.bf16 %v1015_v16, %v6394_v5  ;;  %v2692_v5 = vld [vmem:[%s6051_s17 + $0x68] sm:$0xff]  ;;  %v1614_v16 = vld [vmem:[%s6051_s17 + $0x70] sm:$0xff] }
  0xfa   : > { %8728 = vst [vmem:[#allocation31_spill] sm:$0xff] %v6504_v3  ;;  %5569 = vrot.lane.b32.xlu1 %v5568_v33, %s6012_s22  ;;  %v5593_v17 = vpack.i.bf16 %v2692_v5, %v2347_v49  ;;  %v6539_v49 = vld [vmem:[%s6051_s17 + $0x78] sm:$0xff] }
  0xfb   : > { %5564 = vrot.lane.b32.xlu0 %v5533_v46, %s6011_s21  ;;  %4587 = vmatprep.subr.bf16.mxu1 %v4586_v38 }
  0xfc   : > { %4589 = vmatpush1.bf16.msra.mxu1 %v4588_v9  ;;  %v6510_v34 = vpop.permute.xlu1 %5289 }
  0xfd   : > { %8729 = vst [vmem:[#allocation32_spill] sm:$0xff] %v6510_v34  ;;  %v6512_v45 = vpop.permute.xlu0 %5284  ;;  %v2351_v34 = vld [vmem:[%s6051_s17 + $0x80] sm:$0xff] }
  0xfe   : > { %8730 = vst [vmem:[#allocation33_spill] sm:$0xff] %v6512_v45  ;;  %5579 = vrot.lane.b32.xlu1 %v5568_v33, %s6013_s23 }
  0xff   : > { %5574 = vrot.lane.b32.xlu0 %v5573_v51, %s6012_s22 }
 0x100   : > { %v6516_v25 = vpop.permute.xlu1 %5299 }
 0x101   : > { %8731 = vst [vmem:[#allocation34_spill] sm:$0xff] %v6516_v25  ;;  %v6519_v12 = vpop.permute.xlu0 %5294  ;;  %v5658_v25 = vpack.i.bf16 %v1614_v16, %v2692_v5  ;;  %v8613_v5 = vunpack.i.h.bf16 %v6236_v56 }
 0x102   : > { %8732 = vst [vmem:[#allocation35_spill] sm:$0xff] %v6519_v12  ;;  %5589 = vrot.lane.b32.xlu1 %v5533_v46, %s6014_s24 }
 0x103   : > { %5584 = vrot.lane.b32.xlu0 %v5573_v51, %s6013_s23 }
 0x104   : > { %v6523_v24 = vpop.permute.xlu1 %5309 }
 0x105   : > { %8733 = vst [vmem:[#allocation36_spill] sm:$0xff] %v6523_v24  ;;  %v6525_v39 = vpop.permute.xlu0 %5304 }
 0x106   : > { %8734 = vst [vmem:[#allocation37_spill] sm:$0xff] %v6525_v39  ;;  %5599 = vrot.lane.b32.xlu1 %v5568_v33, %s6015_s25  ;;  %v6546_v33 = vpack.i.bf16 %v6539_v49, %v1614_v16  ;;  %v8614_v16 = vunpack.i.l.bf16 %v6236_v56 }
 0x107   : > { %5594 = vrot.lane.b32.xlu0 %v5593_v17, %s6014_s24 }
 0x108   : > { %v6529_v23 = vpop.permute.xlu1 %5319 }
 0x109   : > { %v6531_v59 = vpop.permute.xlu0 %5314 }
 0x10a   : > { %8735 = vst [vmem:[#allocation38_spill] sm:$0xff] %v6531_v59  ;;  %5609 = vrot.lane.b32.xlu1 %v5533_v46, %s6015_s25 }
 0x10b   : > { %5604 = vrot.lane.b32.xlu0 %v5573_v51, %s6015_s25 }
 0x10c   : > { %v6535_v19 = vpop.permute.xlu1 %5329 }
 0x10d   : > { %8736 = vst [vmem:[#allocation39_spill] sm:$0xff] %v6535_v19  ;;  %v6541_v38 = vpop.permute.xlu0 %5324  ;;  %v8626_v3 = vunpack.i.h.bf16 %v6535_v19 }
 0x10e   : > { %5619 = vrot.lane.b32.xlu1 %v5593_v17, %s6008_s18  ;;  %v5326_v50 = vunpack.i.l.bf16 %v6541_v38  ;;  %v5327_v13 = vunpack.i.h.bf16 %v6541_v38 }
 0x10f   : > { %5614 = vrot.lane.b32.xlu0 %v5593_v17, %s6015_s25 }
 0x110   : > { %v6548_v9 = vpop.permute.xlu1 %5339 }
 0x111   : > { %8737 = vst [vmem:[#allocation40_spill] sm:$0xff] %v6548_v9  ;;  %v6550_v46 = vpop.permute.xlu0 %5334 }
 0x112   : > { %8738 = vst [vmem:[#allocation41_spill] sm:$0xff] %v6550_v46  ;;  %5629 = vrot.lane.b32.xlu1 %v5593_v17, %s6009_s19 }
 0x113   : > { %5624 = vrot.lane.b32.xlu0 %v6546_v33, %s6008_s18 }
 0x114   : > { %v6555_v51 = vpop.permute.xlu1 %5349 }
 0x115   : > { %8739 = vst [vmem:[#allocation42_spill] sm:$0xff] %v6555_v51  ;;  %v6557_v1 = vpop.permute.xlu0 %5344  ;;  %v5321_v51 = vunpack.i.l.bf16 %v6529_v23 }
 0x116   : > { %8740 = vst [vmem:[#allocation43_spill] sm:$0xff] %v6557_v1  ;;  %5639 = vrot.lane.b32.xlu1 %v5593_v17, %s6010_s20  ;;  %v5322_v1 = vunpack.i.h.bf16 %v6529_v23  ;;  %v8750_v23 = vunpack.i.h.bf16 %v6222_v52  ;;  %v5331_v52 = vunpack.i.l.bf16 %v6535_v19 }
 0x117   : > { %5634 = vrot.lane.b32.xlu0 %v6546_v33, %s6009_s19 }
 0x118   : > { %v6562_v24 = vpop.permute.xlu1 %5359  ;;  %v6614_v48 = vsel %vm271_vm0, %v8750_v23, %v5011_v14  ;;  %v5683_v23 = vpack.i.bf16 %v6539_v49, %v2351_v34 }
 0x119   : > { %8741 = vst [vmem:[#allocation44_spill] sm:$0xff] %v6562_v24  ;;  %v6564_v39 = vpop.permute.xlu0 %5354 }
 0x11a   : > { %8742 = vst [vmem:[#allocation45_spill] sm:$0xff] %v6564_v39  ;;  %5649 = vrot.lane.b32.xlu1 %v5593_v17, %s6011_s21  ;;  %v6580_v17 = vpack.i.bf16 %v2351_v34, %v6539_v49 }
 0x11b   : > { %5644 = vrot.lane.b32.xlu0 %v6546_v33, %s6010_s20 }
 0x11c   : > { %v6569_v12 = vpop.permute.xlu1 %5369 }
 0x11d   : > { %8743 = vst [vmem:[#allocation46_spill] sm:$0xff] %v6569_v12  ;;  %v6572_v20 = vpop.permute.xlu0 %5364  ;;  %v6603_v12 = vsel %vm271_vm0, %v8614_v16, %v8613_v5  ;;  %v5027_v16 = vunpack.i.h.bf16 %v6248_v61 }
 0x11e   : > { %8744 = vst [vmem:[#allocation47_spill] sm:$0xff] %v6572_v20  ;;  %5659 = vrot.lane.b32.xlu1 %v5658_v25, %s6012_s22  ;;  %v5016_v20 = vunpack.i.l.bf16 %v6239_v58  ;;  %8747 = vst [vmem:[#allocation50_spill] sm:$0xff] %v6603_v12 }
 0x11f   : > { %5654 = vrot.lane.b32.xlu0 %v6546_v33, %s6011_s21 }
 0x120   : > { %v6586_v24 = vpop.permute.xlu1 %5379  ;;  %v6618_v5 = vsel %vm271_vm0, %v5012_v4, %v5016_v20  ;;  %v1185_v4 = vsel %vm1184_vm6, %v5321_v51, %v5322_v1 }
 0x121   : > { %8745 = vst [vmem:[#allocation48_spill] sm:$0xff] %v6586_v24  ;;  %v6588_v39 = vpop.permute.xlu0 %5374 }
 0x122   : > { %8746 = vst [vmem:[#allocation49_spill] sm:$0xff] %v6588_v39  ;;  %5669 = vrot.lane.b32.xlu1 %v5658_v25, %s6013_s23  ;;  %v8748_v39 = vunpack.i.h.bf16 %v6239_v58 }
 0x123   : > { %5664 = vrot.lane.b32.xlu0 %v6580_v17, %s6012_s22 }
 0x124   : > { %v6608_v45 = vsel %vm271_vm0, %v5016_v20, %v8748_v39  ;;  %v5390_v32 = vpop.permute.xlu1 %5389  ;;  %v5031_v39 = vunpack.i.l.bf16 %v6246_v60  ;;  %v6630_v20 = vld [vmem:[%s6051_s17 + $0x88] sm:$0xff] }
 0x125   : > { %8749 = vst [vmem:[#allocation51_spill] sm:$0xff] %v6608_v45  ;;  %v5391_v28 = vunpack.i.l.bf16 %v5390_v32  ;;  %v5385_v15 = vpop.permute.xlu0 %5384  ;;  %v5392_v14 = vunpack.i.h.bf16 %v5390_v32  ;;  %v5026_v32 = vunpack.i.l.bf16 %v6248_v61  ;;  %v5037_v61 = vunpack.i.h.bf16 %v6255_v63  ;;  %v6835_v45 = vld [vmem:[%s6051_s17 + $0xa0] sm:$0xff] }
 0x126   : > { %v5387_v27 = vunpack.i.h.bf16 %v5385_v15  ;;  %v5386_v31 = vunpack.i.l.bf16 %v5385_v15  ;;  %5679 = vrot.lane.b32.xlu1 %v6546_v33, %s6014_s24  ;;  %v1186_v15 = vsel %vm1184_vm6, %v5322_v1, %v5326_v50  ;;  %v6647_v1 = vpack.i.bf16 %v6630_v20, %v2351_v34 }
 0x127   : > { %5674 = vrot.lane.b32.xlu0 %v6580_v17, %s6013_s23 }
 0x128   : > { %v6633_v46 = vpop.permute.xlu1 %5399  ;;  %v1359_v9 = vsel %vm1357_vm7, %v5387_v27, %v5391_v28  ;;  %v1358_v35 = vsel %vm1357_vm7, %v5386_v31, %v5387_v27  ;;  %v5041_v27 = vunpack.i.l.bf16 %v6253_v62  ;;  %v5036_v31 = vunpack.i.l.bf16 %v6255_v63 }
 0x129   : > { %8751 = vst [vmem:[#allocation52_spill] sm:$0xff] %v6633_v46  ;;  %v6640_v8 = vpop.permute.xlu0 %5394  ;;  %v4554_v49 = vpack.c.bf16 %v1359_v9, %v1186_v15  ;;  %v4556_v51 = vpack.c.bf16 %v1358_v35, %v1185_v4  ;;  %v1360_v35 = vsel %vm1357_vm7, %v5391_v28, %v5392_v14  ;;  %v1188_v62 = vsel %vm1184_vm6, %v5327_v13, %v5331_v52 }
 0x12a   : > { %8752 = vst [vmem:[#allocation53_spill] sm:$0xff] %v6640_v8  ;;  %v8625_v38 = vunpack.i.h.bf16 %v6640_v8  ;;  %v5396_v46 = vunpack.i.l.bf16 %v6640_v8  ;;  %5689 = vrot.lane.b32.xlu1 %v5658_v25, %s6015_s25  ;;  %v5051_v63 = vunpack.i.l.bf16 %v6261_v0  ;;  %v6668_v28 = vsel %vm1184_vm6, %v5331_v52, %v8626_v3 }
 0x12b   : > { %5684 = vrot.lane.b32.xlu0 %v5683_v23, %s6014_s24  ;;  %4555 = vmatprep.subr.bf16.mxu0 %v4554_v49  ;;  %8755 = vst [vmem:[#allocation56_spill] sm:$0xff] %v6668_v28  ;;  %v1187_v49 = vsel %vm1184_vm6, %v5326_v50, %v5327_v13  ;;  %v8756_v9 = vunpack.i.h.bf16 %v6246_v60  ;;  %v5077_v13 = vunpack.i.h.bf16 %v6307_v44  ;;  %v6692_v50 = vld [vmem:[%s6051_s17 + $0x98] sm:$0xff] }
 0x12c   : > { %v6658_v25 = vsel %vm1357_vm7, %v5396_v46, %v8625_v38  ;;  %4557 = vmatpush1.bf16.msra.mxu0 %v4556_v51  ;;  %v6660_v34 = vpop.permute.xlu1 %5409  ;;  %v1361_v4 = vsel %vm1357_vm7, %v5392_v14, %v5396_v46  ;;  %v5047_v51 = vunpack.i.h.bf16 %v6263_v2  ;;  %v5046_v38 = vunpack.i.l.bf16 %v6263_v2  ;;  %v6689_v2 = vld [vmem:[%s6051_s17 + $0x90] sm:$0xff] }
 0x12d   : > { %8753 = vst [vmem:[#allocation54_spill] sm:$0xff] %v6658_v25  ;;  %8754 = vst [vmem:[#allocation55_spill] sm:$0xff] %v6660_v34  ;;  %v6670_v23 = vpop.permute.xlu0 %5404  ;;  %v4590_v15 = vpack.c.bf16 %v1361_v4, %v1188_v62  ;;  %v4592_v46 = vpack.c.bf16 %v1360_v35, %v1187_v49  ;;  %v6682_v52 = vsel %vm271_vm0, %v5031_v39, %v8756_v9  ;;  %v5081_v62 = vunpack.i.l.bf16 %v6300_v37 }
 0x12e   : > { %5699 = vrot.lane.b32.xlu1 %v6647_v1, %s6014_s24  ;;  %8757 = vst [vmem:[#allocation57_spill] sm:$0xff] %v6682_v52  ;;  %v8758_v35 = vunpack.i.l.bf16 %v6236_v56  ;;  %v8759_v4 = vunpack.i.h.bf16 %v6239_v58  ;;  %v6702_v9 = vsel %vm271_vm0, %v5026_v32, %v5027_v16  ;;  %v5076_v14 = vunpack.i.l.bf16 %v6307_v44 }
 0x12f   : > { %5694 = vrot.lane.b32.xlu0 %v6580_v17, %s6015_s25  ;;  %4591 = vmatprep.subr.bf16.mxu1 %v4590_v15  ;;  %8760 = vst [vmem:[#allocation58_spill] sm:$0xff] %v6702_v9  ;;  %v8761_v17 = vunpack.i.h.bf16 %v6236_v56  ;;  %v6713_v34 = vsel %vm271_vm0, %v5027_v16, %v5031_v39  ;;  %v6716_v58 = vsel %vm271_vm0, %v5041_v27, %v5042_v36  ;;  %v8766_v44 = vunpack.i.h.bf16 %v6246_v60 }
 0x130   : > { %v6699_v49 = vsel %vm271_vm0, %v8759_v4, %v8758_v35  ;;  %4593 = vmatpush1.bf16.msra.mxu1 %v4592_v46  ;;  %v6705_v3 = vpop.permute.xlu1 %5419  ;;  %8762 = vst [vmem:[#allocation59_spill] sm:$0xff] %v6713_v34  ;;  %8763 = vst [vmem:[#allocation60_spill] sm:$0xff] %v6716_v58  ;;  %v6719_v35 = vsel %vm271_vm0, %v5036_v31, %v5037_v61  ;;  %v6729_v56 = vsel %vm271_vm0, %v5037_v61, %v5041_v27 }
 0x131   : > { %v6710_v15 = vsel %vm271_vm0, %v8761_v17, %v5026_v32  ;;  %8764 = vst [vmem:[#allocation61_spill] sm:$0xff] %v6719_v35  ;;  %v6721_v4 = vpop.permute.xlu0 %5414  ;;  %v6726_v46 = vsel %vm271_vm0, %v8766_v44, %v5036_v31  ;;  %8768 = vst [vmem:[#allocation64_spill] sm:$0xff] %v6729_v56  ;;  %v8769_v32 = vunpack.i.h.bf16 %v6261_v0  ;;  %v6737_v39 = vsel %vm271_vm0, %v5046_v38, %v5047_v51 }
 0x132   : > { %8765 = vst [vmem:[#allocation62_spill] sm:$0xff] %v6721_v4  ;;  %8767 = vst [vmem:[#allocation63_spill] sm:$0xff] %v6726_v46  ;;  %v5082_v17 = vunpack.i.h.bf16 %v6300_v37  ;;  %5709 = vrot.lane.b32.xlu1 %v6647_v1, %s6015_s25  ;;  %v6744_v60 = vpack.i.bf16 %v6692_v50, %v6689_v2  ;;  %v5422_v27 = vunpack.i.h.bf16 %v6705_v3  ;;  %v5421_v61 = vunpack.i.l.bf16 %v6705_v3 }
 0x133   : > { %v6734_v16 = vsel %vm271_vm0, %v5051_v63, %v8769_v32  ;;  %8771 = vst [vmem:[#allocation66_spill] sm:$0xff] %v6737_v39  ;;  %5704 = vrot.lane.b32.xlu0 %v6546_v33, %s6015_s25  ;;  %v6751_v31 = vsel %vm444_vm1, %v5077_v13, %v5081_v62  ;;  %v6754_v44 = vsel %vm271_vm0, %v5042_v36, %v5046_v38  ;;  %v5091_v32 = vunpack.i.l.bf16 %v6315_v53 }
 0x134   : > { %8770 = vst [vmem:[#allocation65_spill] sm:$0xff] %v6734_v16  ;;  %8772 = vst [vmem:[#allocation67_spill] sm:$0xff] %v6754_v44  ;;  %v5430_v16 = vpop.permute.xlu1 %5429  ;;  %v8773_v39 = vunpack.i.h.bf16 %v6277_v18  ;;  %v5057_v3 = vunpack.i.h.bf16 %v6269_v7  ;;  %v5087_v33 = vunpack.i.h.bf16 %v6317_v55  ;;  %v5086_v58 = vunpack.i.l.bf16 %v6317_v55 }
 0x135   : > { %v5431_v4 = vunpack.i.l.bf16 %v5430_v16  ;;  %v6766_v36 = vpop.permute.xlu0 %5424  ;;  %v6769_v38 = vsel %vm444_vm1, %v5081_v62, %v5082_v17  ;;  %v6772_v37 = vsel %vm444_vm1, %v5076_v14, %v5077_v13  ;;  %v5432_v7 = vunpack.i.h.bf16 %v5430_v16 }
 0x136   : > { %v6761_v0 = vsel %vm444_vm1, %v8773_v39, %v5076_v14  ;;  %8774 = vst [vmem:[#allocation68_spill] sm:$0xff] %v6769_v38  ;;  %5719 = vrot.lane.b32.xlu1 %v6744_v60, %s6008_s18  ;;  %v6779_v39 = vsel %vm271_vm0, %v5047_v51, %v5051_v63  ;;  %v1532_v55 = vsel %vm1530_vm8, %v5421_v61, %v5422_v27  ;;  %v8776_v13 = vunpack.i.h.bf16 %v6315_v53 }
 0x137   : > { %8775 = vst [vmem:[#allocation69_spill] sm:$0xff] %v6779_v39  ;;  %5714 = vrot.lane.b32.xlu0 %v6647_v1, %s6008_s18  ;;  %v1704_v62 = vsel %vm271_vm0, %v5057_v3, %v5431_v4  ;;  %v5426_v63 = vunpack.i.l.bf16 %v6766_v36  ;;  %v6797_v39 = vsel %vm444_vm1, %v5086_v58, %v5087_v33  ;;  %v1705_v19 = vsel %vm271_vm0, %v5431_v4, %v5432_v7 }
 0x138   : > { %v6790_v44 = vsel %vm444_vm1, %v5091_v32, %v8776_v13  ;;  %v6794_v51 = vpop.permute.xlu1 %5439  ;;  %v4558_v16 = vpack.c.bf16 %v1704_v62, %v1532_v55  ;;  %8778 = vst [vmem:[#allocation71_spill] sm:$0xff] %v6797_v39  ;;  %v6811_v55 = vsel %vm444_vm1, %v5082_v17, %v5086_v58  ;;  %v6814_v62 = vsel %vm444_vm1, %v5087_v33, %v5091_v32 }
 0x139   : > { %8777 = vst [vmem:[#allocation70_spill] sm:$0xff] %v6790_v44  ;;  %v5441_v28 = vunpack.i.l.bf16 %v6794_v51  ;;  %v6800_v25 = vpop.permute.xlu0 %5434  ;;  %v8779_v17 = vunpack.i.h.bf16 %v6766_v36  ;;  %v1533_v38 = vsel %vm1530_vm8, %v5422_v27, %v5426_v63  ;;  %v5096_v27 = vunpack.i.l.bf16 %v6324_v41 }
 0x13a   : > { %v5437_v18 = vunpack.i.h.bf16 %v6800_v25  ;;  %5729 = vrot.lane.b32.xlu1 %v6744_v60, %s6009_s19  ;;  %4559 = vmatprep.subr.bf16.mxu0 %v4558_v16  ;;  %v8780_v33 = vunpack.i.l.bf16 %v6800_v25 }
 0x13b   : > { %5724 = vrot.lane.b32.xlu0 %v6647_v1, %s6009_s19  ;;  %v1531_v13 = vsel %vm1530_vm8, %v5441_v28, %v5421_v61  ;;  %v1534_v32 = vsel %vm1530_vm8, %v5426_v63, %v8779_v17  ;;  %v5101_v28 = vunpack.i.l.bf16 %v6322_v57 }
 0x13c   : > { %v6823_v16 = vpop.permute.xlu1 %5449  ;;  %v1703_v58 = vsel %vm271_vm0, %v5437_v18, %v5057_v3  ;;  %v1706_v14 = vsel %vm271_vm0, %v5432_v7, %v8780_v33  ;;  %v6854_v33 = vpack.i.bf16 %v6835_v45, %v6692_v50  ;;  %v5187_v3 = vunpack.i.h.bf16 %v6407_v29 }
 0x13d   : > { %v5445_v4 = vpop.permute.xlu0 %5444  ;;  %v4560_v61 = vpack.c.bf16 %v1703_v58, %v1531_v13  ;;  %v4594_v8 = vpack.c.bf16 %v1706_v14, %v1534_v32  ;;  %v5452_v17 = vunpack.i.h.bf16 %v6823_v16  ;;  %v4596_v13 = vpack.c.bf16 %v1705_v19, %v1533_v38 }
 0x13e   : > { %v5446_v9 = vunpack.i.l.bf16 %v5445_v4  ;;  %5739 = vrot.lane.b32.xlu1 %v6744_v60, %s6010_s20  ;;  %v5447_v63 = vunpack.i.h.bf16 %v5445_v4  ;;  %v5122_v58 = vunpack.i.h.bf16 %v6338_v42  ;;  %v6016_v38 = vmov 0  }
 0x13f   : > { %5734 = vrot.lane.b32.xlu0 %v6647_v1, %s6010_s20  ;;  %4561 = vmatpush1.bf16.msra.mxu0 %v4560_v61  ;;  %v5252_v14 = vunpack.i.h.bf16 %v6478_v10 }
 0x140   : > { %4595 = vmatprep.subr.bf16.mxu1 %v4594_v8  ;;  %v6850_v32 = vpop.permute.xlu1 %5459  ;;  %v6863_v8 = vpack.i.bf16 %v6689_v2, %v6630_v20  ;;  %5993 = vset.pattern.permute.xlu0 %v6016_v38  ;;  %v1876_v7 = vsel %vm444_vm1, %v5122_v58, %v5446_v9  ;;  %v8781_v20 = vunpack.i.l.bf16 %v6823_v16 }
 0x141   : > { %4597 = vmatpush1.bf16.msra.mxu1 %v4596_v13  ;;  %v5462_v4 = vunpack.i.h.bf16 %v6850_v32  ;;  %v5455_v19 = vpop.permute.xlu0 %5454  ;;  %v1875_v13 = vsel %vm444_vm1, %v5452_v17, %v5122_v58  ;;  %5994 = vset.pattern.permute.xlu1 %v6016_v38  ;;  %v8782_v17 = vunpack.i.l.bf16 %v6850_v32 }
 0x142   : > { %v5457_v18 = vunpack.i.h.bf16 %v5455_v19  ;;  %v5456_v50 = vunpack.i.l.bf16 %v5455_v19  ;;  %5749 = vrot.lane.b32.xlu1 %v6744_v60, %s6011_s21  ;;  %v1878_v2 = vsel %vm444_vm1, %v5447_v63, %v8781_v20  ;;  %v1877_v19 = vsel %vm444_vm1, %v5446_v9, %v5447_v63  ;;  %v2291_v9 = vld [vmem:[%s6051_s17 + $0x20] sm:$0xff] }
 0x143   : > { %5744 = vrot.lane.b32.xlu0 %v6647_v1, %s6011_s21  ;;  %v2047_v61 = vsel %vm617_vm2, %v5462_v4, %v5187_v3  ;;  %v8783_v63 = vunpack.i.h.bf16 %v6322_v57 }
 0x144   : > { %v6877_v29 = vpop.permute.xlu1 %5469  ;;  %v2048_v42 = vsel %vm617_vm2, %v5187_v3, %v5456_v50  ;;  %v2050_v58 = vsel %vm617_vm2, %v5457_v18, %v8782_v17  ;;  %v4564_v10 = vpack.c.bf16 %v2047_v61, %v1875_v13  ;;  %v2049_v1 = vsel %vm617_vm2, %v5456_v50, %v5457_v18 }
 0x145   : > { %v5472_v44 = vunpack.i.h.bf16 %v6877_v29  ;;  %v8647_v20 = vunpack.i.l.bf16 %v6877_v29  ;;  %v5465_v12 = vpop.permute.xlu0 %5464  ;;  %v4562_v4 = vpack.c.bf16 %v2048_v42, %v1876_v7  ;;  %v4598_v39 = vpack.c.bf16 %v2050_v58, %v1878_v2 }
 0x146   : > { %v6890_v3 = vsel %vm444_vm1, %v5101_v28, %v8783_v63  ;;  %v5467_v38 = vunpack.i.h.bf16 %v5465_v12  ;;  %v5466_v17 = vunpack.i.l.bf16 %v5465_v12  ;;  %5759 = vrot.lane.b32.xlu1 %v6854_v33, %s6012_s22  ;;  %v4600_v18 = vpack.c.bf16 %v2049_v1, %v1877_v19  ;;  %v6911_v19 = vld [vmem:[%s6051_s17 + $0x28] sm:$0xff] }
 0x147   : > { %8784 = vst [vmem:[#allocation72_spill] sm:$0xff] %v6890_v3  ;;  %5754 = vrot.lane.b32.xlu0 %v6863_v8, %s6012_s22  ;;  %4563 = vmatprep.subr.bf16.mxu0 %v4562_v4  ;;  %v2219_v42 = vsel %vm790_vm3, %v5472_v44, %v5252_v14  ;;  %v8785_v7 = vunpack.i.h.bf16 %v6315_v53  ;;  %v8787_v50 = vunpack.i.h.bf16 %v6324_v41  ;;  %v6917_v44 = vld [vmem:[%s6051_s17 + $0x38] sm:$0xff]  ;;  %v5141_v41 = vunpack.i.l.bf16 %v6354_v21 }
 0x148   : > { %4599 = vmatprep.subr.bf16.mxu1 %v4598_v39  ;;  %4565 = vmatpush1.bf16.msra.mxu0 %v4564_v10  ;;  %v6907_v12 = vpop.permute.xlu1 %5479  ;;  %v2220_v2 = vsel %vm790_vm3, %v5252_v14, %v5466_v17  ;;  %v2222_v53 = vsel %vm790_vm3, %v5467_v38, %v8647_v20  ;;  %v4568_v58 = vpack.c.bf16 %v2291_v9, %v2219_v42  ;;  %v6932_v42 = vld [vmem:[%s6051_s17 + $0x30] sm:$0xff] }
 0x149   : > { %v6900_v61 = vsel %vm444_vm1, %v8785_v7, %v5096_v27  ;;  %v6905_v13 = vsel %vm444_vm1, %v8787_v50, %v5101_v28  ;;  %v8789_v1 = vmov %v8787_v50  ;;  %4601 = vmatpush1.bf16.msra.mxu1 %v4600_v18  ;;  %v5475_v39 = vpop.permute.xlu0 %5474  ;;  %v4566_v14 = vpack.c.bf16 %v6911_v19, %v2220_v2 }
 0x14a   : > { %8786 = vst [vmem:[#allocation73_spill] sm:$0xff] %v6900_v61  ;;  %8788 = vst [vmem:[#allocation74_spill] sm:$0xff] %v6905_v13  ;;  %v6922_v28 = vsel %vm444_vm1, %v5096_v27, %v8789_v1  ;;  %v4602_v4 = vpack.c.bf16 %v6917_v44, %v2222_v53  ;;  %v5482_v63 = vunpack.i.h.bf16 %v6907_v12  ;;  %5769 = vrot.lane.b32.xlu1 %v6854_v33, %s6013_s23  ;;  %v8654_v18 = vunpack.i.l.bf16 %v6907_v12 }
 0x14b   : > { %8790 = vst [vmem:[#allocation75_spill] sm:$0xff] %v6922_v28  ;;  %v2221_v9 = vsel %vm790_vm3, %v5466_v17, %v5467_v38  ;;  %v5477_v7 = vunpack.i.h.bf16 %v5475_v39  ;;  %v5476_v50 = vunpack.i.l.bf16 %v5475_v39  ;;  %5764 = vrot.lane.b32.xlu0 %v6863_v8, %s6013_s23  ;;  %4567 = vmatprep.subr.bf16.mxu0 %v4566_v14  ;;  %v5107_v38 = vunpack.i.h.bf16 %v6332_v6 }
 0x14c   : > { %v4604_v2 = vpack.c.bf16 %v6932_v42, %v2221_v9  ;;  %v5106_v17 = vunpack.i.l.bf16 %v6332_v6  ;;  %4603 = vmatprep.subr.bf16.mxu1 %v4602_v4  ;;  %4569 = vmatpush1.bf16.msra.mxu0 %v4568_v58  ;;  %v6944_v53 = vpop.permute.xlu1 %5489  ;;  %v5317_v27 = vunpack.i.h.bf16 %v6531_v59  ;;  %v5382_v14 = vunpack.i.h.bf16 %v6586_v24  ;;  %v6967_v6 = vld [vmem:[%s6051_s17 + $0xa8] sm:$0xff] }
 0x14d   : > { %v5492_v9 = vunpack.i.h.bf16 %v6944_v53  ;;  %v5485_v4 = vpop.permute.xlu0 %5484  ;;  %v8791_v59 = vunpack.i.l.bf16 %v6944_v53 }
 0x14e   : > { %4605 = vmatpush1.bf16.msra.mxu1 %v4604_v2  ;;  %v5487_v20 = vunpack.i.h.bf16 %v5485_v4  ;;  %v5486_v1 = vunpack.i.l.bf16 %v5485_v4  ;;  %5779 = vrot.lane.b32.xlu1 %v6854_v33, %s6014_s24  ;;  %v2440_v39 = vsel %vm1011_vm5, %v5317_v27, %v5476_v50  ;;  %v2442_v2 = vsel %vm1011_vm5, %v5477_v7, %v8654_v18 }
 0x14f   : > { %5774 = vrot.lane.b32.xlu0 %v6863_v8, %s6014_s24  ;;  %v2439_v10 = vsel %vm1011_vm5, %v5482_v63, %v5317_v27  ;;  %v2611_v58 = vsel %vm1184_vm6, %v5492_v9, %v5382_v14  ;;  %v2441_v63 = vsel %vm1011_vm5, %v5476_v50, %v5477_v7  ;;  %v8792_v27 = vunpack.i.h.bf16 %v6322_v57 }
 0x150   : > { %v6969_v24 = vpop.permute.xlu1 %5499  ;;  %v2612_v4 = vsel %vm1184_vm6, %v5382_v14, %v5486_v1  ;;  %v2614_v35 = vsel %vm1184_vm6, %v5487_v20, %v8791_v59  ;;  %v4572_v3 = vpack.c.bf16 %v2611_v58, %v2439_v10  ;;  %v2613_v52 = vsel %vm1184_vm6, %v5486_v1, %v5487_v20 }
 0x151   : > { %v6976_v28 = vpop.permute.xlu0 %5494  ;;  %v4570_v18 = vpack.c.bf16 %v2612_v4, %v2440_v39  ;;  %v4606_v46 = vpack.c.bf16 %v2614_v35, %v2442_v2  ;;  %v6982_v9 = vsel %vm444_vm1, %v8792_v27, %v5106_v17  ;;  %v6985_v14 = vsel %vm444_vm1, %v5106_v17, %v5107_v38 }
 0x152   : > { %8793 = vst [vmem:[#allocation76_spill] sm:$0xff] %v6982_v9  ;;  %8794 = vst [vmem:[#allocation77_spill] sm:$0xff] %v6985_v14  ;;  %5789 = vrot.lane.b32.xlu1 %v6854_v33, %s6015_s25  ;;  %v4608_v59 = vpack.c.bf16 %v2613_v52, %v2441_v63  ;;  %v6991_v20 = vpack.i.bf16 %v6967_v6, %v6835_v45  ;;  %v8795_v35 = vunpack.i.l.bf16 %v6330_v40  ;;  %v8656_v57 = vunpack.i.h.bf16 %v6969_v24 }
 0x153   : > { %v5501_v7 = vunpack.i.l.bf16 %v6969_v24  ;;  %v5497_v50 = vunpack.i.h.bf16 %v6976_v28  ;;  %v5496_v17 = vunpack.i.l.bf16 %v6976_v28  ;;  %5784 = vrot.lane.b32.xlu0 %v6863_v8, %s6015_s25  ;;  %4571 = vmatprep.subr.bf16.mxu0 %v4570_v18  ;;  %v8797_v45 = vunpack.i.h.bf16 %v6354_v21 }
 0x154   : > { %v6996_v10 = vsel %vm444_vm1, %v5107_v38, %v8795_v35  ;;  %4607 = vmatprep.subr.bf16.mxu1 %v4606_v46  ;;  %4573 = vmatpush1.bf16.msra.mxu0 %v4572_v3  ;;  %v7009_v33 = vpop.permute.xlu1 %5509  ;;  %v8798_v38 = vunpack.i.h.bf16 %v6356_v26  ;;  %v5151_v18 = vunpack.i.l.bf16 %v6362_v22  ;;  %v5147_v39 = vunpack.i.h.bf16 %v6365_v11 }
 0x155   : > { %8796 = vst [vmem:[#allocation78_spill] sm:$0xff] %v6996_v10  ;;  %v7007_v52 = vsel %vm617_vm2, %v5141_v41, %v8797_v45  ;;  %4609 = vmatpush1.bf16.msra.mxu1 %v4608_v59  ;;  %v8661_v46 = vunpack.i.l.bf16 %v7009_v33  ;;  %v5505_v3 = vpop.permute.xlu0 %5504  ;;  %v5146_v26 = vunpack.i.l.bf16 %v6365_v11  ;;  %v5207_v63 = vunpack.i.h.bf16 %v6444_v47  ;;  %v7035_v59 = vld [vmem:[%s6051_s17 + $0xb0] sm:$0xff] }
 0x156   : > { %v7014_v1 = vsel %vm617_vm2, %v8798_v38, %v5141_v41  ;;  %v5442_v41 = vunpack.i.h.bf16 %v6794_v51  ;;  %v5507_v58 = vunpack.i.h.bf16 %v5505_v3  ;;  %v5506_v2 = vunpack.i.l.bf16 %v5505_v3  ;;  %5799 = vrot.lane.b32.xlu1 %v6991_v20, %s6014_s24  ;;  %v7038_v51 = vld [vmem:[%s6051_s17 + $0xb8] sm:$0xff] }
 0x157   : > { %5794 = vrot.lane.b32.xlu0 %v6744_v60, %s6014_s24  ;;  %v2784_v27 = vsel %vm1357_vm7, %v5496_v17, %v5497_v50  ;;  %v2786_v11 = vsel %vm1357_vm7, %v5501_v7, %v8656_v57  ;;  %v5512_v35 = vunpack.i.h.bf16 %v7009_v33  ;;  %v5206_v4 = vunpack.i.l.bf16 %v6444_v47 }
 0x158   : > { %v7041_v45 = vpop.permute.xlu1 %5519  ;;  %v2956_v38 = vsel %vm1530_vm8, %v5442_v41, %v5506_v2  ;;  %v2958_v3 = vsel %vm1530_vm8, %v5507_v58, %v8661_v46  ;;  %v2957_v28 = vsel %vm1530_vm8, %v5506_v2, %v5507_v58  ;;  %v2785_v56 = vsel %vm1357_vm7, %v5497_v50, %v5501_v7  ;;  %v8800_v7 = vld [vmem:[#allocation28_spill] sm:$0xff] }
 0x159   : > { %v7049_v8 = vpop.permute.xlu0 %5514  ;;  %v4574_v57 = vpack.c.bf16 %v2956_v38, %v2784_v27  ;;  %v4610_v40 = vpack.c.bf16 %v2958_v3, %v2786_v11  ;;  %v8799_v9 = vunpack.i.h.bf16 %v6362_v22  ;;  %v4612_v46 = vpack.c.bf16 %v2957_v28, %v2785_v56 }
 0x15a   : > { %v5516_v10 = vunpack.i.l.bf16 %v7049_v8  ;;  %5809 = vrot.lane.b32.xlu1 %v6991_v20, %s6015_s25  ;;  %v7062_v47 = vpack.i.bf16 %v7038_v51, %v7035_v59  ;;  %v5272_v50 = vunpack.i.h.bf16 %v8800_v7  ;;  %v5271_v27 = vunpack.i.l.bf16 %v8800_v7  ;;  %v8803_v7 = vld [vmem:[#allocation31_spill] sm:$0xff] }
 0x15b   : > { %v7055_v14 = vsel %vm617_vm2, %v5151_v18, %v8799_v9  ;;  %5804 = vrot.lane.b32.xlu0 %v6744_v60, %s6015_s25  ;;  %4575 = vmatprep.subr.bf16.mxu0 %v4574_v57  ;;  %v8801_v9 = vld [vmem:[#allocation29_spill] sm:$0xff]  ;;  %v2955_v38 = vsel %vm1530_vm8, %v5512_v35, %v5442_v41  ;;  %v8802_v3 = vunpack.i.l.bf16 %v6437_v43  ;;  %v7079_v58 = vsel %vm617_vm2, %v5146_v26, %v5147_v39 }
 0x15c   : > { %v5267_v11 = vunpack.i.h.bf16 %v8801_v9  ;;  %4611 = vmatprep.subr.bf16.mxu1 %v4610_v40  ;;  %v7071_v56 = vpop.permute.xlu1 %5529  ;;  %v2783_v28 = vsel %vm1357_vm7, %v5516_v10, %v5496_v17  ;;  %v7087_v10 = vld [vmem:[%s8576_s1] sm:$0xff]  ;;  %v8804_v57 = vld [vmem:[#allocation17_spill] sm:$0xff]  ;;  %v797_v35 = vsel %vm790_vm3, %v5206_v4, %v5207_v63 }
 0x15d   : > { %v798_v2 = vsel %vm790_vm3, %v5207_v63, %v8802_v3  ;;  %4613 = vmatpush1.bf16.msra.mxu1 %v4612_v46  ;;  %v7082_v60 = vpop.permute.xlu0 %5524  ;;  %v4576_v40 = vpack.c.bf16 %v2955_v38, %v2783_v28  ;;  %v8805_v17 = vunpack.i.h.bf16 %v8804_v57  ;;  %v8806_v3 = vpack.c.bf16 %v6751_v31, %v6618_v5  ;;  %v7104_v38 = vld [vmem:[%s8576_s1 + $0x18] sm:$0xff] }
 0x15e   : > { %5819 = vrot.lane.b32.xlu1 %v7062_v47, %s6008_s18  ;;  %v8807_v46 = vunpack.i.h.bf16 %v6354_v21  ;;  %v7107_v57 = vsel %vm617_vm2, %v5147_v39, %v5151_v18  ;;  %v8809_v5 = vunpack.i.l.bf16 %v6378_v30  ;;  %v7117_v63 = vsel %vm1011_vm5, %v5271_v27, %v5272_v50  ;;  %v8811_v18 = vld [vmem:[#allocation52_spill] sm:$0xff] }
 0x15f   : > { %v796_v41 = vsel %vm790_vm3, %v8805_v17, %v5206_v4  ;;  %4651 = vmatprep.subr.bf16.mxu1 %v8806_v3  ;;  %v8808_v4 = vunpack.i.h.bf16 %v6378_v30  ;;  %5814 = vrot.lane.b32.xlu0 %v6991_v20, %s6008_s18  ;;  %v5402_v39 = vunpack.i.h.bf16 %v8811_v18  ;;  %v5401_v17 = vunpack.i.l.bf16 %v8811_v18 }
 0x160   : > { %v625_v28 = vsel %vm617_vm2, %v8807_v46, %v5146_v26  ;;  %4577 = vmatpush1.bf16.msra.mxu0 %v4576_v40  ;;  %v7122_v26 = vld [vmem:[%s6051_s17 + $0xc0] sm:$0xff]  ;;  %3624 = vmatmul.mubr.f32.vlgmr.msra.gmra.mrb[0].mxu1 %v7087_v10  ;;  %v8812_v3 = vpack.c.bf16 %v6761_v0, %v6614_v48  ;;  %v7130_v46 = vpop.permute.xlu1 %5539  ;;  %v8814_v18 = vpack.c.bf16 %v6772_v37, %v6592_v54 }
 0x161   : > { %v7114_v31 = vsel %vm617_vm2, %v8809_v5, %v8808_v4  ;;  %v4654_v21 = vpack.c.bf16 %v798_v2, %v625_v28  ;;  %v4618_v4 = vpack.c.bf16 %v796_v41, %v7014_v1  ;;  %v1017_v5 = vsel %vm1011_vm5, %v5267_v11, %v5271_v27  ;;  %v7143_v13 = vpop.permute.xlu0 %5534  ;;  %v7147_v48 = vld [vmem:[%s6051_s17 + $0x40] sm:$0xff]  ;;  %4519 = vmatprep.mubr.msk.f32.mxu1 %vm3475_vm4, %v7104_v38 }
 0x162   : > { %8810 = vst [vmem:[#allocation28_spill] sm:$0xff] %v7114_v31  ;;  %4615 = vmatprep.subr.bf16.mxu0 %v8812_v3  ;;  %v8813_v2 = vunpack.i.l.bf16 %v8801_v9  ;;  %v8663_v28 = vunpack.i.l.bf16 %v6670_v23  ;;  %4653 = vmatpush1.bf16.msra.mxu1 %v8814_v18  ;;  %v4656_v0 = vpack.c.bf16 %v797_v35, %v7007_v52  ;;  %v8815_v1 = vunpack.i.l.bf16 %v8803_v7  ;;  %v8816_v9 = vld [vmem:[#allocation40_spill] sm:$0xff] }
 0x163   : > { %4655 = vmatprep.subr.bf16.mxu1 %v4654_v21  ;;  %5829 = vrot.lane.b32.xlu1 %v7062_v47, %s6009_s19  ;;  %v4660_v54 = vpack.c.bf16 %v7117_v63, %v6917_v44  ;;  %v7160_v37 = vpack.i.bf16 %v7122_v26, %v7038_v51  ;;  %v7164_v52 = vpack.i.bf16 %v7035_v59, %v6967_v6  ;;  %v8818_v63 = vld [vmem:[#allocation6_spill] sm:$0xff]  ;;  %v8819_v21 = vld [vmem:[#allocation5_spill] sm:$0xff] }
 0x164   : > { %v7137_v40 = vsel %vm1011_vm5, %v8813_v2, %v5267_v11  ;;  %v1019_v27 = vsel %vm1011_vm5, %v5272_v50, %v8815_v1  ;;  %v8666_v50 = vunpack.i.l.bf16 %v8816_v9  ;;  %v8817_v11 = vld [vmem:[#allocation41_spill] sm:$0xff]  ;;  %5824 = vrot.lane.b32.xlu0 %v6991_v20, %s6009_s19  ;;  %3547 = vmatmul.mubr.f32.vlgmr.msra.gmra.mrb[0].mxu0 %v7087_v10  ;;  %v4622_v44 = vpack.c.bf16 %v1017_v5, %v6932_v42  ;;  %v7177_v6 = vpop.permute.xlu1 %5549 }
 0x165   : > { %v5337_v41 = vunpack.i.h.bf16 %v8817_v11  ;;  %v5336_v35 = vunpack.i.l.bf16 %v8817_v11  ;;  %v1364_v51 = vsel %vm1357_vm7, %v5401_v17, %v5402_v39  ;;  %v8820_v3 = vpack.c.bf16 %v8818_v63, %v8819_v21  ;;  %4517 = vmatprep.mubr.msk.f32.mxu0 %vm3475_vm4, %v7104_v38  ;;  %v7187_v42 = vld [vmem:[%s8576_s1 + $0x10] sm:$0xff] }
 0x166   : > { %v4658_v59 = vpack.c.bf16 %v1019_v27, %v7147_v48  ;;  %v4624_v2 = vpack.c.bf16 %v7137_v40, %v6911_v19  ;;  %v5531_v5 = vunpack.i.l.bf16 %v7071_v56  ;;  %v5536_v1 = vunpack.i.l.bf16 %v7143_v13  ;;  %4657 = vmatpush1.bf16.msra.mxu1 %v4656_v0  ;;  %v7192_v27 = vpop.permute.xlu0 %5544  ;;  %v8821_v21 = vld [vmem:[#allocation53_spill] sm:$0xff] }
 0x167   : > { %4617 = vmatpush1.bf16.msra.mxu0 %v8820_v3  ;;  %v1365_v19 = vsel %vm1357_vm7, %v5402_v39, %v8663_v28  ;;  %v5532_v40 = vunpack.i.h.bf16 %v7071_v56  ;;  %v5526_v63 = vunpack.i.l.bf16 %v7082_v60  ;;  %5839 = vrot.lane.b32.xlu1 %v7062_v47, %s6010_s20  ;;  %v8822_v3 = vunpack.i.h.bf16 %v8821_v21  ;;  %v8823_v39 = vld [vmem:[#allocation39_spill] sm:$0xff] }
 0x168   : > { %4619 = vmatprep.subr.bf16.mxu0 %v4618_v4  ;;  %4659 = vmatprep.subr.bf16.mxu1 %v4658_v59  ;;  %v1191_v0 = vsel %vm1184_vm6, %v5336_v35, %v5337_v41  ;;  %v1192_v56 = vsel %vm1184_vm6, %v5337_v41, %v8666_v50  ;;  %v8824_v28 = vunpack.i.h.bf16 %v8823_v39  ;;  %v5522_v11 = vunpack.i.h.bf16 %v7041_v45  ;;  %v7220_v31 = vpop.permute.xlu1 %5559 }
 0x169   : > { %v1363_v4 = vsel %vm1357_vm7, %v8822_v3, %v5401_v17  ;;  %5834 = vrot.lane.b32.xlu0 %v6991_v20, %s6010_s20  ;;  %3553 = vmatmul.mubr.f32.gmra.mrb[2].mxu0 %v7187_v42  ;;  %v5521_v21 = vunpack.i.l.bf16 %v7041_v45  ;;  %v8825_v17 = vld [vmem:[#allocation19_spill] sm:$0xff]  ;;  %v8826_v3 = vld [vmem:[#allocation18_spill] sm:$0xff]  ;;  %v4662_v34 = vpack.c.bf16 %v1365_v19, %v1192_v56  ;;  %v4664_v61 = vpack.c.bf16 %v1364_v51, %v1191_v0 }
 0x16a   : > { %v1190_v59 = vsel %vm1184_vm6, %v8824_v28, %v5336_v35  ;;  %v8827_v18 = vpack.c.bf16 %v8825_v17, %v8826_v3  ;;  %v8828_v41 = vunpack.i.l.bf16 %v6800_v25  ;;  %4661 = vmatpush1.bf16.msra.mxu1 %v4660_v54  ;;  %v7227_v28 = vpop.permute.xlu0 %5554  ;;  %v8829_v45 = vunpack.i.h.bf16 %v7143_v13 }
 0x16b   : > { %v4626_v35 = vpack.c.bf16 %v1363_v4, %v1190_v59  ;;  %v5556_v17 = vunpack.i.l.bf16 %v7227_v28  ;;  %4663 = vmatprep.subr.bf16.mxu1 %v4662_v34  ;;  %5849 = vrot.lane.b32.xlu1 %v7062_v47, %s6011_s21  ;;  %v8830_v25 = vunpack.i.h.bf16 %v7082_v60  ;;  %v1708_v54 = vsel %vm271_vm0, %v5531_v5, %v5532_v40 }
 0x16c   : > { %4621 = vmatpush1.bf16.msra.mxu0 %v8827_v18  ;;  %v7225_v39 = vsel %vm271_vm0, %v8828_v41, %v5531_v5  ;;  %v1710_v50 = vsel %vm271_vm0, %v5536_v1, %v8829_v45  ;;  %v8668_v18 = vunpack.i.h.bf16 %v7227_v28  ;;  %v5552_v51 = vunpack.i.h.bf16 %v7177_v6  ;;  %3630 = vmatmul.mubr.f32.gmra.mrb[2].mxu1 %v7187_v42  ;;  %v7251_v5 = vpop.permute.xlu1 %5569 }
 0x16d   : > { %4623 = vmatprep.subr.bf16.mxu0 %v4622_v44  ;;  %v1538_v44 = vsel %vm1530_vm8, %v5526_v63, %v8830_v25  ;;  %v5551_v19 = vunpack.i.l.bf16 %v7177_v6  ;;  %v8667_v4 = vunpack.i.h.bf16 %v7192_v27  ;;  %v5546_v0 = vunpack.i.l.bf16 %v7192_v27  ;;  %5844 = vrot.lane.b32.xlu0 %v6991_v20, %s6011_s21 }
 0x16e   : > { %v8831_v34 = vunpack.i.h.bf16 %v6766_v36  ;;  %v1709_v59 = vsel %vm271_vm0, %v5532_v40, %v5536_v1  ;;  %v4666_v3 = vpack.c.bf16 %v1710_v50, %v1538_v44  ;;  %v1536_v6 = vsel %vm1530_vm8, %v5521_v21, %v5522_v11  ;;  %4665 = vmatpush1.bf16.msra.mxu1 %v4664_v61  ;;  %v7257_v25 = vpop.permute.xlu0 %5564 }
 0x16f   : > { %v5542_v45 = vunpack.i.h.bf16 %v7130_v46  ;;  %v5541_v20 = vunpack.i.l.bf16 %v7130_v46  ;;  %v2054_v36 = vsel %vm617_vm2, %v5556_v17, %v8668_v18  ;;  %v8670_v50 = vunpack.i.h.bf16 %v7257_v25  ;;  %5859 = vrot.lane.b32.xlu1 %v7160_v37, %s6012_s22  ;;  %v8832_v46 = vld [vmem:[#allocation11_spill] sm:$0xff] }
 0x170   : > { %v1535_v56 = vsel %vm1530_vm8, %v8831_v34, %v5521_v21  ;;  %4625 = vmatpush1.bf16.msra.mxu0 %v4624_v2  ;;  %v1537_v2 = vsel %vm1530_vm8, %v5522_v11, %v5526_v63  ;;  %v5566_v1 = vunpack.i.l.bf16 %v7257_v25  ;;  %4667 = vmatprep.subr.bf16.mxu1 %v4666_v3  ;;  %v4630_v40 = vpack.c.bf16 %v1708_v54, %v1536_v6  ;;  %v7277_v63 = vld [vmem:[%s8576_s1 + $0x8] sm:$0xff]  ;;  %v8833_v34 = vld [vmem:[#allocation54_spill] sm:$0xff]  ;;  %v7287_v3 = vpop.permute.xlu1 %5579 }
 0x171   : > { %v4632_v41 = vpack.c.bf16 %v7225_v39, %v1535_v56  ;;  %4627 = vmatprep.subr.bf16.mxu0 %v4626_v35  ;;  %v8669_v21 = vunpack.i.l.bf16 %v8832_v46  ;;  %v4668_v61 = vpack.c.bf16 %v1709_v59, %v1537_v2  ;;  %5854 = vrot.lane.b32.xlu0 %v7164_v52, %s6012_s22  ;;  %v1882_v39 = vsel %vm444_vm1, %v5546_v0, %v8667_v4  ;;  %v8834_v56 = vld [vmem:[#allocation56_spill] sm:$0xff] }
 0x172   : > { %v2052_v11 = vsel %vm617_vm2, %v5551_v19, %v5552_v51  ;;  %4520 = vmatprep.mubr.msk.f32.mxu0 %vm3475_vm4, %v7277_v63  ;;  %v5562_v35 = vunpack.i.h.bf16 %v7220_v31  ;;  %v5561_v44 = vunpack.i.l.bf16 %v7220_v31  ;;  %v2053_v54 = vsel %vm617_vm2, %v5552_v51, %v5556_v17  ;;  %4522 = vmatprep.mubr.msk.f32.mxu1 %vm3475_vm4, %v7277_v63  ;;  %v7295_v31 = vpop.permute.xlu0 %5574 }
 0x173   : > { %v8835_v59 = vpack.c.bf16 %v8833_v34, %v8834_v56  ;;  %v4670_v6 = vpack.c.bf16 %v2054_v36, %v1882_v39  ;;  %v8671_v2 = vunpack.i.h.bf16 %v6437_v43  ;;  %v8836_v4 = vunpack.i.l.bf16 %v6823_v16  ;;  %4669 = vmatpush1.bf16.msra.mxu1 %v4668_v61  ;;  %5869 = vrot.lane.b32.xlu1 %v7160_v37, %s6013_s23 }
 0x174   : > { %v1880_v17 = vsel %vm444_vm1, %v5541_v20, %v5542_v45  ;;  %v2226_v51 = vsel %vm790_vm3, %v5566_v1, %v8670_v50  ;;  %v8837_v36 = vunpack.i.l.bf16 %v6850_v32  ;;  %v1881_v34 = vsel %vm444_vm1, %v5542_v45, %v5546_v0  ;;  %v7313_v32 = vld [vmem:[%s6051_s17 + $0x58] sm:$0xff]  ;;  %v7317_v45 = vpop.permute.xlu1 %5589 }
 0x175   : > { %4629 = vmatpush1.bf16.msra.mxu0 %v8835_v59  ;;  %v1879_v18 = vsel %vm444_vm1, %v8836_v4, %v5541_v20  ;;  %4671 = vmatprep.subr.bf16.mxu1 %v4670_v6  ;;  %v4634_v16 = vpack.c.bf16 %v2052_v11, %v1880_v17  ;;  %v4672_v4 = vpack.c.bf16 %v2053_v54, %v1881_v34  ;;  %v5581_v20 = vunpack.i.l.bf16 %v7287_v3 }
 0x176   : > { %4631 = vmatprep.subr.bf16.mxu0 %v4630_v40  ;;  %v2051_v39 = vsel %vm617_vm2, %v8837_v36, %v5551_v19  ;;  %v5582_v40 = vunpack.i.h.bf16 %v7287_v3  ;;  %v5576_v61 = vunpack.i.l.bf16 %v7295_v31  ;;  %5864 = vrot.lane.b32.xlu0 %v7164_v52, %s6013_s23  ;;  %v2225_v19 = vsel %vm790_vm3, %v5562_v35, %v5566_v1  ;;  %v7343_v36 = vld [vmem:[%s6051_s17 + $0x50] sm:$0xff] }
 0x177   : > { %v8674_v0 = vunpack.i.h.bf16 %v7295_v31  ;;  %v4674_v11 = vpack.c.bf16 %v7313_v32, %v2226_v51  ;;  %v2224_v54 = vsel %vm790_vm3, %v5561_v44, %v5562_v35  ;;  %v8838_v56 = vunpack.i.l.bf16 %v6437_v43  ;;  %4673 = vmatpush1.bf16.msra.mxu1 %v4672_v4  ;;  %5879 = vrot.lane.b32.xlu1 %v7160_v37, %s6014_s24  ;;  %v7359_v4 = vld [vmem:[%s6051_s17 + $0xc8] sm:$0xff] }
 0x178   : > { %v4636_v3 = vpack.c.bf16 %v2051_v39, %v1879_v18  ;;  %v5572_v1 = vunpack.i.h.bf16 %v7251_v5  ;;  %v8839_v6 = vunpack.i.h.bf16 %v6362_v22  ;;  %v8840_v17 = vunpack.i.l.bf16 %v6877_v29  ;;  %v7350_v22 = vld [vmem:[%s6051_s17 + $0x48] sm:$0xff] }
 0x179   : > { %4633 = vmatpush1.bf16.msra.mxu0 %v4632_v41  ;;  %v7326_v59 = vsel %vm790_vm3, %v8838_v56, %v8671_v2  ;;  %v7329_v41 = vpop.permute.xlu0 %5584  ;;  %v5571_v18 = vunpack.i.l.bf16 %v7251_v5  ;;  %4675 = vmatprep.subr.bf16.mxu1 %v4674_v11  ;;  %v4638_v5 = vpack.c.bf16 %v7350_v22, %v2224_v54  ;;  %v5591_v11 = vunpack.i.l.bf16 %v7317_v45 }
 0x17a   : > { %4635 = vmatprep.subr.bf16.mxu0 %v4634_v16  ;;  %v7336_v35 = vsel %vm617_vm2, %v8839_v6, %v8669_v21  ;;  %v2223_v51 = vsel %vm790_vm3, %v8840_v17, %v5561_v44  ;;  %v8675_v39 = vunpack.i.h.bf16 %v7329_v41  ;;  %v5586_v34 = vunpack.i.l.bf16 %v7329_v41  ;;  %5874 = vrot.lane.b32.xlu0 %v7164_v52, %s6014_s24  ;;  %v5600_v6 = vpop.permute.xlu1 %5599 }
 0x17b   : > { %v4676_v16 = vpack.c.bf16 %v7343_v36, %v2225_v19  ;;  %v2445_v29 = vsel %vm1011_vm5, %v5572_v1, %v5576_v61  ;;  %v2616_v44 = vsel %vm1184_vm6, %v5581_v20, %v5582_v40  ;;  %v2446_v19 = vsel %vm1011_vm5, %v5576_v61, %v8674_v0  ;;  %5889 = vrot.lane.b32.xlu1 %v7160_v37, %s6015_s25 }
 0x17c   : > { %v2617_v56 = vsel %vm1184_vm6, %v5582_v40, %v5586_v34  ;;  %v2618_v17 = vsel %vm1184_vm6, %v5586_v34, %v8675_v39  ;;  %v5602_v54 = vunpack.i.h.bf16 %v5600_v6  ;;  %v5601_v50 = vunpack.i.l.bf16 %v5600_v6 }
 0x17d   : > { %4637 = vmatpush1.bf16.msra.mxu0 %v4636_v3  ;;  %v4680_v21 = vpack.c.bf16 %v2617_v56, %v2445_v29  ;;  %4677 = vmatpush1.bf16.msra.mxu1 %v4676_v16  ;;  %v7369_v2 = vpop.permute.xlu0 %5594  ;;  %v4678_v30 = vpack.c.bf16 %v2618_v17, %v2446_v19  ;;  %v5517_v40 = vunpack.i.h.bf16 %v7049_v8  ;;  %v4640_v3 = vpack.c.bf16 %v7147_v48, %v2223_v51  ;;  %v8842_v51 = vld [vmem:[#allocation20_spill] sm:$0xff]  ;;  %v8843_v56 = vld [vmem:[#allocation21_spill] sm:$0xff] }
 0x17e   : > { %4639 = vmatprep.subr.bf16.mxu0 %v4638_v5  ;;  %v2444_v61 = vsel %vm1011_vm5, %v5571_v18, %v5572_v1  ;;  %v7378_v34 = vpack.i.bf16 %v7359_v4, %v7122_v26  ;;  %v8841_v16 = vunpack.i.l.bf16 %v6944_v53  ;;  %5884 = vrot.lane.b32.xlu0 %v7164_v52, %s6015_s25  ;;  %v2960_v48 = vsel %vm1530_vm8, %v5601_v50, %v5602_v54  ;;  %v7389_v26 = vpop.permute.xlu1 %5609 }
 0x17f   : > { %4679 = vmatprep.subr.bf16.mxu1 %v4678_v30  ;;  %v4642_v8 = vpack.c.bf16 %v2616_v44, %v2444_v61  ;;  %v5592_v37 = vunpack.i.h.bf16 %v7317_v45  ;;  %v8676_v1 = vunpack.i.l.bf16 %v7369_v2  ;;  %v2788_v53 = vsel %vm1357_vm7, %v5517_v40, %v5591_v11 }
 0x180   : > { %v2615_v29 = vsel %vm1184_vm6, %v8841_v16, %v5581_v20  ;;  %v5221_v20 = vunpack.i.l.bf16 %v8842_v51  ;;  %v5217_v6 = vunpack.i.h.bf16 %v8843_v56  ;;  %v8844_v30 = vunpack.i.l.bf16 %v6907_v12  ;;  %5899 = vrot.lane.b32.xlu1 %v7378_v34, %s6014_s24  ;;  %v8845_v12 = vld [vmem:[#allocation30_spill] sm:$0xff] }
 0x181   : > { %4641 = vmatpush1.bf16.msra.mxu0 %v4640_v3  ;;  %4681 = vmatpush1.bf16.msra.mxu1 %v4680_v21  ;;  %v7397_v45 = vpop.permute.xlu0 %5604  ;;  %v4646_v44 = vpack.c.bf16 %v2960_v48, %v2788_v53  ;;  %v5216_v19 = vunpack.i.l.bf16 %v8843_v56  ;;  %v5282_v16 = vunpack.i.h.bf16 %v8845_v12  ;;  %v8846_v21 = vunpack.i.l.bf16 %v7009_v33  ;;  %v1627_v53 = vld [vmem:[%s6051_s17 + $0xd8] sm:$0xff] }
 0x182   : > { %v2443_v52 = vsel %vm1011_vm5, %v8844_v30, %v5571_v18  ;;  %4643 = vmatprep.subr.bf16.mxu0 %v4642_v8  ;;  %v5607_v3 = vunpack.i.h.bf16 %v7397_v45  ;;  %v5606_v61 = vunpack.i.l.bf16 %v7397_v45  ;;  %v5281_v18 = vunpack.i.l.bf16 %v8845_v12  ;;  %5894 = vrot.lane.b32.xlu0 %v7062_v47, %s6014_s24 }
 0x183   : > { %v4644_v17 = vpack.c.bf16 %v2615_v29, %v2443_v52  ;;  %v5277_v8 = vunpack.i.h.bf16 %v8803_v7  ;;  %v2959_v48 = vsel %vm1530_vm8, %v8846_v21, %v5601_v50  ;;  %v7413_v29 = vld [vmem:[%s6051_s17 + $0xd0] sm:$0xff]  ;;  %v2789_v56 = vsel %vm1357_vm7, %v5591_v11, %v5592_v37  ;;  %v7418_v52 = vpop.permute.xlu1 %5619 }
 0x184   : > { %v2961_v30 = vsel %vm1530_vm8, %v5602_v54, %v5606_v61  ;;  %v2790_v12 = vsel %vm1357_vm7, %v5592_v37, %v8676_v1  ;;  %v2962_v33 = vsel %vm1530_vm8, %v5606_v61, %v5607_v3  ;;  %v8847_v50 = vld [vmem:[#allocation33_spill] sm:$0xff]  ;;  %v8848_v0 = vunpack.i.h.bf16 %v6969_v24  ;;  %5909 = vrot.lane.b32.xlu1 %v7378_v34, %s6015_s25 }
 0x185   : > { %4645 = vmatpush1.bf16.msra.mxu0 %v4644_v17  ;;  %v5286_v21 = vunpack.i.l.bf16 %v8847_v50  ;;  %v4684_v11 = vpack.c.bf16 %v2961_v30, %v2789_v56  ;;  %v7430_v54 = vpop.permute.xlu0 %5614  ;;  %v4682_v17 = vpack.c.bf16 %v2962_v33, %v2790_v12  ;;  %v7435_v37 = vpack.i.bf16 %v1627_v53, %v7413_v29  ;;  %v7476_v30 = vld [vmem:[%s6051_s17 + $0x60] sm:$0xff] }
 0x186   : > { %v2787_v39 = vsel %vm1357_vm7, %v8848_v0, %v5517_v40  ;;  %4647 = vmatprep.subr.bf16.mxu0 %v4646_v44  ;;  %v8849_v61 = vunpack.i.h.bf16 %v6437_v43  ;;  %v802_v24 = vsel %vm790_vm3, %v5217_v6, %v5221_v20  ;;  %v8850_v0 = vunpack.i.h.bf16 %v8842_v51  ;;  %5904 = vrot.lane.b32.xlu0 %v7062_v47, %s6015_s25 }
 0x187   : > { %v4648_v5 = vpack.c.bf16 %v2959_v48, %v2787_v39  ;;  %v7447_v44 = vsel %vm790_vm3, %v5216_v19, %v5217_v6  ;;  %4683 = vmatprep.subr.bf16.mxu1 %v4682_v17  ;;  %v4692_v43 = vpack.c.bf16 %v7326_v59, %v7079_v58  ;;  %v7454_v39 = vsel %vm1011_vm5, %v5281_v18, %v5282_v16 }
 0x188   : > { %v800_v1 = vsel %vm790_vm3, %v8849_v61, %v5216_v19  ;;  %v7444_v40 = vsel %vm790_vm3, %v5221_v20, %v8850_v0  ;;  %v8851_v48 = vunpack.i.l.bf16 %v8803_v7  ;;  %4685 = vmatpush1.bf16.msra.mxu1 %v4684_v11  ;;  %v7461_v20 = vpop.permute.xlu1 %5629  ;;  %v1021_v6 = vsel %vm1011_vm5, %v5277_v8, %v5281_v18  ;;  %5919 = vrot.lane.b32.xlu1 %v7435_v37, %s6008_s18  ;;  %v8856_v11 = vld [vmem:[#allocation42_spill] sm:$0xff]  ;;  %v8857_v61 = vld [vmem:[#allocation43_spill] sm:$0xff]  ;;  %v8858_v0 = vld [vmem:[#allocation68_spill] sm:$0xff] }
 0x189   : > { %4649 = vmatpush1.bf16.msra.mxu0 %v4648_v5  ;;  %v5342_v47 = vunpack.i.h.bf16 %v8816_v9  ;;  %v8852_v58 = vpack.c.bf16 %v6811_v55, %v6699_v49  ;;  %v7468_v59 = vpop.permute.xlu0 %5624  ;;  %v8853_v7 = vpack.c.bf16 %v6814_v62, %v6710_v15  ;;  %v4690_v5 = vpack.c.bf16 %v800_v1, %v7107_v57  ;;  %v2363_v62 = vld [vmem:[%s6051_s17 + $0xe0] sm:$0xff]  ;;  %v8855_v57 = vld [vmem:[#allocation62_spill] sm:$0xff] }
 0x18a   : > { %v7459_v56 = vsel %vm1011_vm5, %v8851_v48, %v5277_v8  ;;  %v4726_v19 = vpack.c.bf16 %v802_v24, %v7336_v35  ;;  %v1023_v18 = vsel %vm1011_vm5, %v5282_v16, %v5286_v21  ;;  %v8854_v8 = vld [vmem:[#allocation55_spill] sm:$0xff]  ;;  %v5407_v55 = vunpack.i.h.bf16 %v6670_v23  ;;  %5914 = vrot.lane.b32.xlu0 %v7378_v34, %s6008_s18 }
 0x18b   : > { %4687 = vmatprep.subr.bf16.mxu0 %v8852_v58  ;;  %4723 = vmatprep.subr.bf16.mxu1 %v8853_v7  ;;  %v5412_v12 = vunpack.i.h.bf16 %v8854_v8  ;;  %v5411_v49 = vunpack.i.l.bf16 %v8854_v8  ;;  %v4728_v15 = vpack.c.bf16 %v7447_v44, %v7055_v14  ;;  %v8684_v35 = vunpack.i.l.bf16 %v8855_v57  ;;  %v8859_v44 = vld [vmem:[#allocation51_spill] sm:$0xff] }
 0x18c   : > { %3701 = vmatmul.mubr.f32.vlgmr.msra.gmra.mrb[4].mxu0 %v7087_v10  ;;  %v4694_v1 = vpack.c.bf16 %v1021_v6, %v7343_v36  ;;  %v4696_v16 = vpack.c.bf16 %v7459_v56, %v7350_v22  ;;  %v4732_v33 = vpack.c.bf16 %v7454_v39, %v7313_v32  ;;  %v5351_v17 = vunpack.i.l.bf16 %v8856_v11  ;;  %3778 = vmatmul.mubr.f32.vlgmr.msra.gmra.mrb[4].mxu1 %v7087_v10  ;;  %v7505_v58 = vpop.permute.xlu1 %5639  ;;  %v8862_v56 = vld [vmem:[#allocation71_spill] sm:$0xff]  ;;  %v8863_v6 = vld [vmem:[#allocation50_spill] sm:$0xff] }
 0x18d   : > { %v5347_v14 = vunpack.i.h.bf16 %v8857_v61  ;;  %v5346_v24 = vunpack.i.l.bf16 %v8857_v61  ;;  %v8860_v48 = vpack.c.bf16 %v8858_v0, %v8859_v44  ;;  %v4730_v36 = vpack.c.bf16 %v1023_v18, %v7476_v30  ;;  %v7517_v8 = vpop.permute.xlu0 %5634  ;;  %5929 = vrot.lane.b32.xlu1 %v7435_v37, %s6009_s19  ;;  %4521 = vmatprep.mubr.msk.f32.mxu0 %vm3475_vm4, %v7104_v38 }
 0x18e   : > { %v8861_v22 = vunpack.i.l.bf16 %v8816_v9  ;;  %v5621_v39 = vunpack.i.l.bf16 %v7418_v52  ;;  %v8864_v7 = vpack.c.bf16 %v8862_v56, %v8863_v6  ;;  %v7519_v61 = vpack.i.bf16 %v2363_v62, %v1627_v53  ;;  %5924 = vrot.lane.b32.xlu0 %v7378_v34, %s6009_s19  ;;  %4523 = vmatprep.mubr.msk.f32.mxu1 %vm3475_vm4, %v7104_v38 }
 0x18f   : > { %4689 = vmatpush1.bf16.msra.mxu0 %v8860_v48  ;;  %v7523_v0 = vpack.i.bf16 %v7413_v29, %v7359_v4  ;;  %v7526_v9 = vsel %vm1357_vm7, %v5411_v49, %v5412_v12  ;;  %v8865_v18 = vunpack.i.l.bf16 %v6670_v23  ;;  %v5612_v53 = vunpack.i.h.bf16 %v7389_v26 }
 0x190   : > { %v7511_v32 = vsel %vm1184_vm6, %v8861_v22, %v5342_v47  ;;  %4691 = vmatprep.subr.bf16.mxu0 %v4690_v5  ;;  %4725 = vmatpush1.bf16.msra.mxu1 %v8864_v7  ;;  %v1367_v5 = vsel %vm1357_vm7, %v5407_v55, %v5411_v49  ;;  %v5611_v62 = vunpack.i.l.bf16 %v7389_v26  ;;  %v5622_v4 = vunpack.i.h.bf16 %v7418_v52  ;;  %v7546_v49 = vpop.permute.xlu1 %5649 }
 0x191   : > { %v1366_v44 = vsel %vm1357_vm7, %v8865_v18, %v5407_v55  ;;  %4727 = vmatprep.subr.bf16.mxu1 %v4726_v19  ;;  %v1369_v23 = vsel %vm1357_vm7, %v5412_v12, %v8684_v35  ;;  %v1195_v29 = vsel %vm1184_vm6, %v5346_v24, %v5347_v14  ;;  %v5616_v19 = vunpack.i.l.bf16 %v7430_v54  ;;  %5939 = vrot.lane.b32.xlu1 %v7435_v37, %s6010_s20 }
 0x192   : > { %v1194_v26 = vsel %vm1184_vm6, %v5342_v47, %v5346_v24  ;;  %v1196_v52 = vsel %vm1184_vm6, %v5347_v14, %v5351_v17  ;;  %v8866_v55 = vunpack.i.h.bf16 %v7143_v13  ;;  %v8680_v48 = vunpack.i.h.bf16 %v7468_v59  ;;  %5934 = vrot.lane.b32.xlu0 %v7378_v34, %s6010_s20  ;;  %3707 = vmatmul.mubr.f32.gmra.mrb[6].mxu0 %v7187_v42 }
 0x193   : > { %4693 = vmatpush1.bf16.msra.mxu0 %v4692_v43  ;;  %v5626_v22 = vunpack.i.l.bf16 %v7468_v59  ;;  %v7559_v43 = vpop.permute.xlu0 %5644  ;;  %v4736_v56 = vpack.c.bf16 %v7526_v9, %v1195_v29  ;;  %v8682_v47 = vunpack.i.h.bf16 %v7430_v54  ;;  %v4698_v13 = vpack.c.bf16 %v1367_v5, %v1194_v26  ;;  %3784 = vmatmul.mubr.f32.gmra.mrb[6].mxu1 %v7187_v42 }
 0x194   : > { %v7555_v12 = vsel %vm271_vm0, %v8866_v55, %v5621_v39  ;;  %4695 = vmatprep.subr.bf16.mxu0 %v4694_v1  ;;  %4729 = vmatpush1.bf16.msra.mxu1 %v4728_v15  ;;  %v4734_v14 = vpack.c.bf16 %v1369_v23, %v1196_v52  ;;  %v4700_v24 = vpack.c.bf16 %v1366_v44, %v7511_v32  ;;  %v8867_v6 = vunpack.i.h.bf16 %v7082_v60  ;;  %v7579_v44 = vpop.permute.xlu1 %5659 }
 0x195   : > { %4731 = vmatprep.subr.bf16.mxu1 %v4730_v36  ;;  %v5641_v15 = vunpack.i.l.bf16 %v7505_v58  ;;  %v1540_v1 = vsel %vm1530_vm8, %v5611_v62, %v5612_v53  ;;  %v1712_v36 = vsel %vm271_vm0, %v5621_v39, %v5622_v4  ;;  %v1541_v18 = vsel %vm1530_vm8, %v5612_v53, %v5616_v19  ;;  %5949 = vrot.lane.b32.xlu1 %v7435_v37, %s6011_s21 }
 0x196   : > { %v1539_v7 = vsel %vm1530_vm8, %v8867_v6, %v5611_v62  ;;  %v5631_v32 = vunpack.i.l.bf16 %v7461_v20  ;;  %v5642_v60 = vunpack.i.h.bf16 %v7505_v58  ;;  %v5632_v5 = vunpack.i.h.bf16 %v7461_v20  ;;  %5944 = vrot.lane.b32.xlu0 %v7378_v34, %s6011_s21  ;;  %4524 = vmatprep.mubr.msk.f32.mxu0 %vm3475_vm4, %v7277_v63 }
 0x197   : > { %v4704_v9 = vpack.c.bf16 %v7555_v12, %v1539_v7  ;;  %4697 = vmatpush1.bf16.msra.mxu0 %v4696_v16  ;;  %v8679_v23 = vunpack.i.h.bf16 %v7559_v43  ;;  %v5646_v62 = vunpack.i.l.bf16 %v7559_v43  ;;  %v7584_v39 = vpop.permute.xlu0 %5654  ;;  %v1714_v53 = vsel %vm271_vm0, %v5626_v22, %v8680_v48  ;;  %4526 = vmatprep.mubr.msk.f32.mxu1 %vm3475_vm4, %v7277_v63 }
 0x198   : > { %4699 = vmatprep.subr.bf16.mxu0 %v4698_v13  ;;  %4733 = vmatpush1.bf16.msra.mxu1 %v4732_v33  ;;  %v5652_v29 = vunpack.i.h.bf16 %v7546_v49  ;;  %v5651_v16 = vunpack.i.l.bf16 %v7546_v49  ;;  %v4702_v20 = vpack.c.bf16 %v1712_v36, %v1540_v1  ;;  %v1542_v58 = vsel %vm1530_vm8, %v5616_v19, %v8682_v47  ;;  %v8875_v47 = vld [vmem:[#allocation32_spill] sm:$0xff] }
 0x199   : > { %4735 = vmatprep.subr.bf16.mxu1 %v4734_v14  ;;  %v1713_v33 = vsel %vm271_vm0, %v5622_v4, %v5626_v22  ;;  %v8868_v26 = vunpack.i.h.bf16 %v7227_v28  ;;  %v8678_v55 = vunpack.i.h.bf16 %v7517_v8  ;;  %v5636_v12 = vunpack.i.l.bf16 %v7517_v8  ;;  %v7609_v4 = vpop.permute.xlu1 %5669  ;;  %5959 = vrot.lane.b32.xlu1 %v7519_v61, %s6012_s22 }
 0x19a   : > { %v8869_v37 = vunpack.i.h.bf16 %v7192_v27  ;;  %v4738_v28 = vpack.c.bf16 %v1714_v53, %v1542_v58  ;;  %v2056_v49 = vsel %vm617_vm2, %v5641_v15, %v5642_v60  ;;  %v8677_v22 = vunpack.i.h.bf16 %v7584_v39  ;;  %5954 = vrot.lane.b32.xlu0 %v7523_v0, %s6012_s22 }
 0x19b   : > { %v2055_v52 = vsel %vm617_vm2, %v8868_v26, %v5641_v15  ;;  %4701 = vmatpush1.bf16.msra.mxu0 %v4700_v24  ;;  %v5656_v13 = vunpack.i.l.bf16 %v7584_v39  ;;  %v7615_v34 = vpop.permute.xlu0 %5664  ;;  %v1884_v27 = vsel %vm444_vm1, %v5631_v32, %v5632_v5  ;;  %v2058_v14 = vsel %vm617_vm2, %v5646_v62, %v8679_v23  ;;  %v7640_v26 = vld [vmem:[%s6051_s17 + $0x68] sm:$0xff] }
 0x19c   : > { %v1883_v19 = vsel %vm444_vm1, %v8869_v37, %v5631_v32  ;;  %4703 = vmatprep.subr.bf16.mxu0 %v4702_v20  ;;  %4737 = vmatpush1.bf16.msra.mxu1 %v4736_v56  ;;  %v5157_v24 = vunpack.i.h.bf16 %v8832_v46  ;;  %v4740_v6 = vpack.c.bf16 %v1713_v33, %v1541_v18  ;;  %v2228_v15 = vsel %vm790_vm3, %v5651_v16, %v5652_v29  ;;  %v8870_v56 = vld [vmem:[#allocation13_spill] sm:$0xff] }
 0x19d   : > { %v4708_v7 = vpack.c.bf16 %v2055_v52, %v1883_v19  ;;  %4739 = vmatprep.subr.bf16.mxu1 %v4738_v28  ;;  %v5166_v1 = vunpack.i.l.bf16 %v8870_v56  ;;  %v1885_v36 = vsel %vm444_vm1, %v5632_v5, %v5636_v12  ;;  %v4706_v32 = vpack.c.bf16 %v2056_v49, %v1884_v27  ;;  %v7637_v33 = vpop.permute.xlu1 %5679  ;;  %v8871_v52 = vld [vmem:[#allocation22_spill] sm:$0xff]  ;;  %5969 = vrot.lane.b32.xlu1 %v7519_v61, %s6013_s23 }
 0x19e   : > { %v1886_v18 = vsel %vm444_vm1, %v5636_v12, %v8678_v55  ;;  %v2057_v53 = vsel %vm617_vm2, %v5642_v60, %v5646_v62  ;;  %v5672_v20 = vunpack.i.h.bf16 %v7609_v4  ;;  %v5671_v58 = vunpack.i.l.bf16 %v7609_v4  ;;  %5964 = vrot.lane.b32.xlu0 %v7523_v0, %s6013_s23 }
 0x19f   : > { %4705 = vmatpush1.bf16.msra.mxu0 %v4704_v9  ;;  %v4742_v5 = vpack.c.bf16 %v2058_v14, %v1886_v18  ;;  %v5231_v37 = vunpack.i.l.bf16 %v8871_v52  ;;  %v8872_v19 = vunpack.i.h.bf16 %v7257_v25  ;;  %v7646_v60 = vpop.permute.xlu0 %5674  ;;  %v4710_v62 = vpack.c.bf16 %v7640_v26, %v2228_v15  ;;  %v8873_v15 = vld [vmem:[#allocation23_spill] sm:$0xff] }
 0x1a0   : > { %4707 = vmatprep.subr.bf16.mxu0 %v4706_v32  ;;  %4741 = vmatpush1.bf16.msra.mxu1 %v4740_v6  ;;  %v2230_v9 = vsel %vm790_vm3, %v5656_v13, %v8677_v22  ;;  %v5662_v4 = vunpack.i.h.bf16 %v7579_v44  ;;  %v5661_v28 = vunpack.i.l.bf16 %v7579_v44  ;;  %v8681_v49 = vunpack.i.h.bf16 %v7646_v60  ;;  %v7664_v44 = vld [vmem:[%s6051_s17 + $0x78] sm:$0xff] }
 0x1a1   : > { %v2227_v12 = vsel %vm790_vm3, %v8872_v19, %v5651_v16  ;;  %v5676_v25 = vunpack.i.l.bf16 %v7646_v60  ;;  %4743 = vmatprep.subr.bf16.mxu1 %v4742_v5  ;;  %v4744_v16 = vpack.c.bf16 %v2057_v53, %v1885_v36  ;;  %v2229_v27 = vsel %vm790_vm3, %v5652_v29, %v5656_v13  ;;  %v5690_v36 = vpop.permute.xlu1 %5689  ;;  %v7674_v5 = vld [vmem:[%s6051_s17 + $0x70] sm:$0xff]  ;;  %5979 = vrot.lane.b32.xlu1 %v7519_v61, %s6014_s24 }
 0x1a2   : > { %v8683_v14 = vunpack.i.h.bf16 %v7615_v34  ;;  %v5666_v6 = vunpack.i.l.bf16 %v7615_v34  ;;  %v5227_v32 = vunpack.i.h.bf16 %v8873_v15  ;;  %v5681_v18 = vunpack.i.l.bf16 %v7637_v33  ;;  %5974 = vrot.lane.b32.xlu0 %v7523_v0, %s6014_s24 }
 0x1a3   : > { %4709 = vmatpush1.bf16.msra.mxu0 %v4708_v7  ;;  %v4746_v29 = vpack.c.bf16 %v7664_v44, %v2230_v9  ;;  %v2620_v13 = vsel %vm1184_vm6, %v5671_v58, %v5672_v20  ;;  %v4712_v53 = vpack.c.bf16 %v7476_v30, %v2227_v12  ;;  %v5692_v19 = vunpack.i.h.bf16 %v5690_v36  ;;  %v7676_v55 = vpop.permute.xlu0 %5684 }
 0x1a4   : > { %4711 = vmatprep.subr.bf16.mxu0 %v4710_v62  ;;  %4745 = vmatpush1.bf16.msra.mxu1 %v4744_v16  ;;  %v5691_v22 = vunpack.i.l.bf16 %v5690_v36  ;;  %v2622_v23 = vsel %vm1184_vm6, %v5676_v25, %v8681_v49  ;;  %v5597_v7 = vunpack.i.h.bf16 %v7369_v2  ;;  %v4748_v9 = vpack.c.bf16 %v7674_v5, %v2229_v27 }
 0x1a5   : > { %v8874_v48 = vunpack.i.h.bf16 %v7329_v41  ;;  %4747 = vmatprep.subr.bf16.mxu1 %v4746_v29  ;;  %v2448_v12 = vsel %vm1011_vm5, %v5661_v28, %v5662_v4  ;;  %v5682_v62 = vunpack.i.h.bf16 %v7637_v33  ;;  %v2450_v27 = vsel %vm1011_vm5, %v5666_v6, %v8683_v14  ;;  %v7698_v36 = vpop.permute.xlu1 %5699  ;;  %5989 = vrot.lane.b32.xlu1 %v7519_v61, %s6015_s25 }
 0x1a6   : > { %v4714_v16 = vpack.c.bf16 %v2620_v13, %v2448_v12  ;;  %v2964_v41 = vsel %vm1530_vm8, %v5691_v22, %v5692_v19  ;;  %v4750_v29 = vpack.c.bf16 %v2622_v23, %v2450_v27  ;;  %v2792_v33 = vsel %vm1357_vm7, %v5597_v7, %v5681_v18  ;;  %5984 = vrot.lane.b32.xlu0 %v7523_v0, %s6015_s25  ;;  %v3463_v0 = vld [vmem:[%s8577_s2] sm:$0xff] }
 0x1a7   : > { %v2619_v30 = vsel %vm1184_vm6, %v8874_v48, %v5671_v58  ;;  %v2621_v48 = vsel %vm1184_vm6, %v5672_v20, %v5676_v25  ;;  %v5686_v58 = vunpack.i.l.bf16 %v7676_v55  ;;  %4713 = vmatpush1.bf16.msra.mxu0 %v4712_v53  ;;  %v5226_v49 = vunpack.i.l.bf16 %v8873_v15  ;;  %v7706_v35 = vpop.permute.xlu0 %5694 }
 0x1a8   : > { %v5292_v13 = vunpack.i.h.bf16 %v8875_v47  ;;  %v8876_v12 = vunpack.i.h.bf16 %v7295_v31  ;;  %4715 = vmatprep.subr.bf16.mxu0 %v4714_v16  ;;  %4749 = vmatpush1.bf16.msra.mxu1 %v4748_v9  ;;  %v4718_v20 = vpack.c.bf16 %v2964_v41, %v2792_v33  ;;  %v2449_v53 = vsel %vm1011_vm5, %v5662_v4, %v5666_v6  ;;  %v3464_v4 = vld [vmem:[%s8577_s2 + $0x8] sm:$0xff] }
 0x1a9   : > { %v5697_v23 = vunpack.i.h.bf16 %v7706_v35  ;;  %v5696_v27 = vunpack.i.l.bf16 %v7706_v35  ;;  %4751 = vmatprep.subr.bf16.mxu1 %v4750_v29  ;;  %v5291_v31 = vunpack.i.l.bf16 %v8875_v47  ;;  %v4752_v16 = vpack.c.bf16 %v2621_v48, %v2449_v53  ;;  %v7725_v47 = vpop.permute.xlu1 %5709  ;;  %3472 = vperm.xlu1 %5994, %v3464_v4   ;;  %v8912_v35 = vld [vmem:[#allocation37_spill] sm:$0xff] }
 0x1aa   : > { %v2447_v14 = vsel %vm1011_vm5, %v8876_v12, %v5661_v28  ;;  %v5287_v28 = vunpack.i.h.bf16 %v8847_v50  ;;  %v2963_v9 = vsel %vm1530_vm8, %v5607_v3, %v5691_v22  ;;  %v2794_v45 = vsel %vm1357_vm7, %v5682_v62, %v5686_v58  ;;  %v8877_v22 = vld [vmem:[#allocation35_spill] sm:$0xff]  ;;  %v8880_v12 = vld [vmem:[#allocation10_spill] sm:$0xff]  ;;  %3467 = vperm.xlu0 %5993, %v3463_v0  }
 0x1ab   : > { %v4716_v25 = vpack.c.bf16 %v2619_v30, %v2447_v14  ;;  %v2793_v14 = vsel %vm1357_vm7, %v5681_v18, %v5682_v62  ;;  %v2965_v61 = vsel %vm1530_vm8, %v5692_v19, %v5696_v27  ;;  %v2966_v3 = vsel %vm1530_vm8, %v5696_v27, %v5697_v23  ;;  %v7740_v41 = vpop.permute.xlu0 %5704 }
 0x1ac   : > { %v5296_v6 = vunpack.i.l.bf16 %v8877_v22  ;;  %v8878_v18 = vunpack.i.l.bf16 %v7369_v2  ;;  %v4756_v30 = vpack.c.bf16 %v2965_v61, %v2793_v14  ;;  %4753 = vmatpush1.bf16.msra.mxu1 %v4752_v16  ;;  %v4754_v62 = vpack.c.bf16 %v2966_v3, %v2794_v45  ;;  %v8884_v61 = vld [vmem:[#allocation45_spill] sm:$0xff] }
 0x1ad   : > { %4717 = vmatpush1.bf16.msra.mxu0 %v4716_v25  ;;  %v8879_v48 = vunpack.i.l.bf16 %v8832_v46  ;;  %v8881_v25 = vunpack.i.l.bf16 %v8880_v12  ;;  %v8883_v53 = vunpack.i.h.bf16 %v8842_v51  ;;  %v806_v46 = vsel %vm790_vm3, %v5227_v32, %v5231_v37  ;;  %v7780_v4 = vpop.permute.xlu1 %5719 }
 0x1ae   : > { %v2791_v19 = vsel %vm1357_vm7, %v8878_v18, %v5597_v7  ;;  %4719 = vmatprep.subr.bf16.mxu0 %v4718_v20  ;;  %v8882_v7 = vunpack.i.h.bf16 %v8880_v12  ;;  %4755 = vmatprep.subr.bf16.mxu1 %v4754_v62  ;;  %v805_v16 = vsel %vm790_vm3, %v5226_v49, %v5227_v32  ;;  %v7778_v51 = vsel %vm1011_vm5, %v5286_v21, %v5287_v28  ;;  %v8886_v32 = vld [vmem:[#allocation59_spill] sm:$0xff]  ;;  %v8888_v18 = vld [vmem:[#allocation74_spill] sm:$0xff]  ;;  %v8891_v12 = vld [vmem:[#allocation28_spill] sm:$0xff] }
 0x1af   : > { %v7747_v29 = vsel %vm617_vm2, %v8879_v48, %v5157_v24  ;;  %v4720_v33 = vpack.c.bf16 %v2963_v9, %v2791_v19  ;;  %v631_v2 = vsel %vm617_vm2, %v5157_v24, %v8881_v25  ;;  %v804_v27 = vsel %vm790_vm3, %v8883_v53, %v5226_v49  ;;  %v8885_v49 = vld [vmem:[#allocation73_spill] sm:$0xff]  ;;  %v7789_v50 = vpop.permute.xlu0 %5714  ;;  %v7792_v21 = vld [vmem:[%s6051_s17 + $0x80] sm:$0xff]  ;;  %v8893_v53 = vld [vmem:[#allocation58_spill] sm:$0xff] }
 0x1b0   : > { %v633_v20 = vsel %vm617_vm2, %v8882_v7, %v5166_v1  ;;  %v4764_v24 = vpack.c.bf16 %v7444_v40, %v7747_v29  ;;  %v7773_v9 = vsel %vm1011_vm5, %v5291_v31, %v5292_v13  ;;  %v1025_v14 = vsel %vm1011_vm5, %v5287_v28, %v5291_v31  ;;  %4757 = vmatpush1.bf16.msra.mxu1 %v4756_v30  ;;  %v8889_v19 = vld [vmem:[#allocation63_spill] sm:$0xff]  ;;  %v8892_v7 = vld [vmem:[#allocation70_spill] sm:$0xff] }
 0x1b1   : > { %4721 = vmatpush1.bf16.msra.mxu0 %v4720_v33  ;;  %v5352_v40 = vunpack.i.h.bf16 %v8856_v11  ;;  %v5357_v45 = vunpack.i.h.bf16 %v8884_v61  ;;  %v5356_v15 = vunpack.i.l.bf16 %v8884_v61  ;;  %v8887_v3 = vpack.c.bf16 %v8885_v49, %v8886_v32  ;;  %v7812_v49 = vpop.permute.xlu1 %5729  ;;  %v8897_v32 = vld [vmem:[#allocation57_spill] sm:$0xff] }
 0x1b2   : > { %v1027_v0 = vsel %vm1011_vm5, %v5292_v13, %v5296_v6  ;;  %v5417_v31 = vunpack.i.h.bf16 %v8855_v57  ;;  %v5687_v28 = vunpack.i.h.bf16 %v7676_v55  ;;  %v8890_v62 = vpack.c.bf16 %v8888_v18, %v8889_v19 }
 0x1b3   : > { %4759 = vmatprep.subr.bf16.mxu0 %v8887_v3  ;;  %v4762_v30 = vpack.c.bf16 %v804_v27, %v631_v2  ;;  %v4798_v48 = vpack.c.bf16 %v806_v46, %v633_v20  ;;  %v5702_v29 = vunpack.i.h.bf16 %v7698_v36  ;;  %v5701_v33 = vunpack.i.l.bf16 %v7698_v36  ;;  %3932 = vmatmul.mubr.f32.vlgmr.msra.gmra.mrb[8].mxu1 %v7087_v10 }
 0x1b4   : > { %4795 = vmatprep.subr.bf16.mxu1 %v8890_v62  ;;  %3855 = vmatmul.mubr.f32.vlgmr.msra.gmra.mrb[8].mxu0 %v7087_v10  ;;  %v4800_v25 = vpack.c.bf16 %v805_v16, %v8891_v12  ;;  %v4804_v13 = vpack.c.bf16 %v7773_v9, %v7664_v44  ;;  %v8894_v61 = vpack.c.bf16 %v8892_v7, %v8893_v53  ;;  %v8895_v44 = vld [vmem:[#allocation44_spill] sm:$0xff]  ;;  %v8896_v10 = vld [vmem:[#allocation75_spill] sm:$0xff]  ;;  %v8690_v19 = vunpack.i.h.bf16 %v7725_v47 }
 0x1b5   : > { %v4766_v2 = vpack.c.bf16 %v1025_v14, %v7674_v5  ;;  %v4802_v20 = vpack.c.bf16 %v1027_v0, %v7792_v21  ;;  %v4768_v27 = vpack.c.bf16 %v7778_v51, %v7640_v26  ;;  %v7821_v46 = vsel %vm1184_vm6, %v5351_v17, %v5352_v40  ;;  %v7830_v5 = vpop.permute.xlu0 %5724  ;;  %4525 = vmatprep.mubr.msk.f32.mxu0 %vm3475_vm4, %v7104_v38  ;;  %v7856_v62 = vpop.permute.xlu1 %5739 }
 0x1b6   : > { %4761 = vmatpush1.bf16.msra.mxu0 %v8894_v61  ;;  %v5361_v16 = vunpack.i.l.bf16 %v8895_v44  ;;  %v7825_v9 = vsel %vm1184_vm6, %v5356_v15, %v5357_v45  ;;  %v8898_v3 = vpack.c.bf16 %v8896_v10, %v8897_v32  ;;  %v1198_v14 = vsel %vm1184_vm6, %v5352_v40, %v5356_v15  ;;  %4527 = vmatprep.mubr.msk.f32.mxu1 %vm3475_vm4, %v7104_v38 }
 0x1b7   : > { %4763 = vmatprep.subr.bf16.mxu0 %v4762_v30  ;;  %v8899_v26 = vunpack.i.l.bf16 %v8855_v57  ;;  %v5717_v17 = vunpack.i.h.bf16 %v7789_v50  ;;  %v5716_v51 = vunpack.i.l.bf16 %v7789_v50  ;;  %v1371_v0 = vsel %vm1357_vm7, %v5417_v31, %v5687_v28  ;;  %3938 = vmatmul.mubr.f32.gmra.mrb[10].mxu1 %v7187_v42 }
 0x1b8   : > { %4797 = vmatpush1.bf16.msra.mxu1 %v8898_v3  ;;  %v7842_v18 = vsel %vm1357_vm7, %v5687_v28, %v5701_v33  ;;  %v5711_v40 = vunpack.i.l.bf16 %v7725_v47  ;;  %v1373_v57 = vsel %vm1357_vm7, %v5701_v33, %v5702_v29  ;;  %3861 = vmatmul.mubr.f32.gmra.mrb[10].mxu0 %v7187_v42  ;;  %v5707_v15 = vunpack.i.h.bf16 %v7740_v41 }
 0x1b9   : > { %v1370_v11 = vsel %vm1357_vm7, %v8899_v26, %v5417_v31  ;;  %4799 = vmatprep.subr.bf16.mxu1 %v4798_v48  ;;  %v5706_v50 = vunpack.i.l.bf16 %v7740_v41  ;;  %v8691_v31 = vunpack.i.h.bf16 %v7780_v4  ;;  %v5721_v28 = vunpack.i.l.bf16 %v7780_v4  ;;  %v5735_v30 = vpop.permute.xlu0 %5734  ;;  %v8900_v41 = vld [vmem:[#allocation12_spill] sm:$0xff]  ;;  %4528 = vmatprep.mubr.msk.f32.mxu0 %vm3475_vm4, %v7277_v63 }
 0x1ba   : > { %4765 = vmatpush1.bf16.msra.mxu0 %v4764_v24  ;;  %v4770_v48 = vpack.c.bf16 %v1371_v0, %v1198_v14  ;;  %v1200_v38 = vsel %vm1184_vm6, %v5357_v45, %v5361_v16  ;;  %v4772_v33 = vpack.c.bf16 %v1370_v11, %v7821_v46  ;;  %v5172_v12 = vunpack.i.h.bf16 %v8900_v41  ;;  %4530 = vmatprep.mubr.msk.f32.mxu1 %vm3475_vm4, %v7277_v63 }
 0x1bb   : > { %4767 = vmatprep.subr.bf16.mxu0 %v4766_v2  ;;  %v4808_v7 = vpack.c.bf16 %v7842_v18, %v7825_v9  ;;  %v4806_v24 = vpack.c.bf16 %v1373_v57, %v1200_v38  ;;  %v1716_v53 = vsel %vm271_vm0, %v5716_v51, %v5717_v17  ;;  %v8689_v42 = vunpack.i.h.bf16 %v7856_v62  ;;  %v7877_v9 = vpop.permute.xlu1 %5749 }
 0x1bc   : > { %4801 = vmatpush1.bf16.msra.mxu1 %v4800_v25  ;;  %v5741_v25 = vunpack.i.l.bf16 %v7856_v62  ;;  %v5737_v61 = vunpack.i.h.bf16 %v5735_v30  ;;  %v5736_v45 = vunpack.i.l.bf16 %v5735_v30  ;;  %v1545_v2 = vsel %vm1530_vm8, %v5707_v15, %v5711_v40 }
 0x1bd   : > { %4803 = vmatprep.subr.bf16.mxu1 %v4802_v20  ;;  %v8901_v46 = vunpack.i.h.bf16 %v7430_v54  ;;  %v1546_v10 = vsel %vm1530_vm8, %v5711_v40, %v8690_v19  ;;  %v1718_v32 = vsel %vm271_vm0, %v5721_v28, %v8691_v31  ;;  %v1717_v3 = vsel %vm271_vm0, %v5717_v17, %v5721_v28 }
 0x1be   : > { %4769 = vmatpush1.bf16.msra.mxu0 %v4768_v27  ;;  %v8902_v63 = vunpack.i.h.bf16 %v7468_v59  ;;  %v8686_v54 = vunpack.i.h.bf16 %v7812_v49  ;;  %v5745_v27 = vpop.permute.xlu0 %5744  ;;  %v1544_v26 = vsel %vm1530_vm8, %v5706_v50, %v5707_v15  ;;  %v5731_v11 = vunpack.i.l.bf16 %v7812_v49 }
 0x1bf   : > { %v1543_v20 = vsel %vm1530_vm8, %v8901_v46, %v5706_v50  ;;  %4771 = vmatprep.subr.bf16.mxu0 %v4770_v48  ;;  %v5727_v0 = vunpack.i.h.bf16 %v7830_v5  ;;  %v5726_v18 = vunpack.i.l.bf16 %v7830_v5  ;;  %v4774_v40 = vpack.c.bf16 %v1716_v53, %v1544_v26  ;;  %v7903_v5 = vpop.permute.xlu1 %5759 }
 0x1c0   : > { %v1715_v14 = vsel %vm271_vm0, %v8902_v63, %v5716_v51  ;;  %4805 = vmatpush1.bf16.msra.mxu1 %v4804_v13  ;;  %v8903_v17 = vunpack.i.h.bf16 %v7559_v43  ;;  %v4810_v51 = vpack.c.bf16 %v1718_v32, %v1546_v10  ;;  %v2060_v57 = vsel %vm617_vm2, %v5736_v45, %v5737_v61 }
 0x1c1   : > { %4807 = vmatprep.subr.bf16.mxu1 %v4806_v24  ;;  %v2062_v13 = vsel %vm617_vm2, %v5741_v25, %v8689_v42  ;;  %v8685_v15 = vunpack.i.h.bf16 %v7877_v9  ;;  %v5751_v50 = vunpack.i.l.bf16 %v7877_v9  ;;  %v5747_v28 = vunpack.i.h.bf16 %v5745_v27 }
 0x1c2   : > { %v2059_v59 = vsel %vm617_vm2, %v8903_v17, %v5736_v45  ;;  %v5746_v30 = vunpack.i.l.bf16 %v5745_v27  ;;  %4773 = vmatpush1.bf16.msra.mxu0 %v4772_v33  ;;  %v5171_v43 = vunpack.i.l.bf16 %v8900_v41  ;;  %v5232_v48 = vunpack.i.h.bf16 %v8871_v52  ;;  %v7907_v53 = vpop.permute.xlu0 %5754  ;;  %v8915_v52 = vld [vmem:[#allocation60_spill] sm:$0xff] }
 0x1c3   : > { %v4776_v38 = vpack.c.bf16 %v1715_v14, %v1543_v20  ;;  %v4812_v24 = vpack.c.bf16 %v1717_v3, %v1545_v2  ;;  %4775 = vmatprep.subr.bf16.mxu0 %v4774_v40  ;;  %v1889_v45 = vsel %vm444_vm1, %v5727_v0, %v5731_v11  ;;  %v8904_v46 = vunpack.i.h.bf16 %v7517_v8  ;;  %v7922_v27 = vpop.permute.xlu1 %5769 }
 0x1c4   : > { %4809 = vmatpush1.bf16.msra.mxu1 %v4808_v7  ;;  %v1888_v33 = vsel %vm444_vm1, %v5726_v18, %v5727_v0  ;;  %v1890_v32 = vsel %vm444_vm1, %v5731_v11, %v8686_v54  ;;  %v2061_v20 = vsel %vm617_vm2, %v5737_v61, %v5741_v25  ;;  %v2233_v63 = vsel %vm790_vm3, %v5747_v28, %v5751_v50  ;;  %v8909_v54 = vld [vmem:[#allocation25_spill] sm:$0xff] }
 0x1c5   : > { %v1887_v10 = vsel %vm444_vm1, %v8904_v46, %v5726_v18  ;;  %4811 = vmatprep.subr.bf16.mxu1 %v4810_v51  ;;  %v4778_v3 = vpack.c.bf16 %v2060_v57, %v1888_v33  ;;  %v4814_v7 = vpack.c.bf16 %v2062_v13, %v1890_v32  ;;  %v8905_v14 = vunpack.i.h.bf16 %v7584_v39  ;;  %v7935_v57 = vld [vmem:[%s6051_s17 + $0x88] sm:$0xff] }
 0x1c6   : > { %v4780_v2 = vpack.c.bf16 %v2059_v59, %v1887_v10  ;;  %4777 = vmatpush1.bf16.msra.mxu0 %v4776_v38  ;;  %v2232_v26 = vsel %vm790_vm3, %v5746_v30, %v5747_v28  ;;  %v2234_v11 = vsel %vm790_vm3, %v5751_v50, %v8685_v15  ;;  %v5757_v25 = vunpack.i.h.bf16 %v7907_v53  ;;  %v5765_v18 = vpop.permute.xlu0 %5764  ;;  %v8906_v50 = vld [vmem:[#allocation15_spill] sm:$0xff]  ;;  %v7940_v38 = vld [vmem:[%s6051_s17 + $0x90] sm:$0xff] }
 0x1c7   : > { %v2231_v8 = vsel %vm790_vm3, %v8905_v14, %v5746_v30  ;;  %v5756_v61 = vunpack.i.l.bf16 %v7907_v53  ;;  %4779 = vmatprep.subr.bf16.mxu0 %v4778_v3  ;;  %v8687_v39 = vunpack.i.h.bf16 %v7922_v27  ;;  %v5771_v0 = vunpack.i.l.bf16 %v7922_v27  ;;  %v7944_v53 = vld [vmem:[%s6051_s17 + $0x98] sm:$0xff]  ;;  %v7954_v33 = vpop.permute.xlu1 %5779 }
 0x1c8   : > { %4813 = vmatpush1.bf16.msra.mxu1 %v4812_v24  ;;  %v8688_v40 = vunpack.i.h.bf16 %v7903_v5  ;;  %v5761_v17 = vunpack.i.l.bf16 %v7903_v5  ;;  %v5767_v59 = vunpack.i.h.bf16 %v5765_v18  ;;  %v5766_v51 = vunpack.i.l.bf16 %v5765_v18 }
 0x1c9   : > { %4815 = vmatprep.subr.bf16.mxu1 %v4814_v7  ;;  %v5167_v13 = vunpack.i.h.bf16 %v8870_v56  ;;  %v5176_v28 = vunpack.i.l.bf16 %v8906_v50  ;;  %v4816_v30 = vpack.c.bf16 %v2061_v20, %v1889_v45  ;;  %v4782_v24 = vpack.c.bf16 %v7935_v57, %v2232_v26  ;;  %v8907_v20 = vld [vmem:[#allocation24_spill] sm:$0xff] }
 0x1ca   : > { %v7951_v46 = vsel %vm790_vm3, %v5231_v37, %v5232_v48  ;;  %v4820_v10 = vpack.c.bf16 %v7940_v38, %v2233_v63  ;;  %4781 = vmatpush1.bf16.msra.mxu0 %v4780_v2  ;;  %v4818_v45 = vpack.c.bf16 %v7944_v53, %v2234_v11  ;;  %v2624_v32 = vsel %vm1184_vm6, %v5766_v51, %v5767_v59  ;;  %v5775_v14 = vpop.permute.xlu0 %5774 }
 0x1cb   : > { %v5241_v3 = vunpack.i.l.bf16 %v8907_v20  ;;  %v4784_v7 = vpack.c.bf16 %v7792_v21, %v2231_v8  ;;  %4783 = vmatprep.subr.bf16.mxu0 %v4782_v24  ;;  %v2452_v26 = vsel %vm1011_vm5, %v5756_v61, %v5757_v25  ;;  %v2626_v37 = vsel %vm1184_vm6, %v5771_v0, %v8687_v39 }
 0x1cc   : > { %4817 = vmatpush1.bf16.msra.mxu1 %v4816_v30  ;;  %v2625_v2 = vsel %vm1184_vm6, %v5767_v59, %v5771_v0  ;;  %v8908_v63 = vunpack.i.h.bf16 %v7646_v60  ;;  %v4786_v18 = vpack.c.bf16 %v2624_v32, %v2452_v26  ;;  %v2454_v21 = vsel %vm1011_vm5, %v5761_v17, %v8688_v40  ;;  %v8910_v59 = vld [vmem:[#allocation34_spill] sm:$0xff] }
 0x1cd   : > { %4819 = vmatprep.subr.bf16.mxu1 %v4818_v45  ;;  %v5782_v8 = vunpack.i.h.bf16 %v7954_v33  ;;  %v5781_v30 = vunpack.i.l.bf16 %v7954_v33  ;;  %v5777_v24 = vunpack.i.h.bf16 %v5775_v14  ;;  %v5776_v15 = vunpack.i.l.bf16 %v5775_v14 }
 0x1ce   : > { %v2623_v11 = vsel %vm1184_vm6, %v8908_v63, %v5766_v51  ;;  %v5237_v39 = vunpack.i.h.bf16 %v8909_v54  ;;  %v5236_v0 = vunpack.i.l.bf16 %v8909_v54  ;;  %v5302_v60 = vunpack.i.h.bf16 %v8910_v59  ;;  %4785 = vmatpush1.bf16.msra.mxu0 %v4784_v7  ;;  %v7976_v51 = vpop.permute.xlu1 %5789  ;;  %v5785_v42 = vpop.permute.xlu0 %5784 }
 0x1cf   : > { %v4822_v45 = vpack.c.bf16 %v2626_v37, %v2454_v21  ;;  %v2453_v32 = vsel %vm1011_vm5, %v5757_v25, %v5761_v17  ;;  %v8911_v26 = vunpack.i.h.bf16 %v7615_v34  ;;  %4787 = vmatprep.subr.bf16.mxu0 %v4786_v18  ;;  %v5792_v14 = vunpack.i.h.bf16 %v7976_v51 }
 0x1d0   : > { %4821 = vmatpush1.bf16.msra.mxu1 %v4820_v10  ;;  %v5791_v40 = vunpack.i.l.bf16 %v7976_v51  ;;  %v4824_v19 = vpack.c.bf16 %v2625_v2, %v2453_v32  ;;  %v5787_v31 = vunpack.i.h.bf16 %v5785_v42  ;;  %v5786_v7 = vunpack.i.l.bf16 %v5785_v42  ;;  %v8945_v51 = vld [vmem:[#allocation36_spill] sm:$0xff] }
 0x1d1   : > { %v2451_v63 = vsel %vm1011_vm5, %v8911_v26, %v5756_v61  ;;  %4823 = vmatprep.subr.bf16.mxu1 %v4822_v45  ;;  %v2797_v37 = vsel %vm1357_vm7, %v5777_v24, %v5781_v30  ;;  %v2795_v34 = vsel %vm1357_vm7, %v5686_v58, %v5776_v15  ;;  %v2798_v25 = vsel %vm1357_vm7, %v5781_v30, %v5782_v8  ;;  %v8916_v26 = vld [vmem:[#allocation77_spill] sm:$0xff] }
 0x1d2   : > { %v4788_v54 = vpack.c.bf16 %v2623_v11, %v2451_v63  ;;  %v2970_v61 = vsel %vm1530_vm8, %v5791_v40, %v5792_v14  ;;  %v2969_v17 = vsel %vm1530_vm8, %v5787_v31, %v5791_v40  ;;  %v2967_v42 = vsel %vm1530_vm8, %v5697_v23, %v5786_v7  ;;  %v7998_v10 = vpop.permute.xlu1 %5799  ;;  %v8002_v21 = vpop.permute.xlu0 %5794 }
 0x1d3   : > { %v2968_v55 = vsel %vm1530_vm8, %v5786_v7, %v5787_v31  ;;  %v4826_v58 = vpack.c.bf16 %v2970_v61, %v2798_v25  ;;  %v5301_v2 = vunpack.i.l.bf16 %v8910_v59  ;;  %v4792_v11 = vpack.c.bf16 %v2967_v42, %v2795_v34  ;;  %v8914_v59 = vld [vmem:[#allocation78_spill] sm:$0xff]  ;;  %v8061_v61 = vld [vmem:[%s6051_s17 + $0xa0] sm:$0xff] }
 0x1d4   : > { %4789 = vmatpush1.bf16.msra.mxu0 %v4788_v54  ;;  %v4828_v18 = vpack.c.bf16 %v2969_v17, %v2797_v37  ;;  %4825 = vmatpush1.bf16.msra.mxu1 %v4824_v19  ;;  %v2796_v30 = vsel %vm1357_vm7, %v5776_v15, %v5777_v24  ;;  %v5297_v40 = vunpack.i.h.bf16 %v8877_v22  ;;  %v8696_v45 = vunpack.i.l.bf16 %v8912_v35  ;;  %v8913_v24 = vld [vmem:[#allocation67_spill] sm:$0xff] }
 0x1d5   : > { %v4790_v23 = vpack.c.bf16 %v2968_v55, %v2796_v30  ;;  %4827 = vmatprep.subr.bf16.mxu1 %v4826_v58  ;;  %v808_v31 = vsel %vm790_vm3, %v5232_v48, %v5236_v0  ;;  %v8015_v19 = vsel %vm617_vm2, %v5171_v43, %v5172_v12  ;;  %v8022_v15 = vsel %vm617_vm2, %v5166_v1, %v5167_v13  ;;  %v8920_v55 = vld [vmem:[#allocation4_spill] sm:$0xff] }
 0x1d6   : > { %v4866_v32 = vpack.c.bf16 %v8914_v59, %v8913_v24  ;;  %v4868_v48 = vpack.c.bf16 %v8916_v26, %v8915_v52  ;;  %v809_v63 = vsel %vm790_vm3, %v5236_v0, %v5237_v39  ;;  %v8029_v54 = vpop.permute.xlu1 %5809  ;;  %v635_v7 = vsel %vm617_vm2, %v5167_v13, %v5171_v43  ;;  %v8046_v34 = vpop.permute.xlu0 %5804  ;;  %v8918_v43 = vld [vmem:[#allocation64_spill] sm:$0xff]  ;;  %v8925_v26 = vld [vmem:[#allocation46_spill] sm:$0xff] }
 0x1d7   : > { %4791 = vmatprep.subr.bf16.mxu0 %v4790_v23  ;;  %v637_v1 = vsel %vm617_vm2, %v5172_v12, %v5176_v28  ;;  %v4836_v37 = vpack.c.bf16 %v7951_v46, %v8022_v15  ;;  %v8044_v0 = vsel %vm1011_vm5, %v5301_v2, %v5302_v60  ;;  %v4834_v25 = vpack.c.bf16 %v808_v31, %v635_v7  ;;  %v8917_v12 = vld [vmem:[#allocation76_spill] sm:$0xff]  ;;  %v8923_v31 = vld [vmem:[#allocation61_spill] sm:$0xff] }
 0x1d8   : > { %4793 = vmatpush1.bf16.msra.mxu0 %v4792_v11  ;;  %4829 = vmatpush1.bf16.msra.mxu1 %v4828_v18  ;;  %v810_v56 = vsel %vm790_vm3, %v5237_v39, %v5241_v3  ;;  %v8054_v41 = vsel %vm1011_vm5, %v5296_v6, %v5297_v40  ;;  %v8919_v13 = vpack.c.bf16 %v8917_v12, %v8918_v43  ;;  %v8692_v39 = vunpack.i.h.bf16 %v7998_v10  ;;  %v8922_v23 = vld [vmem:[#allocation72_spill] sm:$0xff] }
 0x1d9   : > { %4867 = vmatprep.subr.bf16.mxu1 %v4866_v32  ;;  %v1029_v46 = vsel %vm1011_vm5, %v5297_v40, %v5301_v2  ;;  %v1031_v17 = vsel %vm1011_vm5, %v5302_v60, %v8696_v45  ;;  %v5801_v22 = vunpack.i.l.bf16 %v7998_v10  ;;  %v5797_v6 = vunpack.i.h.bf16 %v8002_v21  ;;  %v8074_v2 = vld [vmem:[%s8576_s1] sm:$0xff] }
 0x1da   : > { %4831 = vmatprep.subr.bf16.mxu0 %v8919_v13  ;;  %v5796_v42 = vunpack.i.l.bf16 %v8002_v21  ;;  %v5056_v58 = vunpack.i.l.bf16 %v8920_v55  ;;  %v8078_v60 = vpop.permute.xlu1 %5819  ;;  %v4870_v11 = vpack.c.bf16 %v810_v56, %v637_v1  ;;  %v4872_v18 = vpack.c.bf16 %v809_v63, %v8015_v19  ;;  %v8921_v21 = vld [vmem:[#allocation7_spill] sm:$0xff]  ;;  %v8087_v24 = vpop.permute.xlu0 %5814  ;;  %v8123_v13 = vld [vmem:[%s8576_s1 + $0x10] sm:$0xff] }
 0x1db   : > { %4009 = vmatmul.mubr.f32.vlgmr.msra.gmra.mrb[12].mxu0 %v8074_v2  ;;  %4086 = vmatmul.mubr.f32.vlgmr.msra.gmra.mrb[12].mxu1 %v8074_v2  ;;  %v4876_v30 = vpack.c.bf16 %v8044_v0, %v7944_v53  ;;  %v5112_v40 = vunpack.i.h.bf16 %v8921_v21  ;;  %v8924_v15 = vpack.c.bf16 %v8922_v23, %v8923_v31  ;;  %v4838_v59 = vpack.c.bf16 %v1029_v46, %v7940_v38  ;;  %v8926_v63 = vld [vmem:[#allocation47_spill] sm:$0xff] }
 0x1dc   : > { %4869 = vmatpush1.bf16.msra.mxu1 %v4868_v48  ;;  %v4874_v32 = vpack.c.bf16 %v1031_v17, %v8061_v61  ;;  %v4840_v52 = vpack.c.bf16 %v8054_v41, %v7935_v57  ;;  %v5362_v19 = vunpack.i.h.bf16 %v8895_v44  ;;  %v8694_v53 = vunpack.i.l.bf16 %v8925_v26  ;;  %v8927_v48 = vld [vmem:[#allocation8_spill] sm:$0xff]  ;;  %v8108_v41 = vld [vmem:[%s8576_s1 + $0x18] sm:$0xff] }
 0x1dd   : > { %4833 = vmatpush1.bf16.msra.mxu0 %v8924_v15  ;;  %v5367_v7 = vunpack.i.h.bf16 %v8926_v63  ;;  %v5366_v1 = vunpack.i.l.bf16 %v8926_v63  ;;  %4871 = vmatprep.subr.bf16.mxu1 %v4870_v11  ;;  %v5121_v0 = vunpack.i.l.bf16 %v8927_v48  ;;  %v1376_v56 = vsel %vm1357_vm7, %v5797_v6, %v5801_v22  ;;  %v8928_v63 = vld [vmem:[#allocation9_spill] sm:$0xff]  ;;  %v8144_v44 = vld [vmem:[%s8576_s1 + $0x8] sm:$0xff] }
 0x1de   : > { %4835 = vmatprep.subr.bf16.mxu0 %v4834_v25  ;;  %v1374_v38 = vsel %vm1357_vm7, %v5702_v29, %v5796_v42  ;;  %v1377_v57 = vsel %vm1357_vm7, %v5801_v22, %v8692_v39  ;;  %4529 = vmatprep.mubr.msk.f32.mxu0 %vm3475_vm4, %v8108_v41  ;;  %v8693_v25 = vunpack.i.h.bf16 %v8029_v54  ;;  %v5811_v36 = vunpack.i.l.bf16 %v8029_v54  ;;  %v8117_v12 = vpop.permute.xlu1 %5829  ;;  %v5825_v23 = vpop.permute.xlu0 %5824 }
 0x1df   : > { %4531 = vmatprep.mubr.msk.f32.mxu1 %vm3475_vm4, %v8108_v41  ;;  %v5807_v29 = vunpack.i.h.bf16 %v8046_v34  ;;  %v1375_v43 = vsel %vm1357_vm7, %v5796_v42, %v5797_v6  ;;  %4015 = vmatmul.mubr.f32.gmra.mrb[14].mxu0 %v8123_v13  ;;  %v8695_v46 = vunpack.i.h.bf16 %v8078_v60  ;;  %v5821_v17 = vunpack.i.l.bf16 %v8078_v60 }
 0x1e0   : > { %v5817_v22 = vunpack.i.h.bf16 %v8087_v24  ;;  %v5816_v11 = vunpack.i.l.bf16 %v8087_v24  ;;  %4873 = vmatpush1.bf16.msra.mxu1 %v4872_v18  ;;  %v1201_v6 = vsel %vm1184_vm6, %v5361_v16, %v5362_v19  ;;  %v1203_v42 = vsel %vm1184_vm6, %v5366_v1, %v5367_v7  ;;  %4532 = vmatprep.mubr.msk.f32.mxu0 %vm3475_vm4, %v8144_v44 }
 0x1e1   : > { %4837 = vmatpush1.bf16.msra.mxu0 %v4836_v37  ;;  %v5806_v31 = vunpack.i.l.bf16 %v8046_v34  ;;  %4875 = vmatprep.subr.bf16.mxu1 %v4874_v32  ;;  %v1204_v15 = vsel %vm1184_vm6, %v5367_v7, %v8694_v53  ;;  %v5117_v39 = vunpack.i.h.bf16 %v8928_v63  ;;  %v4844_v24 = vpack.c.bf16 %v1374_v38, %v1201_v6 }
 0x1e2   : > { %4839 = vmatprep.subr.bf16.mxu0 %v4838_v59  ;;  %v1202_v37 = vsel %vm1184_vm6, %v5362_v19, %v5366_v1  ;;  %v4878_v18 = vpack.c.bf16 %v1377_v57, %v1204_v15  ;;  %4092 = vmatmul.mubr.f32.gmra.mrb[14].mxu1 %v8123_v13  ;;  %v4880_v16 = vpack.c.bf16 %v1376_v56, %v1203_v42  ;;  %v8149_v59 = vpop.permute.xlu1 %5839  ;;  %v5835_v38 = vpop.permute.xlu0 %5834  ;;  %v5831_v15 = vunpack.i.l.bf16 %v8117_v12 }
 0x1e3   : > { %v1549_v34 = vsel %vm1530_vm8, %v5807_v29, %v5811_v36  ;;  %v4842_v32 = vpack.c.bf16 %v1375_v43, %v1202_v37  ;;  %v1550_v19 = vsel %vm1530_vm8, %v5811_v36, %v8693_v25  ;;  %4534 = vmatprep.mubr.msk.f32.mxu1 %vm3475_vm4, %v8144_v44  ;;  %v5842_v7 = vunpack.i.h.bf16 %v8149_v59 }
 0x1e4   : > { %4877 = vmatpush1.bf16.msra.mxu1 %v4876_v30  ;;  %v5841_v1 = vunpack.i.l.bf16 %v8149_v59  ;;  %v1720_v56 = vsel %vm271_vm0, %v5816_v11, %v5817_v22  ;;  %v1722_v57 = vsel %vm271_vm0, %v5821_v17, %v8695_v46  ;;  %v8929_v43 = vunpack.i.h.bf16 %v7780_v4 }
 0x1e5   : > { %4841 = vmatpush1.bf16.msra.mxu0 %v4840_v52  ;;  %v5837_v6 = vunpack.i.h.bf16 %v5835_v38  ;;  %v5836_v42 = vunpack.i.l.bf16 %v5835_v38  ;;  %4879 = vmatprep.subr.bf16.mxu1 %v4878_v18  ;;  %v1548_v30 = vsel %vm1530_vm8, %v5806_v31, %v5807_v29  ;;  %v5832_v52 = vunpack.i.h.bf16 %v8117_v12 }
 0x1e6   : > { %v1719_v36 = vsel %vm271_vm0, %v8929_v43, %v5816_v11  ;;  %4843 = vmatprep.subr.bf16.mxu0 %v4842_v32  ;;  %v5827_v37 = vunpack.i.h.bf16 %v5825_v23  ;;  %v5826_v25 = vunpack.i.l.bf16 %v5825_v23  ;;  %v8930_v53 = vunpack.i.h.bf16 %v7725_v47  ;;  %v8172_v45 = vpop.permute.xlu1 %5849  ;;  %v5845_v32 = vpop.permute.xlu0 %5844 }
 0x1e7   : > { %v1721_v4 = vsel %vm271_vm0, %v5817_v22, %v5821_v17  ;;  %v4846_v11 = vpack.c.bf16 %v1720_v56, %v1548_v30  ;;  %v4882_v38 = vpack.c.bf16 %v1722_v57, %v1550_v19  ;;  %v5852_v29 = vunpack.i.h.bf16 %v8172_v45 }
 0x1e8   : > { %v1547_v46 = vsel %vm1530_vm8, %v8930_v53, %v5806_v31  ;;  %4881 = vmatpush1.bf16.msra.mxu1 %v4880_v16  ;;  %v5851_v18 = vunpack.i.l.bf16 %v8172_v45  ;;  %v2064_v43 = vsel %vm617_vm2, %v5836_v42, %v5837_v6  ;;  %v2066_v47 = vsel %vm617_vm2, %v5841_v1, %v5842_v7 }
 0x1e9   : > { %4845 = vmatpush1.bf16.msra.mxu0 %v4844_v24  ;;  %v4848_v53 = vpack.c.bf16 %v1719_v36, %v1547_v46  ;;  %v8931_v17 = vunpack.i.h.bf16 %v7856_v62  ;;  %v5847_v23 = vunpack.i.h.bf16 %v5845_v32  ;;  %v5846_v31 = vunpack.i.l.bf16 %v5845_v32  ;;  %4883 = vmatprep.subr.bf16.mxu1 %v4882_v38 }
 0x1ea   : > { %4847 = vmatprep.subr.bf16.mxu0 %v4846_v11  ;;  %v4884_v24 = vpack.c.bf16 %v1721_v4, %v1549_v34  ;;  %v2065_v16 = vsel %vm617_vm2, %v5837_v6, %v5841_v1  ;;  %v1892_v19 = vsel %vm444_vm1, %v5826_v25, %v5827_v37  ;;  %v1894_v56 = vsel %vm444_vm1, %v5831_v15, %v5832_v52  ;;  %v8192_v36 = vpop.permute.xlu1 %5859  ;;  %v5855_v6 = vpop.permute.xlu0 %5854 }
 0x1eb   : > { %v2063_v22 = vsel %vm617_vm2, %v8931_v17, %v5836_v42  ;;  %v1893_v57 = vsel %vm444_vm1, %v5827_v37, %v5831_v15  ;;  %v8932_v46 = vunpack.i.h.bf16 %v7812_v49  ;;  %v4850_v42 = vpack.c.bf16 %v2064_v43, %v1892_v19  ;;  %v8209_v17 = vld [vmem:[%s6051_s17 + $0xb8] sm:$0xff] }
 0x1ec   : > { %v4886_v30 = vpack.c.bf16 %v2066_v47, %v1894_v56  ;;  %v5116_v34 = vunpack.i.l.bf16 %v8928_v63  ;;  %4885 = vmatpush1.bf16.msra.mxu1 %v4884_v24  ;;  %v2236_v4 = vsel %vm790_vm3, %v5846_v31, %v5847_v23  ;;  %v2238_v49 = vsel %vm790_vm3, %v5851_v18, %v5852_v29  ;;  %v8935_v24 = vld [vmem:[#allocation3_spill] sm:$0xff]  ;;  %v8230_v56 = vld [vmem:[%s6051_s17 + $0xb0] sm:$0xff] }
 0x1ed   : > { %v1891_v62 = vsel %vm444_vm1, %v8932_v46, %v5826_v25  ;;  %4849 = vmatpush1.bf16.msra.mxu0 %v4848_v53  ;;  %v4888_v15 = vpack.c.bf16 %v2065_v16, %v1893_v57  ;;  %v2237_v25 = vsel %vm790_vm3, %v5847_v23, %v5851_v18  ;;  %v8933_v37 = vunpack.i.h.bf16 %v7877_v9  ;;  %v8206_v53 = vld [vmem:[%s6051_s17 + $0xa8] sm:$0xff] }
 0x1ee   : > { %v4852_v1 = vpack.c.bf16 %v2063_v22, %v1891_v62  ;;  %4851 = vmatprep.subr.bf16.mxu0 %v4850_v42  ;;  %4887 = vmatprep.subr.bf16.mxu1 %v4886_v30  ;;  %v5862_v38 = vunpack.i.h.bf16 %v8192_v36  ;;  %v5861_v32 = vunpack.i.l.bf16 %v8192_v36  ;;  %v5857_v43 = vunpack.i.h.bf16 %v5855_v6  ;;  %v8218_v22 = vpop.permute.xlu1 %5869  ;;  %v5865_v62 = vpop.permute.xlu0 %5864 }
 0x1ef   : > { %v2235_v11 = vsel %vm790_vm3, %v8933_v37, %v5846_v31  ;;  %v5856_v47 = vunpack.i.l.bf16 %v5855_v6  ;;  %v8934_v18 = vunpack.i.l.bf16 %v8921_v21  ;;  %v4854_v23 = vpack.c.bf16 %v8206_v53, %v2236_v4 }
 0x1f0   : > { %v4890_v31 = vpack.c.bf16 %v8209_v17, %v2238_v49  ;;  %v8936_v16 = vunpack.i.h.bf16 %v8935_v24  ;;  %4889 = vmatpush1.bf16.msra.mxu1 %v4888_v15  ;;  %v8699_v57 = vunpack.i.h.bf16 %v8218_v22  ;;  %v5871_v46 = vunpack.i.l.bf16 %v8218_v22  ;;  %v8939_v24 = vld [vmem:[#allocation69_spill] sm:$0xff] }
 0x1f1   : > { %v8216_v9 = vsel %vm444_vm1, %v8934_v18, %v5112_v40  ;;  %4853 = vmatpush1.bf16.msra.mxu0 %v4852_v1  ;;  %v8237_v42 = vsel %vm444_vm1, %v5112_v40, %v5116_v34  ;;  %v8244_v55 = vsel %vm444_vm1, %v5117_v39, %v5121_v0  ;;  %v4856_v30 = vpack.c.bf16 %v8061_v61, %v2235_v11 }
 0x1f2   : > { %v8227_v19 = vsel %vm271_vm0, %v8936_v16, %v5056_v58  ;;  %v4892_v58 = vpack.c.bf16 %v8230_v56, %v2237_v25  ;;  %v5867_v1 = vunpack.i.h.bf16 %v5865_v62  ;;  %v5866_v6 = vunpack.i.l.bf16 %v5865_v62  ;;  %4855 = vmatprep.subr.bf16.mxu0 %v4854_v23  ;;  %4891 = vmatprep.subr.bf16.mxu1 %v4890_v31  ;;  %v8262_v25 = vpop.permute.xlu1 %5879 }
 0x1f3   : > { %v2457_v21 = vsel %vm1011_vm5, %v5857_v43, %v5861_v32  ;;  %v8937_v40 = vunpack.i.h.bf16 %v7903_v5  ;;  %v2458_v48 = vsel %vm1011_vm5, %v5861_v32, %v5862_v38  ;;  %v2630_v0 = vsel %vm1184_vm6, %v5871_v46, %v8699_v57  ;;  %v5875_v32 = vpop.permute.xlu0 %5874 }
 0x1f4   : > { %v2629_v61 = vsel %vm1184_vm6, %v5867_v1, %v5871_v46  ;;  %v8938_v49 = vunpack.i.h.bf16 %v7922_v27  ;;  %v2628_v5 = vsel %vm1184_vm6, %v5866_v6, %v5867_v1  ;;  %v4894_v37 = vpack.c.bf16 %v2630_v0, %v2458_v48  ;;  %4893 = vmatpush1.bf16.msra.mxu1 %v4892_v58  ;;  %v8940_v46 = vld [vmem:[#allocation66_spill] sm:$0xff] }
 0x1f5   : > { %v2455_v4 = vsel %vm1011_vm5, %v8937_v40, %v5856_v47  ;;  %v4896_v18 = vpack.c.bf16 %v2629_v61, %v2457_v21  ;;  %4857 = vmatpush1.bf16.msra.mxu0 %v4856_v30  ;;  %v2456_v23 = vsel %vm1011_vm5, %v5856_v47, %v5857_v43  ;;  %v8269_v31 = vsel %vm444_vm1, %v5116_v34, %v5117_v39  ;;  %v8941_v43 = vld [vmem:[#allocation14_spill] sm:$0xff]  ;;  %v8942_v21 = vld [vmem:[#allocation16_spill] sm:$0xff] }
 0x1f6   : > { %v2627_v15 = vsel %vm1184_vm6, %v8938_v49, %v5866_v6  ;;  %v4858_v27 = vpack.c.bf16 %v2628_v5, %v2456_v23  ;;  %4895 = vmatprep.subr.bf16.mxu1 %v4894_v37  ;;  %v4902_v16 = vpack.c.bf16 %v8237_v42, %v8939_v24  ;;  %v4904_v62 = vpack.c.bf16 %v8216_v9, %v8940_v46  ;;  %v8280_v34 = vpop.permute.xlu1 %5889  ;;  %v8943_v49 = vld [vmem:[#allocation26_spill] sm:$0xff]  ;;  %v8944_v5 = vld [vmem:[#allocation27_spill] sm:$0xff] }
 0x1f7   : > { %v4860_v11 = vpack.c.bf16 %v2627_v15, %v2455_v4  ;;  %v8697_v1 = vunpack.i.h.bf16 %v8262_v25  ;;  %v5881_v58 = vunpack.i.l.bf16 %v8262_v25  ;;  %v5877_v30 = vunpack.i.h.bf16 %v5875_v32  ;;  %v5885_v61 = vpop.permute.xlu0 %5884 }
 0x1f8   : > { %v5876_v6 = vunpack.i.l.bf16 %v5875_v32  ;;  %v5182_v47 = vunpack.i.h.bf16 %v8941_v43  ;;  %v5181_v63 = vunpack.i.l.bf16 %v8941_v43  ;;  %v5177_v39 = vunpack.i.h.bf16 %v8906_v50  ;;  %4859 = vmatprep.subr.bf16.mxu0 %v4858_v27  ;;  %4897 = vmatpush1.bf16.msra.mxu1 %v4896_v18 }
 0x1f9   : > { %v4938_v42 = vpack.c.bf16 %v8244_v55, %v8227_v19  ;;  %v5186_v40 = vunpack.i.l.bf16 %v8942_v21  ;;  %v5242_v4 = vunpack.i.h.bf16 %v8907_v20  ;;  %4861 = vmatpush1.bf16.msra.mxu0 %v4860_v11  ;;  %v8698_v48 = vunpack.i.h.bf16 %v8280_v34 }
 0x1fa   : > { %v5891_v0 = vunpack.i.l.bf16 %v8280_v34  ;;  %v5251_v15 = vunpack.i.l.bf16 %v8943_v49  ;;  %v5247_v37 = vunpack.i.h.bf16 %v8944_v5  ;;  %v5887_v32 = vunpack.i.h.bf16 %v5885_v61  ;;  %v8304_v43 = vpop.permute.xlu1 %5899 }
 0x1fb   : > { %v5886_v23 = vunpack.i.l.bf16 %v5885_v61  ;;  %v2801_v27 = vsel %vm1357_vm7, %v5877_v30, %v5881_v58  ;;  %v2799_v19 = vsel %vm1357_vm7, %v5782_v8, %v5876_v6  ;;  %v2802_v55 = vsel %vm1357_vm7, %v5881_v58, %v8697_v1  ;;  %v8308_v58 = vpop.permute.xlu0 %5894 }
 0x1fc   : > { %v2974_v11 = vsel %vm1530_vm8, %v5891_v0, %v8698_v48  ;;  %v2973_v18 = vsel %vm1530_vm8, %v5887_v32, %v5891_v0  ;;  %v5246_v8 = vunpack.i.l.bf16 %v8944_v5  ;;  %v2800_v1 = vsel %vm1357_vm7, %v5876_v6, %v5877_v30  ;;  %v8946_v5 = vld [vmem:[#allocation38_spill] sm:$0xff] }
 0x1fd   : > { %v2971_v24 = vsel %vm1530_vm8, %v5792_v14, %v5886_v23  ;;  %v2972_v33 = vsel %vm1530_vm8, %v5886_v23, %v5887_v32  ;;  %v4898_v21 = vpack.c.bf16 %v2974_v11, %v2802_v55  ;;  %v4900_v49 = vpack.c.bf16 %v2973_v18, %v2801_v27  ;;  %v8947_v27 = vld [vmem:[#allocation65_spill] sm:$0xff] }
 0x1fe   : > { %v4864_v61 = vpack.c.bf16 %v2971_v24, %v2799_v19  ;;  %v8314_v0 = vsel %vm790_vm3, %v5241_v3, %v5242_v4  ;;  %v5312_v14 = vunpack.i.h.bf16 %v8945_v51  ;;  %v5311_v48 = vunpack.i.l.bf16 %v8945_v51  ;;  %v8327_v6 = vpop.permute.xlu1 %5909 }
 0x1ff   : > { %v4862_v57 = vpack.c.bf16 %v2972_v33, %v2800_v1  ;;  %4899 = vmatprep.subr.bf16.mxu1 %v4898_v21  ;;  %v5307_v32 = vunpack.i.h.bf16 %v8912_v35  ;;  %v5316_v23 = vunpack.i.l.bf16 %v8946_v5  ;;  %v4940_v19 = vpack.c.bf16 %v8269_v31, %v8947_v27  ;;  %v8331_v11 = vpop.permute.xlu0 %5904 }
 0x200   : > { %4901 = vmatpush1.bf16.msra.mxu1 %v4900_v49  ;;  %v814_v30 = vsel %vm790_vm3, %v5247_v37, %v5251_v15  ;;  %v640_v20 = vsel %vm617_vm2, %v5181_v63, %v5182_v47  ;;  %v638_v3 = vsel %vm617_vm2, %v5176_v28, %v5177_v39  ;;  %v639_v1 = vsel %vm617_vm2, %v5177_v39, %v5181_v63 }
 0x201   : > { %4863 = vmatprep.subr.bf16.mxu0 %v4862_v57  ;;  %4939 = vmatprep.subr.bf16.mxu1 %v4938_v42  ;;  %v813_v55 = vsel %vm790_vm3, %v5246_v8, %v5247_v37  ;;  %v812_v31 = vsel %vm790_vm3, %v5242_v4, %v5246_v8  ;;  %v641_v15 = vsel %vm617_vm2, %v5182_v47, %v5186_v40  ;;  %v5902_v57 = vunpack.i.h.bf16 %v8304_v43  ;;  %v8344_v47 = vld [vmem:[%s6051_s17 + $0xc0] sm:$0xff] }
 0x202   : > { %4865 = vmatpush1.bf16.msra.mxu0 %v4864_v61  ;;  %v4908_v50 = vpack.c.bf16 %v8314_v0, %v638_v3  ;;  %v1034_v28 = vsel %vm1011_vm5, %v5311_v48, %v5312_v14  ;;  %v5901_v42 = vunpack.i.l.bf16 %v8304_v43  ;;  %v4942_v63 = vpack.c.bf16 %v814_v30, %v641_v15  ;;  %v5920_v24 = vpop.permute.xlu1 %5919  ;;  %v8950_v61 = vld [vmem:[#allocation49_spill] sm:$0xff] }
 0x203   : > { %4903 = vmatprep.subr.bf16.mxu0 %v4902_v16  ;;  %4240 = vmatmul.mubr.f32.vlgmr.msra.gmra.mrb[16].mxu1 %v8074_v2  ;;  %v5897_v39 = vunpack.i.h.bf16 %v8308_v58  ;;  %v5896_v37 = vunpack.i.l.bf16 %v8308_v58  ;;  %v1033_v4 = vsel %vm1011_vm5, %v5307_v32, %v5311_v48  ;;  %v1035_v40 = vsel %vm1011_vm5, %v5312_v14, %v5316_v23  ;;  %v8949_v48 = vld [vmem:[#allocation48_spill] sm:$0xff]  ;;  %v8359_v58 = vpop.permute.xlu0 %5914 }
 0x204   : > { %4941 = vmatpush1.bf16.msra.mxu1 %v4940_v19  ;;  %4535 = vmatprep.mubr.msk.f32.mxu1 %vm3475_vm4, %v8108_v41  ;;  %v8948_v18 = vunpack.i.l.bf16 %v8912_v35  ;;  %v4906_v43 = vpack.c.bf16 %v812_v31, %v639_v1  ;;  %v4944_v33 = vpack.c.bf16 %v813_v55, %v640_v20  ;;  %v5372_v21 = vunpack.i.h.bf16 %v8925_v26 }
 0x205   : > { %4163 = vmatmul.mubr.f32.vlgmr.msra.gmra.mrb[16].mxu0 %v8074_v2  ;;  %4943 = vmatprep.subr.bf16.mxu1 %v4942_v63  ;;  %v5381_v8 = vunpack.i.l.bf16 %v8949_v48  ;;  %v5377_v49 = vunpack.i.h.bf16 %v8950_v61  ;;  %v4948_v35 = vpack.c.bf16 %v1034_v28, %v8209_v17  ;;  %v5376_v0 = vunpack.i.l.bf16 %v8950_v61 }
 0x206   : > { %v1032_v16 = vsel %vm1011_vm5, %v8948_v18, %v5307_v32  ;;  %4905 = vmatpush1.bf16.msra.mxu0 %v4904_v62  ;;  %4533 = vmatprep.mubr.msk.f32.mxu0 %vm3475_vm4, %v8108_v41  ;;  %v4910_v51 = vpack.c.bf16 %v1033_v4, %v8230_v56  ;;  %v4946_v14 = vpack.c.bf16 %v1035_v40, %v8344_v47  ;;  %v8951_v46 = vunpack.i.h.bf16 %v7998_v10  ;;  %v8379_v30 = vpop.permute.xlu1 %5929 }
 0x207   : > { %4907 = vmatprep.subr.bf16.mxu0 %v4906_v43  ;;  %v1381_v32 = vsel %vm1357_vm7, %v5901_v42, %v5902_v57  ;;  %4246 = vmatmul.mubr.f32.gmra.mrb[18].mxu1 %v8123_v13  ;;  %v1380_v9 = vsel %vm1357_vm7, %v5897_v39, %v5901_v42  ;;  %v5922_v62 = vunpack.i.h.bf16 %v5920_v24  ;;  %v5921_v5 = vunpack.i.l.bf16 %v5920_v24  ;;  %v8384_v3 = vpop.permute.xlu0 %5924 }
 0x208   : > { %v1378_v17 = vsel %vm1357_vm7, %v8951_v46, %v5896_v37  ;;  %4945 = vmatpush1.bf16.msra.mxu1 %v4944_v33  ;;  %4538 = vmatprep.mubr.msk.f32.mxu1 %vm3475_vm4, %v8144_v44  ;;  %v5912_v56 = vunpack.i.h.bf16 %v8327_v6  ;;  %v5911_v23 = vunpack.i.l.bf16 %v8327_v6  ;;  %v5917_v27 = vunpack.i.h.bf16 %v8359_v58 }
 0x209   : > { %v5916_v19 = vunpack.i.l.bf16 %v8359_v58  ;;  %4947 = vmatprep.subr.bf16.mxu1 %v4946_v14  ;;  %v8952_v10 = vunpack.i.l.bf16 %v8925_v26  ;;  %v4912_v1 = vpack.c.bf16 %v1032_v16, %v8206_v53  ;;  %v1379_v55 = vsel %vm1357_vm7, %v5896_v37, %v5897_v39  ;;  %4169 = vmatmul.mubr.f32.gmra.mrb[18].mxu0 %v8123_v13 }
 0x20a   : > { %4909 = vmatpush1.bf16.msra.mxu0 %v4908_v50  ;;  %v1208_v6 = vsel %vm1184_vm6, %v5377_v49, %v5381_v8  ;;  %v1207_v31 = vsel %vm1184_vm6, %v5376_v0, %v5377_v49  ;;  %v5907_v15 = vunpack.i.h.bf16 %v8331_v11  ;;  %v1206_v28 = vsel %vm1184_vm6, %v5372_v21, %v5376_v0  ;;  %4536 = vmatprep.mubr.msk.f32.mxu0 %vm3475_vm4, %v8144_v44  ;;  %v5940_v39 = vpop.permute.xlu1 %5939 }
 0x20b   : > { %v1205_v20 = vsel %vm1184_vm6, %v8952_v10, %v5372_v21  ;;  %4911 = vmatprep.subr.bf16.mxu0 %v4910_v51  ;;  %v4950_v57 = vpack.c.bf16 %v1381_v32, %v1208_v6  ;;  %v4952_v50 = vpack.c.bf16 %v1380_v9, %v1207_v31  ;;  %v5906_v42 = vunpack.i.l.bf16 %v8331_v11  ;;  %v5935_v43 = vpop.permute.xlu0 %5934 }
 0x20c   : > { %v4916_v26 = vpack.c.bf16 %v1378_v17, %v1205_v20  ;;  %4949 = vmatpush1.bf16.msra.mxu1 %v4948_v35  ;;  %v1726_v53 = vsel %vm271_vm0, %v5921_v5, %v5922_v62  ;;  %v1725_v63 = vsel %vm271_vm0, %v5917_v27, %v5921_v5  ;;  %v4914_v37 = vpack.c.bf16 %v1379_v55, %v1206_v28 }
 0x20d   : > { %4951 = vmatprep.subr.bf16.mxu1 %v4950_v57  ;;  %v1724_v4 = vsel %vm271_vm0, %v5916_v19, %v5917_v27  ;;  %v1554_v40 = vsel %vm1530_vm8, %v5911_v23, %v5912_v56  ;;  %v5932_v18 = vunpack.i.h.bf16 %v8379_v30  ;;  %v5931_v16 = vunpack.i.l.bf16 %v8379_v30  ;;  %v2312_v57 = vld [vmem:[%s6051_s17 + $0xc8] sm:$0xff] }
 0x20e   : > { %4913 = vmatpush1.bf16.msra.mxu0 %v4912_v1  ;;  %v5942_v11 = vunpack.i.h.bf16 %v5940_v39  ;;  %v5941_v24 = vunpack.i.l.bf16 %v5940_v39  ;;  %v1553_v33 = vsel %vm1530_vm8, %v5907_v15, %v5911_v23  ;;  %v5937_v44 = vunpack.i.h.bf16 %v5935_v43  ;;  %v5950_v9 = vpop.permute.xlu1 %5949  ;;  %v2314_v1 = vld [vmem:[%s6051_s17 + $0xd8] sm:$0xff] }
 0x20f   : > { %v5936_v21 = vunpack.i.l.bf16 %v5935_v43  ;;  %4915 = vmatprep.subr.bf16.mxu0 %v4914_v37  ;;  %v4954_v48 = vpack.c.bf16 %v1726_v53, %v1554_v40  ;;  %v5927_v8 = vunpack.i.h.bf16 %v8384_v3  ;;  %v5926_v61 = vunpack.i.l.bf16 %v8384_v3  ;;  %v5945_v5 = vpop.permute.xlu0 %5944 }
 0x210   : > { %4953 = vmatpush1.bf16.msra.mxu1 %v4952_v50  ;;  %v1552_v49 = vsel %vm1530_vm8, %v5906_v42, %v5907_v15  ;;  %v2070_v58 = vsel %vm617_vm2, %v5941_v24, %v5942_v11  ;;  %v8953_v35 = vunpack.i.h.bf16 %v8029_v54  ;;  %v8954_v51 = vunpack.i.h.bf16 %v8078_v60  ;;  %v2313_v50 = vld [vmem:[%s6051_s17 + $0xd0] sm:$0xff]  ;;  %s4975_s17 = smul.u32 384, %s8959_s13 }
 0x211   : > { %v4956_v32 = vpack.c.bf16 %v1725_v63, %v1553_v33  ;;  %v4918_v46 = vpack.c.bf16 %v1724_v4, %v1552_v49  ;;  %4955 = vmatprep.subr.bf16.mxu1 %v4954_v48  ;;  %v5952_v17 = vunpack.i.h.bf16 %v5950_v9  ;;  %v5951_v62 = vunpack.i.l.bf16 %v5950_v9 }
 0x212   : > { %v1551_v0 = vsel %vm1530_vm8, %v8953_v35, %v5906_v42  ;;  %v1723_v14 = vsel %vm271_vm0, %v8954_v51, %v5916_v19  ;;  %4917 = vmatpush1.bf16.msra.mxu0 %v4916_v26  ;;  %v2068_v56 = vsel %vm617_vm2, %v5936_v21, %v5937_v44  ;;  %v1898_v23 = vsel %vm444_vm1, %v5931_v16, %v5932_v18  ;;  %v5960_v6 = vpop.permute.xlu1 %5959  ;;  %s8472_s26 = scalar_lea.vmem %s8578_s3, %s4975_s17 }
 0x213   : > { %v2069_v54 = vsel %vm617_vm2, %v5937_v44, %v5941_v24  ;;  %v5947_v27 = vunpack.i.h.bf16 %v5945_v5  ;;  %v5946_v30 = vunpack.i.l.bf16 %v5945_v5  ;;  %4919 = vmatprep.subr.bf16.mxu0 %v4918_v46  ;;  %v4958_v60 = vpack.c.bf16 %v2070_v58, %v1898_v23  ;;  %v5955_v59 = vpop.permute.xlu0 %5954 }
 0x214   : > { %v4920_v19 = vpack.c.bf16 %v1723_v14, %v1551_v0  ;;  %v2067_v10 = vsel %vm617_vm2, %v5842_v7, %v5936_v21  ;;  %4957 = vmatpush1.bf16.msra.mxu1 %v4956_v32  ;;  %v1896_v20 = vsel %vm444_vm1, %v5926_v61, %v5927_v8  ;;  %v2242_v3 = vsel %vm790_vm3, %v5951_v62, %v5952_v17 }
 0x215   : > { %v1897_v55 = vsel %vm444_vm1, %v5927_v8, %v5931_v16  ;;  %v4922_v31 = vpack.c.bf16 %v2068_v56, %v1896_v20  ;;  %4959 = vmatprep.subr.bf16.mxu1 %v4958_v60  ;;  %v1895_v15 = vsel %vm444_vm1, %v5832_v52, %v5926_v61  ;;  %v2240_v7 = vsel %vm790_vm3, %v5946_v30, %v5947_v27 }
 0x216   : > { %v4960_v28 = vpack.c.bf16 %v2069_v54, %v1897_v55  ;;  %4921 = vmatpush1.bf16.msra.mxu0 %v4920_v19  ;;  %v4924_v26 = vpack.c.bf16 %v2067_v10, %v1895_v15  ;;  %v2241_v42 = vsel %vm790_vm3, %v5947_v27, %v5951_v62  ;;  %v2239_v53 = vsel %vm790_vm3, %v5852_v29, %v5946_v30  ;;  %v5970_v4 = vpop.permute.xlu1 %5969 }
 0x217   : > { %4923 = vmatprep.subr.bf16.mxu0 %v4922_v31  ;;  %v4962_v63 = vpack.c.bf16 %v2314_v1, %v2242_v3  ;;  %v5962_v39 = vunpack.i.h.bf16 %v5960_v6  ;;  %v5961_v12 = vunpack.i.l.bf16 %v5960_v6  ;;  %v5957_v37 = vunpack.i.h.bf16 %v5955_v59  ;;  %v5965_v24 = vpop.permute.xlu0 %5964 }
 0x218   : > { %v5956_v52 = vunpack.i.l.bf16 %v5955_v59  ;;  %4961 = vmatpush1.bf16.msra.mxu1 %v4960_v28  ;;  %v4926_v40 = vpack.c.bf16 %v2312_v57, %v2240_v7  ;;  %v4964_v18 = vpack.c.bf16 %v2313_v50, %v2241_v42  ;;  %v5972_v16 = vunpack.i.h.bf16 %v5970_v4 }
 0x219   : > { %4963 = vmatprep.subr.bf16.mxu1 %v4962_v63  ;;  %v5971_v11 = vunpack.i.l.bf16 %v5970_v4  ;;  %v4928_v43 = vpack.c.bf16 %v8344_v47, %v2239_v53  ;;  %v5967_v45 = vunpack.i.h.bf16 %v5965_v24  ;;  %v5966_v33 = vunpack.i.l.bf16 %v5965_v24 }
 0x21a   : > { %4925 = vmatpush1.bf16.msra.mxu0 %v4924_v26  ;;  %v2461_v29 = vsel %vm1011_vm5, %v5957_v37, %v5961_v12  ;;  %v2459_v44 = vsel %vm1011_vm5, %v5862_v38, %v5956_v52  ;;  %v2462_v21 = vsel %vm1011_vm5, %v5961_v12, %v5962_v39  ;;  %v8955_v61 = vunpack.i.h.bf16 %v8218_v22  ;;  %v5980_v49 = vpop.permute.xlu1 %5979 }
 0x21b   : > { %4927 = vmatprep.subr.bf16.mxu0 %v4926_v40  ;;  %v2634_v48 = vsel %vm1184_vm6, %v5971_v11, %v5972_v16  ;;  %v2633_v8 = vsel %vm1184_vm6, %v5967_v45, %v5971_v11  ;;  %v2632_v58 = vsel %vm1184_vm6, %v5966_v33, %v5967_v45  ;;  %v5975_v36 = vpop.permute.xlu0 %5974  ;;  %v2460_v38 = vsel %vm1011_vm5, %v5956_v52, %v5957_v37 }
 0x21c   : > { %4965 = vmatpush1.bf16.msra.mxu1 %v4964_v18  ;;  %v2631_v47 = vsel %vm1184_vm6, %v8955_v61, %v5966_v33  ;;  %v4966_v35 = vpack.c.bf16 %v2634_v48, %v2462_v21  ;;  %v4968_v51 = vpack.c.bf16 %v2633_v8, %v2461_v29  ;;  %v5982_v14 = vunpack.i.h.bf16 %v5980_v49 }
 0x21d   : > { %v4932_v0 = vpack.c.bf16 %v2631_v47, %v2459_v44  ;;  %v5981_v32 = vunpack.i.l.bf16 %v5980_v49  ;;  %v4930_v9 = vpack.c.bf16 %v2632_v58, %v2460_v38  ;;  %v5977_v46 = vunpack.i.h.bf16 %v5975_v36 }
 0x21e   : > { %4929 = vmatpush1.bf16.msra.mxu0 %v4928_v43  ;;  %4967 = vmatprep.subr.bf16.mxu1 %v4966_v35  ;;  %v5976_v17 = vunpack.i.l.bf16 %v5975_v36  ;;  %v5990_v22 = vpop.permute.xlu1 %5989  ;;  %v8956_v60 = vunpack.i.h.bf16 %v8262_v25  ;;  %v8957_v1 = vunpack.i.h.bf16 %v8280_v34 }
 0x21f   : > { %4931 = vmatprep.subr.bf16.mxu0 %v4930_v9  ;;  %v5992_v62 = vunpack.i.h.bf16 %v5990_v22  ;;  %v5991_v5 = vunpack.i.l.bf16 %v5990_v22  ;;  %v5985_v56 = vpop.permute.xlu0 %5984  ;;  %v2806_v27 = vsel %vm1357_vm7, %v5981_v32, %v5982_v14  ;;  %v2805_v30 = vsel %vm1357_vm7, %v5977_v46, %v5981_v32 }
 0x220   : > { %4969 = vmatpush1.bf16.msra.mxu1 %v4968_v51  ;;  %v5987_v23 = vunpack.i.h.bf16 %v5985_v56  ;;  %v5986_v54 = vunpack.i.l.bf16 %v5985_v56  ;;  %v2803_v19 = vsel %vm1357_vm7, %v8956_v60, %v5976_v17  ;;  %v2804_v10 = vsel %vm1357_vm7, %v5976_v17, %v5977_v46 }
 0x221   : > { %v2978_v20 = vsel %vm1530_vm8, %v5991_v5, %v5992_v62 }
 0x222   : > { %4933 = vmatpush1.bf16.msra.mxu0 %v4932_v0  ;;  %v2977_v3 = vsel %vm1530_vm8, %v5987_v23, %v5991_v5  ;;  %v2975_v55 = vsel %vm1530_vm8, %v8957_v1, %v5986_v54  ;;  %v2976_v6 = vsel %vm1530_vm8, %v5986_v54, %v5987_v23  ;;  %v4970_v31 = vpack.c.bf16 %v2978_v20, %v2806_v27 }
 0x223   : > { %v4936_v15 = vpack.c.bf16 %v2975_v55, %v2803_v19  ;;  %v4972_v28 = vpack.c.bf16 %v2977_v3, %v2805_v30  ;;  %v4934_v59 = vpack.c.bf16 %v2976_v6, %v2804_v10 }
 0x224   : > { %4971 = vmatprep.subr.bf16.mxu1 %v4970_v31 }
 0x225   : > { %4935 = vmatprep.subr.bf16.mxu0 %v4934_v59  ;;  %4973 = vmatpush1.bf16.msra.mxu1 %v4972_v28 }
 0x226   : > { %4937 = vmatpush1.bf16.msra.mxu0 %v4936_v15 }
 0x228   : > { %4394 = vmatmul.mubr.f32.vlgmr.msra.gmra.mrb[20].mxu1 %v8074_v2  ;;  %v8480_v42 = vpop.permute.xlu1 %3472 }
 0x229   : > { %4317 = vmatmul.mubr.f32.vlgmr.msra.gmra.mrb[20].mxu0 %v8074_v2  ;;  %4539 = vmatprep.mubr.msk.f32.mxu1 %vm3475_vm4, %v8108_v41  ;;  %v8467_v25 = vpop.permute.xlu0 %3467 }
 0x22a   : > { %4537 = vmatprep.mubr.msk.f32.mxu0 %vm3475_vm4, %v8108_v41 }
 0x22c   : > { %4400 = vmatmul.mubr.f32.gmra.mrb[22].mxu1 %v8123_v13 }
 0x22d   : > { %4323 = vmatmul.mubr.f32.gmra.mrb[22].mxu0 %v8123_v13 }
 0x233   : > { %v3625_v34 = vpop.f32.mrb[0].mxu1 }
 0x234   : > { %v3626_v2 = vadd.f32 %v3625_v34, %v8467_v25  ;;  %v3627_v41 = vpop.f32.mrb[1].mxu1 }
 0x235   : > { %v3628_v7 = vadd.f32 %v3627_v41, %v8467_v25 }
 0x236   : > { %4408 = vst [vmem:[%s8472_s26 + $0x10] sm:$0xff] %v3626_v2 }
 0x237   : > { %v3548_v13 = vpop.f32.mrb[0].mxu0  ;;  %4409 = vst [vmem:[%s8472_s26 + $0x18] sm:$0xff] %v3628_v7 }
 0x238   : > { %v3549_v57 = vadd.f32 %v3548_v13, %v8467_v25  ;;  %v3550_v26 = vpop.f32.mrb[1].mxu0 }
 0x239   : > { %v3551_v50 = vadd.f32 %v3550_v26, %v8467_v25 }
 0x23a   : > { %4406 = vst [vmem:[%s8472_s26] sm:$0xff] %v3549_v57 }
 0x23b   : > { %4407 = vst [vmem:[%s8472_s26 + $0x8] sm:$0xff] %v3551_v50 }
 0x23c   : > { %v3554_v53 = vpop.f32.mrb[2].mxu0 }
 0x23d   : > { %v3555_v63 = vadd.f32 %v3554_v53, %v8480_v42  ;;  %v3556_v39 = vpop.f32.mrb[3].mxu0 }
 0x23e   : > { %v3557_v12 = vadd.f32 %v3556_v39, %v8480_v42 }
 0x23f   : > { %4430 = vst [vmem:[%s8472_s26 + $0xc0] sm:$0xff] %v3555_v63  ;;  %v3631_v37 = vpop.f32.mrb[2].mxu1 }
 0x240   : > { %4431 = vst [vmem:[%s8472_s26 + $0xc8] sm:$0xff] %v3557_v12  ;;  %v3632_v52 = vadd.f32 %v3631_v37, %v8480_v42  ;;  %v3633_v4 = vpop.f32.mrb[3].mxu1 }
 0x241   : > { %v3634_v40 = vadd.f32 %v3633_v4, %v8480_v42 }
 0x242   : > { %4432 = vst [vmem:[%s8472_s26 + $0xd0] sm:$0xff] %v3632_v52 }
 0x243   : > { %4433 = vst [vmem:[%s8472_s26 + $0xd8] sm:$0xff] %v3634_v40 }
 0x25f   : > { %v3702_v18 = vpop.f32.mrb[4].mxu0  ;;  %v3779_v11 = vpop.f32.mrb[4].mxu1 }
 0x260   : > { %v3703_v16 = vadd.f32 %v3702_v18, %v8467_v25  ;;  %v3704_v24 = vpop.f32.mrb[5].mxu0  ;;  %v3780_v43 = vadd.f32 %v3779_v11, %v8467_v25  ;;  %v3781_v33 = vpop.f32.mrb[5].mxu1 }
 0x261   : > { %v3705_v45 = vadd.f32 %v3704_v24, %v8467_v25  ;;  %v3782_v29 = vadd.f32 %v3781_v33, %v8467_v25 }
 0x262   : > { %4410 = vst [vmem:[%s8472_s26 + $0x20] sm:$0xff] %v3703_v16  ;;  %4412 = vst [vmem:[%s8472_s26 + $0x30] sm:$0xff] %v3780_v43 }
 0x263   : > { %4411 = vst [vmem:[%s8472_s26 + $0x28] sm:$0xff] %v3705_v45  ;;  %4413 = vst [vmem:[%s8472_s26 + $0x38] sm:$0xff] %v3782_v29 }
 0x265   : > { %v3708_v44 = vpop.f32.mrb[6].mxu0 }
 0x266   : > { %v3709_v21 = vadd.f32 %v3708_v44, %v8480_v42  ;;  %v3710_v48 = vpop.f32.mrb[7].mxu0  ;;  %v3785_v61 = vpop.f32.mrb[6].mxu1 }
 0x267   : > { %v3711_v8 = vadd.f32 %v3710_v48, %v8480_v42  ;;  %v3786_v47 = vadd.f32 %v3785_v61, %v8480_v42  ;;  %v3787_v49 = vpop.f32.mrb[7].mxu1 }
 0x268   : > { %4434 = vst [vmem:[%s8472_s26 + $0xe0] sm:$0xff] %v3709_v21  ;;  %v3788_v58 = vadd.f32 %v3787_v49, %v8480_v42 }
 0x269   : > { %4435 = vst [vmem:[%s8472_s26 + $0xe8] sm:$0xff] %v3711_v8  ;;  %4436 = vst [vmem:[%s8472_s26 + $0xf0] sm:$0xff] %v3786_v47 }
 0x26a   : > { %4437 = vst [vmem:[%s8472_s26 + $0xf8] sm:$0xff] %v3788_v58 }
 0x286   : > { %v3933_v51 = vpop.f32.mrb[8].mxu1 }
 0x287   : > { %v3856_v35 = vpop.f32.mrb[8].mxu0  ;;  %v3934_v38 = vadd.f32 %v3933_v51, %v8467_v25  ;;  %v3935_v32 = vpop.f32.mrb[9].mxu1 }
 0x288   : > { %v3857_v0 = vadd.f32 %v3856_v35, %v8467_v25  ;;  %v3858_v36 = vpop.f32.mrb[9].mxu0  ;;  %v3936_v9 = vadd.f32 %v3935_v32, %v8467_v25 }
 0x289   : > { %v3859_v14 = vadd.f32 %v3858_v36, %v8467_v25  ;;  %4416 = vst [vmem:[%s8472_s26 + $0x50] sm:$0xff] %v3934_v38 }
 0x28a   : > { %4414 = vst [vmem:[%s8472_s26 + $0x40] sm:$0xff] %v3857_v0  ;;  %4417 = vst [vmem:[%s8472_s26 + $0x58] sm:$0xff] %v3936_v9  ;;  %v3939_v22 = vpop.f32.mrb[10].mxu1 }
 0x28b   : > { %4415 = vst [vmem:[%s8472_s26 + $0x48] sm:$0xff] %v3859_v14  ;;  %v3862_v46 = vpop.f32.mrb[10].mxu0  ;;  %v3940_v5 = vadd.f32 %v3939_v22, %v8480_v42  ;;  %v3941_v23 = vpop.f32.mrb[11].mxu1 }
 0x28c   : > { %v3863_v17 = vadd.f32 %v3862_v46, %v8480_v42  ;;  %v3864_v62 = vpop.f32.mrb[11].mxu0  ;;  %v3942_v54 = vadd.f32 %v3941_v23, %v8480_v42 }
 0x28d   : > { %v3865_v56 = vadd.f32 %v3864_v62, %v8480_v42  ;;  %4440 = vst [vmem:[%s8472_s26 + $0x110] sm:$0xff] %v3940_v5 }
 0x28e   : > { %4438 = vst [vmem:[%s8472_s26 + $0x100] sm:$0xff] %v3863_v17  ;;  %4441 = vst [vmem:[%s8472_s26 + $0x118] sm:$0xff] %v3942_v54 }
 0x28f   : > { %4439 = vst [vmem:[%s8472_s26 + $0x108] sm:$0xff] %v3865_v56 }
 0x2ae   : > { %v4010_v27 = vpop.f32.mrb[12].mxu0  ;;  %v4087_v30 = vpop.f32.mrb[12].mxu1 }
 0x2af   : > { %v4011_v60 = vadd.f32 %v4010_v27, %v8467_v25  ;;  %v4088_v19 = vadd.f32 %v4087_v30, %v8467_v25  ;;  %v4012_v10 = vpop.f32.mrb[13].mxu0  ;;  %v4089_v20 = vpop.f32.mrb[13].mxu1 }
 0x2b0   : > { %v4013_v3 = vadd.f32 %v4012_v10, %v8467_v25  ;;  %v4090_v1 = vadd.f32 %v4089_v20, %v8467_v25 }
 0x2b1   : > { %4418 = vst [vmem:[%s8472_s26 + $0x60] sm:$0xff] %v4011_v60  ;;  %4420 = vst [vmem:[%s8472_s26 + $0x70] sm:$0xff] %v4088_v19 }
 0x2b2   : > { %4419 = vst [vmem:[%s8472_s26 + $0x68] sm:$0xff] %v4013_v3  ;;  %4421 = vst [vmem:[%s8472_s26 + $0x78] sm:$0xff] %v4090_v1  ;;  %v4016_v55 = vpop.f32.mrb[14].mxu0 }
 0x2b3   : > { %v4017_v6 = vadd.f32 %v4016_v55, %v8480_v42  ;;  %v4018_v31 = vpop.f32.mrb[15].mxu0 }
 0x2b4   : > { %v4019_v15 = vadd.f32 %v4018_v31, %v8480_v42 }
 0x2b5   : > { %4442 = vst [vmem:[%s8472_s26 + $0x120] sm:$0xff] %v4017_v6  ;;  %v4093_v28 = vpop.f32.mrb[14].mxu1 }
 0x2b6   : > { %v4094_v59 = vadd.f32 %v4093_v28, %v8480_v42  ;;  %4443 = vst [vmem:[%s8472_s26 + $0x128] sm:$0xff] %v4019_v15  ;;  %v4095_v34 = vpop.f32.mrb[15].mxu1 }
 0x2b7   : > { %v4096_v2 = vadd.f32 %v4095_v34, %v8480_v42 }
 0x2b8   : > { %4444 = vst [vmem:[%s8472_s26 + $0x130] sm:$0xff] %v4094_v59 }
 0x2b9   : > { %4445 = vst [vmem:[%s8472_s26 + $0x138] sm:$0xff] %v4096_v2 }
 0x2d6   : > { %v4241_v41 = vpop.f32.mrb[16].mxu1 }
 0x2d7   : > { %v4242_v7 = vadd.f32 %v4241_v41, %v8467_v25  ;;  %v4243_v13 = vpop.f32.mrb[17].mxu1 }
 0x2d8   : > { %v4164_v57 = vpop.f32.mrb[16].mxu0  ;;  %v4244_v26 = vadd.f32 %v4243_v13, %v8467_v25 }
 0x2d9   : > { %v4165_v50 = vadd.f32 %v4164_v57, %v8467_v25  ;;  %4424 = vst [vmem:[%s8472_s26 + $0x90] sm:$0xff] %v4242_v7  ;;  %v4166_v53 = vpop.f32.mrb[17].mxu0 }
 0x2da   : > { %v4167_v63 = vadd.f32 %v4166_v53, %v8467_v25  ;;  %4425 = vst [vmem:[%s8472_s26 + $0x98] sm:$0xff] %v4244_v26  ;;  %v4247_v39 = vpop.f32.mrb[18].mxu1 }
 0x2db   : > { %4422 = vst [vmem:[%s8472_s26 + $0x80] sm:$0xff] %v4165_v50  ;;  %v4248_v12 = vadd.f32 %v4247_v39, %v8480_v42  ;;  %v4249_v37 = vpop.f32.mrb[19].mxu1 }
 0x2dc   : > { %4423 = vst [vmem:[%s8472_s26 + $0x88] sm:$0xff] %v4167_v63  ;;  %v4250_v52 = vadd.f32 %v4249_v37, %v8480_v42  ;;  %v4170_v4 = vpop.f32.mrb[18].mxu0 }
 0x2dd   : > { %4448 = vst [vmem:[%s8472_s26 + $0x150] sm:$0xff] %v4248_v12  ;;  %v4171_v40 = vadd.f32 %v4170_v4, %v8480_v42  ;;  %v4172_v18 = vpop.f32.mrb[19].mxu0 }
 0x2de   : > { %4449 = vst [vmem:[%s8472_s26 + $0x158] sm:$0xff] %v4250_v52  ;;  %v4173_v16 = vadd.f32 %v4172_v18, %v8480_v42 }
 0x2df   : > { %4446 = vst [vmem:[%s8472_s26 + $0x140] sm:$0xff] %v4171_v40 }
 0x2e0   : > { %4447 = vst [vmem:[%s8472_s26 + $0x148] sm:$0xff] %v4173_v16 }
 0x2fb   : > { %v4395_v11 = vpop.f32.mrb[20].mxu1 }
 0x2fc   : > { %v4318_v24 = vpop.f32.mrb[20].mxu0  ;;  %v4396_v43 = vadd.f32 %v4395_v11, %v8467_v25  ;;  %v4397_v45 = vpop.f32.mrb[21].mxu1 }
 0x2fd   : > { %v4319_v33 = vadd.f32 %v4318_v24, %v8467_v25  ;;  %v4320_v29 = vpop.f32.mrb[21].mxu0  ;;  %v4398_v44 = vadd.f32 %v4397_v45, %v8467_v25 }
 0x2fe   : > { %4428 = vst [vmem:[%s8472_s26 + $0xb0] sm:$0xff] %v4396_v43  ;;  %v4321_v21 = vadd.f32 %v4320_v29, %v8467_v25 }
 0x2ff   : > { %4426 = vst [vmem:[%s8472_s26 + $0xa0] sm:$0xff] %v4319_v33  ;;  %4429 = vst [vmem:[%s8472_s26 + $0xb8] sm:$0xff] %v4398_v44  ;;  %v4401_v48 = vpop.f32.mrb[22].mxu1 }
 0x300   : > { %4427 = vst [vmem:[%s8472_s26 + $0xa8] sm:$0xff] %v4321_v21  ;;  %v4324_v8 = vpop.f32.mrb[22].mxu0  ;;  %v4402_v61 = vadd.f32 %v4401_v48, %v8480_v42  ;;  %v4403_v47 = vpop.f32.mrb[23].mxu1 }
 0x301   : > { %v4325_v49 = vadd.f32 %v4324_v8, %v8480_v42  ;;  %v4326_v58 = vpop.f32.mrb[23].mxu0  ;;  %v4404_v35 = vadd.f32 %v4403_v47, %v8480_v42 }
 0x302   : > { %4452 = vst [vmem:[%s8472_s26 + $0x170] sm:$0xff] %v4402_v61  ;;  %v4327_v0 = vadd.f32 %v4326_v58, %v8480_v42 }
 0x303   : > { %4450 = vst [vmem:[%s8472_s26 + $0x160] sm:$0xff] %v4325_v49  ;;  %4453 = vst [vmem:[%s8472_s26 + $0x178] sm:$0xff] %v4404_v35 }
 0x304   : > { %4451 = vst [vmem:[%s8472_s26 + $0x168] sm:$0xff] %v4327_v0 }
 0x305 PF: > { %s13_s12 = sadd.s32 1, %s6006_s12  }
 0x306   : > { %p10_p4 = scmp.ge.s32.totalorder %s13_s12, 4  }
 0x308   :  { %12 = sbr.rel (!%p10_p4) target bundleno = 1 (0x1), region = 62 }

</bundles_post_ra>
